<compile_context>
chip_gen: v7x
topology: tpu7x:2x2x1
jax: 0.10.0
libtpu: 0.0.40
codegen_flags: <defaults>
</compile_context>

<pallas_src>
import math
import functools

import jax
import jax.numpy as jnp
from jax import lax
from jax.experimental import pallas as pl
from jax.experimental.pallas import tpu as pltpu


def _softplus(z):
    # matches torch.nn.functional.softplus (beta=1, threshold=20)
    return jnp.where(z > 20.0, z, jnp.log1p(jnp.exp(z)))


def _residual_block_kernel(x_ref, w_norm_ref, W1_ref, b1_ref,
                           convw_ref, convb_ref,
                           Wp_ref, bd_ref, A_logT_ref, Dp_ref,
                           Wo_ref, bo_ref,
                           out_ref,
                           h_scr, hist_scr, bm_scr, cm_scr, dt_scr, du_scr, y_scr,
                           *, TL, H, E, K):
    """Processes one (batch b, seq-chunk c) tile of shape (TL, H)."""
    chunk = pl.program_id(1)

    # Reset the cross-chunk carried state at the start of every batch row.
    @pl.when(chunk == 0)
    def _init():
        h_scr[...] = jnp.zeros((H, E), jnp.float32)
        hist_scr[...] = jnp.zeros((8, E), jnp.float32)

    x = x_ref[...].astype(jnp.float32)                      # (TL, H) original input

    # ---- RMSNorm (f32) ----
    ms = jnp.mean(x * x, axis=-1, keepdims=True)
    xn = x * lax.rsqrt(ms + 1e-5) * w_norm_ref[...]

    # ---- fused in-projection: [xe | skip] = xn @ [W1x | W1s] + [b1x | b1s] ----
    # TODO(synk): feed bf16 operands to the MXU on real TPUs; kept f32 here so
    # the kernel also executes on backends without BF16xBF16=F32 dot support.
    xe_skip = jnp.dot(xn, W1_ref[...], preferred_element_type=jnp.float32) + b1_ref[...]
    xe = xe_skip[:, :E]                                     # (TL, E)
    skip = xe_skip[:, E:]                                   # (TL, E)

    # ---- CausalConv1d: depthwise causal conv along the sequence axis.
    #      Only the last K-1 (<= 8) rows of the previous chunk's xe are needed
    #      as causal history across the chunk boundary. ----
    prev_tail = hist_scr[...]                               # (8, E)
    acc = jnp.zeros((TL, E), jnp.float32) + convb_ref[...]
    for k in range(K):                                      # K is a small static constant
        s = K - 1 - k                                       # causal shift
        if s == 0:
            shifted = xe
        else:
            # shifted[t] = xe_global[t - s]; rows t<s come from the prev chunk tail.
            shifted = jnp.concatenate([prev_tail[8 - s:, :], xe[:TL - s, :]], axis=0)
        acc = acc + convw_ref[k:k + 1, :] * shifted
    hist_scr[...] = xe[TL - 8:, :]                          # conv history for the next chunk
    xs = acc * jax.nn.sigmoid(acc)                          # SiLU, (TL, E), f32

    # ---- fused SSM parameter projection:
    #      [B | C | dt_pre] = xs @ [WpB | WpC | WpD @ Wd]  (dt low-rank folded) ----
    pbc = jnp.dot(xs, Wp_ref[...], preferred_element_type=jnp.float32)   # (TL, 2H+E)
    Bm = pbc[:, :H]
    Cm = pbc[:, H:2 * H]
    dt = _softplus(pbc[:, 2 * H:] + bd_ref[...]) * (1.0 / math.sqrt(E))  # (TL, E)

    bm_scr[...] = Bm
    cm_scr[...] = Cm
    dt_scr[...] = dt
    du_scr[...] = dt * xs

    AT = -jnp.exp(A_logT_ref[...])                          # (H, E) == A transposed

    # ---- selective scan (equivalent to the torch pscan log-space cumsum) ----
    #   h_l = exp(dt_l * A) * h_{l-1} + sign(dBu_l) * max(|dBu_l|, 1e-12)
    #   y_l[d] = sum_n C_l[n] * h_l[n, d]
    # h is carried in registers across a fori_loop over 8-step sub-blocks; each
    # sub-block transposes its (8, H) B/C slice once so the per-step column
    # extraction is an O(H) static lane slice, and the 8 inner steps are
    # statically unrolled (overlaps next-step exp/VPU work with the dependent
    # multiply-add).  All scan math stays in f32 (v5e has no bf16 VPU/EUP).
    SB = 8

    def block_body(blk, h):
        base = pl.multiple_of(blk * SB, SB)
        dt_blk = dt_scr[pl.ds(base, SB), :]                 # (8, E)
        du_blk = du_scr[pl.ds(base, SB), :]                 # (8, E)
        bT = bm_scr[pl.ds(base, SB), :].T                   # (H, 8)
        cT = cm_scr[pl.ds(base, SB), :].T                   # (H, 8)
        y_rows = []
        for j in range(SB):                                 # static unroll
            dA = dt_blk[j:j + 1, :] * AT                    # (H, E)
            dBu = du_blk[j:j + 1, :] * bT[:, j:j + 1]       # (H, E)
            mag = jnp.maximum(jnp.abs(dBu), 1e-12)          # complex_log eps clamp
            v = jnp.where(dBu < 0, -mag, mag)
            h = jnp.exp(dA) * h + v
            y_rows.append(jnp.sum(cT[:, j:j + 1] * h, axis=0, keepdims=True))
        y_scr[pl.ds(base, SB), :] = jnp.concatenate(y_rows, axis=0)
        return h

    # TODO(synk): for very large H*E, fall back to keeping h in VMEM scratch
    # inside the loop instead of the register carry to avoid spills.
    h_final = lax.fori_loop(0, TL // SB, block_body, h_scr[...])
    h_scr[...] = h_final                                    # carried to the next chunk

    # ---- + u*D, gate with SiLU(skip), output projection (MXU), residual ----
    y = y_scr[...] + xs * Dp_ref[...]
    yg = y * (skip * jax.nn.sigmoid(skip))
    out = jnp.dot(yg, Wo_ref[...], preferred_element_type=jnp.float32) + bo_ref[...]
    out_ref[...] = (out + x).astype(out_ref.dtype)
    # TODO(synk): if production H < 128, pad H to 128 (or fold chunks into the
    # lane dim) so the residual/store path is lane-dense instead of vst.msk.


def _pick_vmem_limit():
    try:
        kind = jax.devices()[0].device_kind.lower()
    except Exception:
        kind = ""
    if "v5" in kind or "v6" in kind:
        return 100 * 1024 * 1024        # v5e / v6e have 128 MiB physical VMEM
    return 48 * 1024 * 1024             # v7x has 64 MiB/TC; stay conservative elsewhere


def fuse_params(params):
    """Fold / concatenate the module weights for the kernel's fused matmuls."""
    p = {k: v.astype(jnp.float32) for k, v in params.items()}
    W_dt = p["WpD"] @ p["Wd"]           # exact fold: no nonlinearity between the two linears
    return dict(
        w_norm=p["w_norm"],
        W1=jnp.concatenate([p["W1x"], p["W1s"]], axis=1),          # (H, 2E)
        b1=jnp.concatenate([p["b1x"], p["b1s"]], axis=1),          # (1, 2E)
        convw=p["convw"], convb=p["convb"],
        Wp=jnp.concatenate([p["WpB"], p["WpC"], W_dt], axis=1),    # (E, 2H + E)
        bd=p["bd"], A_logT=p["A_logT"], Dp=p["Dp"],
        Wo=p["Wo"], bo=p["bo"],
    )


def residual_block(x, params, *, kernel_size, expansion_factor, seq_tile=128):
    Bsz, L, H = x.shape
    E = H * expansion_factor
    K = kernel_size
    TL = min(seq_tile, L)
    assert 1 <= K <= 9, "kernel_size - 1 must fit in the 8-row conv history"
    assert TL % 8 == 0 and L % TL == 0, "seq tile must be a multiple of 8 dividing seq_len"
    NC = L // TL

    fused = fuse_params(params)
    weight_order = ["w_norm", "W1", "b1", "convw", "convb", "Wp", "bd",
                    "A_logT", "Dp", "Wo", "bo"]
    weights = [fused[k] for k in weight_order]

    kernel = functools.partial(_residual_block_kernel, TL=TL, H=H, E=E, K=K)

    # Weights: full-array blocks, constant index_map (held in VMEM across the grid).
    # TODO(synk): single-buffer the weight inputs (pipeline_mode=pl.Buffered(1) or a
    # manual persistent-VMEM copy) to halve their VMEM footprint on v7x.
    def rep_spec(arr):
        return pl.BlockSpec(arr.shape, lambda b, c, nd=arr.ndim: (0,) * nd)

    in_specs = [pl.BlockSpec((None, TL, H), lambda b, c: (b, c, 0))]
    in_specs += [rep_spec(w) for w in weights]
    out_spec = pl.BlockSpec((None, TL, H), lambda b, c: (b, c, 0))

    T = Bsz * L
    matmul_flops = 2 * T * (H * 2 * E + E * (2 * H + E) + E * H)
    scan_flops = 8 * T * H * E
    transcendentals = T * (H * E + 4 * E)
    bytes_accessed = (2 * x.size * x.dtype.itemsize
                      + sum(int(w.size) * w.dtype.itemsize for w in weights))

    return pl.pallas_call(
        kernel,
        out_shape=jax.ShapeDtypeStruct((Bsz, L, H), x.dtype),
        grid_spec=pltpu.PrefetchScalarGridSpec(
            num_scalar_prefetch=0,
            grid=(Bsz, NC),                 # batch "parallel" (megacore; keep Bsz >= 2 on v7x),
            in_specs=in_specs,              # seq chunks sequential (carried state)
            out_specs=out_spec,
            scratch_shapes=[
                pltpu.VMEM((H, E), jnp.float32),    # h: selective-scan state (carried)
                pltpu.VMEM((8, E), jnp.float32),    # last rows of prev chunk's xe (conv history)
                pltpu.VMEM((TL, H), jnp.float32),   # B
                pltpu.VMEM((TL, H), jnp.float32),   # C
                pltpu.VMEM((TL, E), jnp.float32),   # dt
                pltpu.VMEM((TL, E), jnp.float32),   # dt * u
                pltpu.VMEM((TL, E), jnp.float32),   # y rows
            ],
        ),
        compiler_params=pltpu.CompilerParams(
            dimension_semantics=("parallel", "arbitrary"),
            vmem_limit_bytes=_pick_vmem_limit(),
        ),
        cost_estimate=pl.CostEstimate(
            flops=int(matmul_flops + scan_flops),
            transcendentals=int(transcendentals),
            bytes_accessed=int(bytes_accessed),
        ),
    )(x, *weights)


def make_params(key, hidden_size, kernel_size, expansion_factor, dt_rank):
    """Module-faithful (unfused) parameters, all f32."""
    H = hidden_size
    E = H * expansion_factor
    K = kernel_size
    R = math.ceil(H / 16) if dt_rank == "auto" else dt_rank
    ks = jax.random.split(key, 13)
    s = 0.1
    params = dict(
        # RMSNorm weight (init = ones, like the module)
        w_norm=jnp.ones((1, H), jnp.float32),
        # expanded_hidden_state: Linear(H, 2E) split into x / skip halves
        W1x=jax.random.normal(ks[0], (H, E), jnp.float32) * s,
        b1x=jax.random.normal(ks[1], (1, E), jnp.float32) * s,
        W1s=jax.random.normal(ks[2], (H, E), jnp.float32) * s,
        b1s=jax.random.normal(ks[3], (1, E), jnp.float32) * s,
        # depthwise causal conv1d (channels=E, kernel=K): weight (K, E), bias (1, E)
        convw=jax.random.normal(ks[4], (K, E), jnp.float32) * s,
        convb=jax.random.normal(ks[5], (1, E), jnp.float32) * s,
        # param_linear: Linear(E, R + 2H, bias=False), split into dt / B / C parts
        WpD=jax.random.normal(ks[6], (E, R), jnp.float32) * s,
        WpB=jax.random.normal(ks[7], (E, H), jnp.float32) * s,
        WpC=jax.random.normal(ks[8], (E, H), jnp.float32) * s,
        # dt_linear: Linear(R, E)
        Wd=jax.random.normal(ks[9], (R, E), jnp.float32) * s,
        bd=jax.random.normal(ks[10], (1, E), jnp.float32) * s,
        # A_log = log(ones(E, H)) = zeros, D = ones(E) as in MambaBlock.__init__
        # (A stored transposed as (H, E) for the kernel's h[n, d] layout)
        A_logT=jnp.zeros((H, E), jnp.float32),
        Dp=jnp.ones((1, E), jnp.float32),
        # output_state: Linear(E, H)
        Wo=jax.random.normal(ks[11], (E, H), jnp.float32) * s,
        bo=jax.random.normal(ks[12], (1, H), jnp.float32) * s,
    )
    return params, R


def residual_block_ref(x, params, *, kernel_size, expansion_factor):
    """Pure-JAX f32 reference (same math as the torch module, unfused weights)."""
    p = {k: v.astype(jnp.float32) for k, v in params.items()}
    Bsz, L, H = x.shape
    E = H * expansion_factor
    K = kernel_size
    xf = x.astype(jnp.float32)
    ms = jnp.mean(xf * xf, axis=-1, keepdims=True)
    xn = xf * lax.rsqrt(ms + 1e-5) * p["w_norm"][0]
    xe = xn @ p["W1x"] + p["b1x"][0]
    skip = xn @ p["W1s"] + p["b1s"][0]
    xpad = jnp.pad(xe, ((0, 0), (K - 1, 0), (0, 0)))
    xc = p["convb"][0] + sum(p["convw"][k] * xpad[:, k:k + L, :] for k in range(K))
    xs = xc * jax.nn.sigmoid(xc)
    d_r = xs @ p["WpD"]
    Bm = xs @ p["WpB"]
    Cm = xs @ p["WpC"]
    dt = _softplus(d_r @ p["Wd"] + p["bd"][0]) / math.sqrt(E)
    A = -jnp.exp(p["A_logT"].T)                              # (E, H)
    dA = jnp.einsum("bld,dn->bldn", dt, A)
    dBu = jnp.einsum("bld,bld,bln->bldn", dt, xs, Bm)
    mag = jnp.maximum(jnp.abs(dBu), 1e-12)
    v = jnp.where(dBu < 0, -mag, mag)

    def step(h, inp):
        da, vv = inp
        h = jnp.exp(da) * h + vv
        return h, h

    h0 = jnp.zeros((Bsz, E, H), jnp.float32)
    _, hs = lax.scan(step, h0, (jnp.moveaxis(dA, 1, 0), jnp.moveaxis(v, 1, 0)))
    hs = jnp.moveaxis(hs, 0, 1)                              # (B, L, E, H)
    y = jnp.einsum("bldn,bln->bld", hs, Cm) + xs * p["Dp"][0]
    yg = y * (skip * jax.nn.sigmoid(skip))
    out = yg @ p["Wo"] + p["bo"][0]
    return (out + xf).astype(x.dtype)


if __name__ == "__main__":
    hidden_size = 32
    kernel_size = 4
    expansion_factor = 2
    dt_rank = "auto"          # -> ceil(32/16) = 2
    batch, seq = 2, 256       # 2 sequence chunks of 128 -> exercises the cross-chunk carry
    seq_tile = 128            # >=128 per the tile-size sweep (single biggest lever)

    key = jax.random.PRNGKey(0)
    kx, kp = jax.random.split(key)
    params, _ = make_params(kp, hidden_size, kernel_size, expansion_factor, dt_rank)
    x = jax.random.normal(kx, (batch, seq, hidden_size), jnp.float32)

    out = residual_block(x, params, kernel_size=kernel_size,
                         expansion_factor=expansion_factor, seq_tile=seq_tile)
    out = jax.block_until_ready(out)
    assert out.shape == (batch, seq, hidden_size)

    ref = residual_block_ref(x, params, kernel_size=kernel_size,
                             expansion_factor=expansion_factor)
    err = float(jnp.max(jnp.abs(out - ref)))
    # all matmuls / scan math run in f32 -> tight tolerance
    assert jnp.allclose(out, ref, atol=1e-2, rtol=1e-2), err
    print("KERNEL_OK")
</pallas_src>

<mosaic_0001>
module attributes {stable_mosaic.version = 11 : i64} {
  func.func @_residual_block_kernel(%arg0: i32, %arg1: i32, %arg2: memref<1x128x32xf32, #tpu.memory_space<vmem>>, %arg3: memref<1x32xf32, #tpu.memory_space<vmem>>, %arg4: memref<32x128xf32, #tpu.memory_space<vmem>>, %arg5: memref<1x128xf32, #tpu.memory_space<vmem>>, %arg6: memref<4x64xf32, #tpu.memory_space<vmem>>, %arg7: memref<1x64xf32, #tpu.memory_space<vmem>>, %arg8: memref<64x128xf32, #tpu.memory_space<vmem>>, %arg9: memref<1x64xf32, #tpu.memory_space<vmem>>, %arg10: memref<32x64xf32, #tpu.memory_space<vmem>>, %arg11: memref<1x64xf32, #tpu.memory_space<vmem>>, %arg12: memref<64x32xf32, #tpu.memory_space<vmem>>, %arg13: memref<1x32xf32, #tpu.memory_space<vmem>>, %arg14: memref<1x128x32xf32, #tpu.memory_space<vmem>>, %arg15: memref<32x64xf32, #tpu.memory_space<vmem>>, %arg16: memref<8x64xf32, #tpu.memory_space<vmem>>, %arg17: memref<128x32xf32, #tpu.memory_space<vmem>>, %arg18: memref<128x32xf32, #tpu.memory_space<vmem>>, %arg19: memref<128x64xf32, #tpu.memory_space<vmem>>, %arg20: memref<128x64xf32, #tpu.memory_space<vmem>>, %arg21: memref<128x64xf32, #tpu.memory_space<vmem>>) attributes {dimension_semantics = [#tpu.dimension_semantics<parallel>, #tpu.dimension_semantics<arbitrary>], iteration_bounds = array<i64: 2, 2>, scalar_prefetch = 0 : i64, scratch_operands = 7 : i64, tpu.core_type = #tpu.core_type<tc>, window_params = [{transform_indices = @transform_0, window_bounds = array<i64: 1, 128, 32>}, {pipeline_mode = #tpu.pipeline_mode<synchronous>, transform_indices = @transform_1, window_bounds = array<i64: 1, 32>}, {pipeline_mode = #tpu.pipeline_mode<synchronous>, transform_indices = @transform_2, window_bounds = array<i64: 32, 128>}, {pipeline_mode = #tpu.pipeline_mode<synchronous>, transform_indices = @transform_3, window_bounds = array<i64: 1, 128>}, {pipeline_mode = #tpu.pipeline_mode<synchronous>, transform_indices = @transform_4, window_bounds = array<i64: 4, 64>}, {pipeline_mode = #tpu.pipeline_mode<synchronous>, transform_indices = @transform_5, window_bounds = array<i64: 1, 64>}, {pipeline_mode = #tpu.pipeline_mode<synchronous>, transform_indices = @transform_6, window_bounds = array<i64: 64, 128>}, {pipeline_mode = #tpu.pipeline_mode<synchronous>, transform_indices = @transform_7, window_bounds = array<i64: 1, 64>}, {pipeline_mode = #tpu.pipeline_mode<synchronous>, transform_indices = @transform_8, window_bounds = array<i64: 32, 64>}, {pipeline_mode = #tpu.pipeline_mode<synchronous>, transform_indices = @transform_9, window_bounds = array<i64: 1, 64>}, {pipeline_mode = #tpu.pipeline_mode<synchronous>, transform_indices = @transform_10, window_bounds = array<i64: 64, 32>}, {pipeline_mode = #tpu.pipeline_mode<synchronous>, transform_indices = @transform_11, window_bounds = array<i64: 1, 32>}, {transform_indices = @transform_12, window_bounds = array<i64: 1, 128, 32>}]} {
    %c0_i32 = arith.constant 0 : i32
    %0 = arith.cmpi eq, %arg1, %c0_i32 : i32
    %1 = arith.extui %0 : i1 to i32
    %c0_i32_0 = arith.constant 0 : i32
    %2 = arith.cmpi ne, %1, %c0_i32_0 : i32
    scf.if %2 {
      %cst_62 = arith.constant 0.000000e+00 : f32
      %112 = vector.broadcast %cst_62 : f32 to vector<32x64xf32>
      %c0_63 = arith.constant 0 : index
      %c0_64 = arith.constant 0 : index
      %113 = vector.load %arg15[%c0_63, %c0_64] : memref<32x64xf32, #tpu.memory_space<vmem>>, vector<32x64xf32>
      tpu.vector_store %arg15[%c0_63, %c0_64], %112 {strides = array<i32>} : memref<32x64xf32, #tpu.memory_space<vmem>>, vector<32x64xf32>,
      %cst_65 = arith.constant 0.000000e+00 : f32
      %114 = vector.broadcast %cst_65 : f32 to vector<8x64xf32>
      %c0_66 = arith.constant 0 : index
      %c0_67 = arith.constant 0 : index
      %115 = vector.load %arg16[%c0_66, %c0_67] : memref<8x64xf32, #tpu.memory_space<vmem>>, vector<8x64xf32>
      tpu.vector_store %arg16[%c0_66, %c0_67], %114 {strides = array<i32>} : memref<8x64xf32, #tpu.memory_space<vmem>>, vector<8x64xf32>,
    } else {
    }
    %c0 = arith.constant 0 : index
    %c0_1 = arith.constant 0 : index
    %c0_2 = arith.constant 0 : index
    %3 = vector.load %arg2[%c0, %c0_1, %c0_2] : memref<1x128x32xf32, #tpu.memory_space<vmem>>, vector<1x128x32xf32>
    %4 = vector.shape_cast %3 : vector<1x128x32xf32> to vector<128x32xf32>
    %5 = arith.mulf %4, %4 : vector<128x32xf32>
    %cst = arith.constant dense<0.000000e+00> : vector<128xf32>
    %6 = vector.multi_reduction <add>, %5, %cst [1] : vector<128x32xf32> to vector<128xf32>
    %7 = vector.shape_cast %6 : vector<128xf32> to vector<128x1xf32>
    %cst_3 = arith.constant 3.200000e+01 : f32
    %8 = vector.broadcast %cst_3 : f32 to vector<128x1xf32>
    %9 = arith.divf %7, %8 : vector<128x1xf32>
    %cst_4 = arith.constant 9.99999974E-6 : f32
    %10 = vector.broadcast %cst_4 : f32 to vector<128x1xf32>
    %11 = arith.addf %9, %10 : vector<128x1xf32>
    %12 = math.rsqrt %11 : vector<128x1xf32>
    %13 = vector.broadcast %12 : vector<128x1xf32> to vector<128x32xf32>
    %14 = arith.mulf %4, %13 : vector<128x32xf32>
    %c0_5 = arith.constant 0 : index
    %c0_6 = arith.constant 0 : index
    %15 = vector.load %arg3[%c0_5, %c0_6] : memref<1x32xf32, #tpu.memory_space<vmem>>, vector<1x32xf32>
    %16 = vector.broadcast %15 : vector<1x32xf32> to vector<128x32xf32>
    %17 = arith.mulf %14, %16 : vector<128x32xf32>
    %c0_7 = arith.constant 0 : index
    %c0_8 = arith.constant 0 : index
    %18 = vector.load %arg4[%c0_7, %c0_8] : memref<32x128xf32, #tpu.memory_space<vmem>>, vector<32x128xf32>
    %cst_9 = arith.constant dense<0.000000e+00> : vector<128x128xf32>
    %19 = tpu.matmul %17, %18, %cst_9 {dimension_numbers = #tpu.dot_dimension_numbers<[1], [0], [0], [1], [0, 0, 1, 1], [], []>} : vector<128x32xf32>, vector<32x128xf32>, vector<128x128xf32> -> vector<128x128xf32>
    %c0_10 = arith.constant 0 : index
    %c0_11 = arith.constant 0 : index
    %20 = vector.load %arg5[%c0_10, %c0_11] : memref<1x128xf32, #tpu.memory_space<vmem>>, vector<1x128xf32>
    %21 = vector.broadcast %20 : vector<1x128xf32> to vector<128x128xf32>
    %22 = arith.addf %19, %21 : vector<128x128xf32>
    %23 = vector.extract_strided_slice %22 {offsets = [0, 0], sizes = [128, 64], strides = [1, 1]} : vector<128x128xf32> to vector<128x64xf32>
    %24 = vector.extract_strided_slice %22 {offsets = [0, 64], sizes = [128, 64], strides = [1, 1]} : vector<128x128xf32> to vector<128x64xf32>
    %c0_12 = arith.constant 0 : index
    %c0_13 = arith.constant 0 : index
    %25 = vector.load %arg16[%c0_12, %c0_13] : memref<8x64xf32, #tpu.memory_space<vmem>>, vector<8x64xf32>
    %cst_14 = arith.constant 0.000000e+00 : f32
    %26 = vector.broadcast %cst_14 : f32 to vector<128x64xf32>
    %c0_15 = arith.constant 0 : index
    %c0_16 = arith.constant 0 : index
    %27 = vector.load %arg7[%c0_15, %c0_16] : memref<1x64xf32, #tpu.memory_space<vmem>>, vector<1x64xf32>
    %28 = vector.broadcast %27 : vector<1x64xf32> to vector<128x64xf32>
    %29 = arith.addf %26, %28 : vector<128x64xf32>
    %30 = vector.extract_strided_slice %25 {offsets = [5, 0], sizes = [3, 64], strides = [1, 1]} : vector<8x64xf32> to vector<3x64xf32>
    %31 = vector.extract_strided_slice %23 {offsets = [0, 0], sizes = [125, 64], strides = [1, 1]} : vector<128x64xf32> to vector<125x64xf32>
    %32 = tpu.concatenate %30, %31 in 0 : vector<3x64xf32>, vector<125x64xf32> -> vector<128x64xf32>
    %c0_17 = arith.constant 0 : index
    %c0_18 = arith.constant 0 : index
    %33 = vector.load %arg6[%c0_17, %c0_18] : memref<4x64xf32, #tpu.memory_space<vmem>>, vector<1x64xf32>
    %34 = vector.broadcast %33 : vector<1x64xf32> to vector<128x64xf32>
    %35 = arith.mulf %34, %32 : vector<128x64xf32>
    %36 = arith.addf %29, %35 : vector<128x64xf32>
    %37 = vector.extract_strided_slice %25 {offsets = [6, 0], sizes = [2, 64], strides = [1, 1]} : vector<8x64xf32> to vector<2x64xf32>
    %38 = vector.extract_strided_slice %23 {offsets = [0, 0], sizes = [126, 64], strides = [1, 1]} : vector<128x64xf32> to vector<126x64xf32>
    %39 = tpu.concatenate %37, %38 in 0 : vector<2x64xf32>, vector<126x64xf32> -> vector<128x64xf32>
    %c1 = arith.constant 1 : index
    %c0_19 = arith.constant 0 : index
    %40 = vector.load %arg6[%c1, %c0_19] : memref<4x64xf32, #tpu.memory_space<vmem>>, vector<1x64xf32>
    %41 = vector.broadcast %40 : vector<1x64xf32> to vector<128x64xf32>
    %42 = arith.mulf %41, %39 : vector<128x64xf32>
    %43 = arith.addf %36, %42 : vector<128x64xf32>
    %44 = vector.extract_strided_slice %25 {offsets = [7, 0], sizes = [1, 64], strides = [1, 1]} : vector<8x64xf32> to vector<1x64xf32>
    %45 = vector.extract_strided_slice %23 {offsets = [0, 0], sizes = [127, 64], strides = [1, 1]} : vector<128x64xf32> to vector<127x64xf32>
    %46 = tpu.concatenate %44, %45 in 0 : vector<1x64xf32>, vector<127x64xf32> -> vector<128x64xf32>
    %c2 = arith.constant 2 : index
    %c0_20 = arith.constant 0 : index
    %47 = vector.load %arg6[%c2, %c0_20] : memref<4x64xf32, #tpu.memory_space<vmem>>, vector<1x64xf32>
    %48 = vector.broadcast %47 : vector<1x64xf32> to vector<128x64xf32>
    %49 = arith.mulf %48, %46 : vector<128x64xf32>
    %50 = arith.addf %43, %49 : vector<128x64xf32>
    %c3 = arith.constant 3 : index
    %c0_21 = arith.constant 0 : index
    %51 = vector.load %arg6[%c3, %c0_21] : memref<4x64xf32, #tpu.memory_space<vmem>>, vector<1x64xf32>
    %52 = vector.broadcast %51 : vector<1x64xf32> to vector<128x64xf32>
    %53 = arith.mulf %52, %23 : vector<128x64xf32>
    %54 = arith.addf %50, %53 : vector<128x64xf32>
    %55 = vector.extract_strided_slice %23 {offsets = [120, 0], sizes = [8, 64], strides = [1, 1]} : vector<128x64xf32> to vector<8x64xf32>
    %c0_22 = arith.constant 0 : index
    %c0_23 = arith.constant 0 : index
    %56 = vector.load %arg16[%c0_22, %c0_23] : memref<8x64xf32, #tpu.memory_space<vmem>>, vector<8x64xf32>
    tpu.vector_store %arg16[%c0_22, %c0_23], %55 {strides = array<i32>} : memref<8x64xf32, #tpu.memory_space<vmem>>, vector<8x64xf32>,
    %57 = arith.negf %54 : vector<128x64xf32>
    %58 = math.exp %57 : vector<128x64xf32>
    %cst_24 = arith.constant 1.000000e+00 : f32
    %59 = vector.broadcast %cst_24 : f32 to vector<128x64xf32>
    %60 = arith.addf %59, %58 : vector<128x64xf32>
    %61 = arith.divf %59, %60 : vector<128x64xf32>
    %62 = arith.mulf %54, %61 : vector<128x64xf32>
    %c0_25 = arith.constant 0 : index
    %c0_26 = arith.constant 0 : index
    %63 = vector.load %arg8[%c0_25, %c0_26] : memref<64x128xf32, #tpu.memory_space<vmem>>, vector<64x128xf32>
    %cst_27 = arith.constant dense<0.000000e+00> : vector<128x128xf32>
    %64 = tpu.matmul %62, %63, %cst_27 {dimension_numbers = #tpu.dot_dimension_numbers<[1], [0], [0], [1], [0, 0, 1, 1], [], []>} : vector<128x64xf32>, vector<64x128xf32>, vector<128x128xf32> -> vector<128x128xf32>
    %65 = vector.extract_strided_slice %64 {offsets = [0, 0], sizes = [128, 32], strides = [1, 1]} : vector<128x128xf32> to vector<128x32xf32>
    %66 = vector.extract_strided_slice %64 {offsets = [0, 32], sizes = [128, 32], strides = [1, 1]} : vector<128x128xf32> to vector<128x32xf32>
    %67 = vector.extract_strided_slice %64 {offsets = [0, 64], sizes = [128, 64], strides = [1, 1]} : vector<128x128xf32> to vector<128x64xf32>
    %c0_28 = arith.constant 0 : index
    %c0_29 = arith.constant 0 : index
    %68 = vector.load %arg9[%c0_28, %c0_29] : memref<1x64xf32, #tpu.memory_space<vmem>>, vector<1x64xf32>
    %69 = vector.broadcast %68 : vector<1x64xf32> to vector<128x64xf32>
    %70 = arith.addf %67, %69 : vector<128x64xf32>
    %cst_30 = arith.constant 2.000000e+01 : f32
    %71 = vector.broadcast %cst_30 : f32 to vector<128x64xf32>
    %72 = arith.cmpf ogt, %70, %71 : vector<128x64xf32>
    %73 = math.exp %70 : vector<128x64xf32>
    %74 = math.log1p %73 : vector<128x64xf32>
    %75 = arith.select %72, %70, %74 : vector<128x64xi1>, vector<128x64xf32>
    %cst_31 = arith.constant 1.250000e-01 : f32
    %76 = vector.broadcast %cst_31 : f32 to vector<128x64xf32>
    %77 = arith.mulf %75, %76 : vector<128x64xf32>
    %c0_32 = arith.constant 0 : index
    %c0_33 = arith.constant 0 : index
    %78 = vector.load %arg17[%c0_32, %c0_33] : memref<128x32xf32, #tpu.memory_space<vmem>>, vector<128x32xf32>
    tpu.vector_store %arg17[%c0_32, %c0_33], %65 {strides = array<i32>} : memref<128x32xf32, #tpu.memory_space<vmem>>, vector<128x32xf32>,
    %c0_34 = arith.constant 0 : index
    %c0_35 = arith.constant 0 : index
    %79 = vector.load %arg18[%c0_34, %c0_35] : memref<128x32xf32, #tpu.memory_space<vmem>>, vector<128x32xf32>
    tpu.vector_store %arg18[%c0_34, %c0_35], %66 {strides = array<i32>} : memref<128x32xf32, #tpu.memory_space<vmem>>, vector<128x32xf32>,
    %c0_36 = arith.constant 0 : index
    %c0_37 = arith.constant 0 : index
    %80 = vector.load %arg19[%c0_36, %c0_37] : memref<128x64xf32, #tpu.memory_space<vmem>>, vector<128x64xf32>
    tpu.vector_store %arg19[%c0_36, %c0_37], %77 {strides = array<i32>} : memref<128x64xf32, #tpu.memory_space<vmem>>, vector<128x64xf32>,
    %81 = arith.mulf %77, %62 : vector<128x64xf32>
    %c0_38 = arith.constant 0 : index
    %c0_39 = arith.constant 0 : index
    %82 = vector.load %arg20[%c0_38, %c0_39] : memref<128x64xf32, #tpu.memory_space<vmem>>, vector<128x64xf32>
    tpu.vector_store %arg20[%c0_38, %c0_39], %81 {strides = array<i32>} : memref<128x64xf32, #tpu.memory_space<vmem>>, vector<128x64xf32>,
    %c0_40 = arith.constant 0 : index
    %c0_41 = arith.constant 0 : index
    %83 = vector.load %arg10[%c0_40, %c0_41] : memref<32x64xf32, #tpu.memory_space<vmem>>, vector<32x64xf32>
    %84 = math.exp %83 : vector<32x64xf32>
    %cst_42 = arith.constant 0.000000e+00 : f32
    %85 = vector.broadcast %cst_42 : f32 to vector<32x64xf32>
    %86 = arith.subf %85, %84 : vector<32x64xf32>
    %c0_43 = arith.constant 0 : index
    %c0_44 = arith.constant 0 : index
    %87 = vector.load %arg15[%c0_43, %c0_44] : memref<32x64xf32, #tpu.memory_space<vmem>>, vector<32x64xf32>
    %c0_i32_45 = arith.constant 0 : i32
    %c16_i32 = arith.constant 16 : i32
    %88 = arith.addi %c0_i32_45, %c16_i32 : i32
    %c1_i32 = arith.constant 1 : i32
    %89 = scf.for %arg22 = %c0_i32_45 to %88 step %c1_i32 iter_args(%arg23 = %87) -> (vector<32x64xf32>)  : i32 {
      %c8_i32 = arith.constant 8 : i32
      %112 = arith.muli %arg22, %c8_i32 : i32
      %113 = tpu.assume_multiple %112, 8 : i32
      %114 = arith.index_cast %113 : i32 to index
      %c0_62 = arith.constant 0 : index
      %115 = vector.load %arg19[%114, %c0_62] : memref<128x64xf32, #tpu.memory_space<vmem>>, vector<8x64xf32>
      %116 = arith.index_cast %113 : i32 to index
      %c0_63 = arith.constant 0 : index
      %117 = vector.load %arg20[%116, %c0_63] : memref<128x64xf32, #tpu.memory_space<vmem>>, vector<8x64xf32>
      %118 = arith.index_cast %113 : i32 to index
      %c0_64 = arith.constant 0 : index
      %119 = vector.load %arg17[%118, %c0_64] : memref<128x32xf32, #tpu.memory_space<vmem>>, vector<8x32xf32>
      %120 = tpu.transpose %119, [1, 0] : vector<8x32xf32> -> vector<32x8xf32>
      %121 = arith.index_cast %113 : i32 to index
      %c0_65 = arith.constant 0 : index
      %122 = vector.load %arg18[%121, %c0_65] : memref<128x32xf32, #tpu.memory_space<vmem>>, vector<8x32xf32>
      %123 = tpu.transpose %122, [1, 0] : vector<8x32xf32> -> vector<32x8xf32>
      %124 = vector.extract_strided_slice %115 {offsets = [0, 0], sizes = [1, 64], strides = [1, 1]} : vector<8x64xf32> to vector<1x64xf32>
      %125 = vector.broadcast %124 : vector<1x64xf32> to vector<32x64xf32>
      %126 = arith.mulf %125, %86 : vector<32x64xf32>
      %127 = vector.extract_strided_slice %117 {offsets = [0, 0], sizes = [1, 64], strides = [1, 1]} : vector<8x64xf32> to vector<1x64xf32>
      %128 = vector.extract_strided_slice %120 {offsets = [0, 0], sizes = [32, 1], strides = [1, 1]} : vector<32x8xf32> to vector<32x1xf32>
      %129 = vector.broadcast %127 : vector<1x64xf32> to vector<32x64xf32>
      %130 = vector.broadcast %128 : vector<32x1xf32> to vector<32x64xf32>
      %131 = arith.mulf %129, %130 : vector<32x64xf32>
      %132 = math.absf %131 : vector<32x64xf32>
      %cst_66 = arith.constant 9.99999996E-13 : f32
      %133 = vector.broadcast %cst_66 : f32 to vector<32x64xf32>
      %134 = arith.maximumf %132, %133 : vector<32x64xf32>
      %cst_67 = arith.constant 0.000000e+00 : f32
      %135 = vector.broadcast %cst_67 : f32 to vector<32x64xf32>
      %136 = arith.cmpf olt, %131, %135 : vector<32x64xf32>
      %cst_68 = arith.constant 0.000000e+00 : f32
      %137 = vector.broadcast %cst_68 : f32 to vector<32x64xf32>
      %138 = arith.subf %137, %134 : vector<32x64xf32>
      %139 = arith.select %136, %138, %134 : vector<32x64xi1>, vector<32x64xf32>
      %140 = math.exp %126 : vector<32x64xf32>
      %141 = arith.mulf %140, %arg23 : vector<32x64xf32>
      %142 = arith.addf %141, %139 : vector<32x64xf32>
      %143 = vector.extract_strided_slice %123 {offsets = [0, 0], sizes = [32, 1], strides = [1, 1]} : vector<32x8xf32> to vector<32x1xf32>
      %144 = vector.broadcast %143 : vector<32x1xf32> to vector<32x64xf32>
      %145 = arith.mulf %144, %142 : vector<32x64xf32>
      %cst_69 = arith.constant dense<0.000000e+00> : vector<64xf32>
      %146 = vector.multi_reduction <add>, %145, %cst_69 [0] : vector<32x64xf32> to vector<64xf32>
      %147 = vector.shape_cast %146 : vector<64xf32> to vector<1x64xf32>
      %148 = vector.extract_strided_slice %115 {offsets = [1, 0], sizes = [1, 64], strides = [1, 1]} : vector<8x64xf32> to vector<1x64xf32>
      %149 = vector.broadcast %148 : vector<1x64xf32> to vector<32x64xf32>
      %150 = arith.mulf %149, %86 : vector<32x64xf32>
      %151 = vector.extract_strided_slice %117 {offsets = [1, 0], sizes = [1, 64], strides = [1, 1]} : vector<8x64xf32> to vector<1x64xf32>
      %152 = vector.extract_strided_slice %120 {offsets = [0, 1], sizes = [32, 1], strides = [1, 1]} : vector<32x8xf32> to vector<32x1xf32>
      %153 = vector.broadcast %151 : vector<1x64xf32> to vector<32x64xf32>
      %154 = vector.broadcast %152 : vector<32x1xf32> to vector<32x64xf32>
      %155 = arith.mulf %153, %154 : vector<32x64xf32>
      %156 = math.absf %155 : vector<32x64xf32>
      %cst_70 = arith.constant 9.99999996E-13 : f32
      %157 = vector.broadcast %cst_70 : f32 to vector<32x64xf32>
      %158 = arith.maximumf %156, %157 : vector<32x64xf32>
      %cst_71 = arith.constant 0.000000e+00 : f32
      %159 = vector.broadcast %cst_71 : f32 to vector<32x64xf32>
      %160 = arith.cmpf olt, %155, %159 : vector<32x64xf32>
      %cst_72 = arith.constant 0.000000e+00 : f32
      %161 = vector.broadcast %cst_72 : f32 to vector<32x64xf32>
      %162 = arith.subf %161, %158 : vector<32x64xf32>
      %163 = arith.select %160, %162, %158 : vector<32x64xi1>, vector<32x64xf32>
      %164 = math.exp %150 : vector<32x64xf32>
      %165 = arith.mulf %164, %142 : vector<32x64xf32>
      %166 = arith.addf %165, %163 : vector<32x64xf32>
      %167 = vector.extract_strided_slice %123 {offsets = [0, 1], sizes = [32, 1], strides = [1, 1]} : vector<32x8xf32> to vector<32x1xf32>
      %168 = vector.broadcast %167 : vector<32x1xf32> to vector<32x64xf32>
      %169 = arith.mulf %168, %166 : vector<32x64xf32>
      %cst_73 = arith.constant dense<0.000000e+00> : vector<64xf32>
      %170 = vector.multi_reduction <add>, %169, %cst_73 [0] : vector<32x64xf32> to vector<64xf32>
      %171 = vector.shape_cast %170 : vector<64xf32> to vector<1x64xf32>
      %172 = vector.extract_strided_slice %115 {offsets = [2, 0], sizes = [1, 64], strides = [1, 1]} : vector<8x64xf32> to vector<1x64xf32>
      %173 = vector.broadcast %172 : vector<1x64xf32> to vector<32x64xf32>
      %174 = arith.mulf %173, %86 : vector<32x64xf32>
      %175 = vector.extract_strided_slice %117 {offsets = [2, 0], sizes = [1, 64], strides = [1, 1]} : vector<8x64xf32> to vector<1x64xf32>
      %176 = vector.extract_strided_slice %120 {offsets = [0, 2], sizes = [32, 1], strides = [1, 1]} : vector<32x8xf32> to vector<32x1xf32>
      %177 = vector.broadcast %175 : vector<1x64xf32> to vector<32x64xf32>
      %178 = vector.broadcast %176 : vector<32x1xf32> to vector<32x64xf32>
      %179 = arith.mulf %177, %178 : vector<32x64xf32>
      %180 = math.absf %179 : vector<32x64xf32>
      %cst_74 = arith.constant 9.99999996E-13 : f32
      %181 = vector.broadcast %cst_74 : f32 to vector<32x64xf32>
      %182 = arith.maximumf %180, %181 : vector<32x64xf32>
      %cst_75 = arith.constant 0.000000e+00 : f32
      %183 = vector.broadcast %cst_75 : f32 to vector<32x64xf32>
      %184 = arith.cmpf olt, %179, %183 : vector<32x64xf32>
      %cst_76 = arith.constant 0.000000e+00 : f32
      %185 = vector.broadcast %cst_76 : f32 to vector<32x64xf32>
      %186 = arith.subf %185, %182 : vector<32x64xf32>
      %187 = arith.select %184, %186, %182 : vector<32x64xi1>, vector<32x64xf32>
      %188 = math.exp %174 : vector<32x64xf32>
      %189 = arith.mulf %188, %166 : vector<32x64xf32>
      %190 = arith.addf %189, %187 : vector<32x64xf32>
      %191 = vector.extract_strided_slice %123 {offsets = [0, 2], sizes = [32, 1], strides = [1, 1]} : vector<32x8xf32> to vector<32x1xf32>
      %192 = vector.broadcast %191 : vector<32x1xf32> to vector<32x64xf32>
      %193 = arith.mulf %192, %190 : vector<32x64xf32>
      %cst_77 = arith.constant dense<0.000000e+00> : vector<64xf32>
      %194 = vector.multi_reduction <add>, %193, %cst_77 [0] : vector<32x64xf32> to vector<64xf32>
      %195 = vector.shape_cast %194 : vector<64xf32> to vector<1x64xf32>
      %196 = vector.extract_strided_slice %115 {offsets = [3, 0], sizes = [1, 64], strides = [1, 1]} : vector<8x64xf32> to vector<1x64xf32>
      %197 = vector.broadcast %196 : vector<1x64xf32> to vector<32x64xf32>
      %198 = arith.mulf %197, %86 : vector<32x64xf32>
      %199 = vector.extract_strided_slice %117 {offsets = [3, 0], sizes = [1, 64], strides = [1, 1]} : vector<8x64xf32> to vector<1x64xf32>
      %200 = vector.extract_strided_slice %120 {offsets = [0, 3], sizes = [32, 1], strides = [1, 1]} : vector<32x8xf32> to vector<32x1xf32>
      %201 = vector.broadcast %199 : vector<1x64xf32> to vector<32x64xf32>
      %202 = vector.broadcast %200 : vector<32x1xf32> to vector<32x64xf32>
      %203 = arith.mulf %201, %202 : vector<32x64xf32>
      %204 = math.absf %203 : vector<32x64xf32>
      %cst_78 = arith.constant 9.99999996E-13 : f32
      %205 = vector.broadcast %cst_78 : f32 to vector<32x64xf32>
      %206 = arith.maximumf %204, %205 : vector<32x64xf32>
      %cst_79 = arith.constant 0.000000e+00 : f32
      %207 = vector.broadcast %cst_79 : f32 to vector<32x64xf32>
      %208 = arith.cmpf olt, %203, %207 : vector<32x64xf32>
      %cst_80 = arith.constant 0.000000e+00 : f32
      %209 = vector.broadcast %cst_80 : f32 to vector<32x64xf32>
      %210 = arith.subf %209, %206 : vector<32x64xf32>
      %211 = arith.select %208, %210, %206 : vector<32x64xi1>, vector<32x64xf32>
      %212 = math.exp %198 : vector<32x64xf32>
      %213 = arith.mulf %212, %190 : vector<32x64xf32>
      %214 = arith.addf %213, %211 : vector<32x64xf32>
      %215 = vector.extract_strided_slice %123 {offsets = [0, 3], sizes = [32, 1], strides = [1, 1]} : vector<32x8xf32> to vector<32x1xf32>
      %216 = vector.broadcast %215 : vector<32x1xf32> to vector<32x64xf32>
      %217 = arith.mulf %216, %214 : vector<32x64xf32>
      %cst_81 = arith.constant dense<0.000000e+00> : vector<64xf32>
      %218 = vector.multi_reduction <add>, %217, %cst_81 [0] : vector<32x64xf32> to vector<64xf32>
      %219 = vector.shape_cast %218 : vector<64xf32> to vector<1x64xf32>
      %220 = vector.extract_strided_slice %115 {offsets = [4, 0], sizes = [1, 64], strides = [1, 1]} : vector<8x64xf32> to vector<1x64xf32>
      %221 = vector.broadcast %220 : vector<1x64xf32> to vector<32x64xf32>
      %222 = arith.mulf %221, %86 : vector<32x64xf32>
      %223 = vector.extract_strided_slice %117 {offsets = [4, 0], sizes = [1, 64], strides = [1, 1]} : vector<8x64xf32> to vector<1x64xf32>
      %224 = vector.extract_strided_slice %120 {offsets = [0, 4], sizes = [32, 1], strides = [1, 1]} : vector<32x8xf32> to vector<32x1xf32>
      %225 = vector.broadcast %223 : vector<1x64xf32> to vector<32x64xf32>
      %226 = vector.broadcast %224 : vector<32x1xf32> to vector<32x64xf32>
      %227 = arith.mulf %225, %226 : vector<32x64xf32>
      %228 = math.absf %227 : vector<32x64xf32>
      %cst_82 = arith.constant 9.99999996E-13 : f32
      %229 = vector.broadcast %cst_82 : f32 to vector<32x64xf32>
      %230 = arith.maximumf %228, %229 : vector<32x64xf32>
      %cst_83 = arith.constant 0.000000e+00 : f32
      %231 = vector.broadcast %cst_83 : f32 to vector<32x64xf32>
      %232 = arith.cmpf olt, %227, %231 : vector<32x64xf32>
      %cst_84 = arith.constant 0.000000e+00 : f32
      %233 = vector.broadcast %cst_84 : f32 to vector<32x64xf32>
      %234 = arith.subf %233, %230 : vector<32x64xf32>
      %235 = arith.select %232, %234, %230 : vector<32x64xi1>, vector<32x64xf32>
      %236 = math.exp %222 : vector<32x64xf32>
      %237 = arith.mulf %236, %214 : vector<32x64xf32>
      %238 = arith.addf %237, %235 : vector<32x64xf32>
      %239 = vector.extract_strided_slice %123 {offsets = [0, 4], sizes = [32, 1], strides = [1, 1]} : vector<32x8xf32> to vector<32x1xf32>
      %240 = vector.broadcast %239 : vector<32x1xf32> to vector<32x64xf32>
      %241 = arith.mulf %240, %238 : vector<32x64xf32>
      %cst_85 = arith.constant dense<0.000000e+00> : vector<64xf32>
      %242 = vector.multi_reduction <add>, %241, %cst_85 [0] : vector<32x64xf32> to vector<64xf32>
      %243 = vector.shape_cast %242 : vector<64xf32> to vector<1x64xf32>
      %244 = vector.extract_strided_slice %115 {offsets = [5, 0], sizes = [1, 64], strides = [1, 1]} : vector<8x64xf32> to vector<1x64xf32>
      %245 = vector.broadcast %244 : vector<1x64xf32> to vector<32x64xf32>
      %246 = arith.mulf %245, %86 : vector<32x64xf32>
      %247 = vector.extract_strided_slice %117 {offsets = [5, 0], sizes = [1, 64], strides = [1, 1]} : vector<8x64xf32> to vector<1x64xf32>
      %248 = vector.extract_strided_slice %120 {offsets = [0, 5], sizes = [32, 1], strides = [1, 1]} : vector<32x8xf32> to vector<32x1xf32>
      %249 = vector.broadcast %247 : vector<1x64xf32> to vector<32x64xf32>
      %250 = vector.broadcast %248 : vector<32x1xf32> to vector<32x64xf32>
      %251 = arith.mulf %249, %250 : vector<32x64xf32>
      %252 = math.absf %251 : vector<32x64xf32>
      %cst_86 = arith.constant 9.99999996E-13 : f32
      %253 = vector.broadcast %cst_86 : f32 to vector<32x64xf32>
      %254 = arith.maximumf %252, %253 : vector<32x64xf32>
      %cst_87 = arith.constant 0.000000e+00 : f32
      %255 = vector.broadcast %cst_87 : f32 to vector<32x64xf32>
      %256 = arith.cmpf olt, %251, %255 : vector<32x64xf32>
      %cst_88 = arith.constant 0.000000e+00 : f32
      %257 = vector.broadcast %cst_88 : f32 to vector<32x64xf32>
      %258 = arith.subf %257, %254 : vector<32x64xf32>
      %259 = arith.select %256, %258, %254 : vector<32x64xi1>, vector<32x64xf32>
      %260 = math.exp %246 : vector<32x64xf32>
      %261 = arith.mulf %260, %238 : vector<32x64xf32>
      %262 = arith.addf %261, %259 : vector<32x64xf32>
      %263 = vector.extract_strided_slice %123 {offsets = [0, 5], sizes = [32, 1], strides = [1, 1]} : vector<32x8xf32> to vector<32x1xf32>
      %264 = vector.broadcast %263 : vector<32x1xf32> to vector<32x64xf32>
      %265 = arith.mulf %264, %262 : vector<32x64xf32>
      %cst_89 = arith.constant dense<0.000000e+00> : vector<64xf32>
      %266 = vector.multi_reduction <add>, %265, %cst_89 [0] : vector<32x64xf32> to vector<64xf32>
      %267 = vector.shape_cast %266 : vector<64xf32> to vector<1x64xf32>
      %268 = vector.extract_strided_slice %115 {offsets = [6, 0], sizes = [1, 64], strides = [1, 1]} : vector<8x64xf32> to vector<1x64xf32>
      %269 = vector.broadcast %268 : vector<1x64xf32> to vector<32x64xf32>
      %270 = arith.mulf %269, %86 : vector<32x64xf32>
      %271 = vector.extract_strided_slice %117 {offsets = [6, 0], sizes = [1, 64], strides = [1, 1]} : vector<8x64xf32> to vector<1x64xf32>
      %272 = vector.extract_strided_slice %120 {offsets = [0, 6], sizes = [32, 1], strides = [1, 1]} : vector<32x8xf32> to vector<32x1xf32>
      %273 = vector.broadcast %271 : vector<1x64xf32> to vector<32x64xf32>
      %274 = vector.broadcast %272 : vector<32x1xf32> to vector<32x64xf32>
      %275 = arith.mulf %273, %274 : vector<32x64xf32>
      %276 = math.absf %275 : vector<32x64xf32>
      %cst_90 = arith.constant 9.99999996E-13 : f32
      %277 = vector.broadcast %cst_90 : f32 to vector<32x64xf32>
      %278 = arith.maximumf %276, %277 : vector<32x64xf32>
      %cst_91 = arith.constant 0.000000e+00 : f32
      %279 = vector.broadcast %cst_91 : f32 to vector<32x64xf32>
      %280 = arith.cmpf olt, %275, %279 : vector<32x64xf32>
      %cst_92 = arith.constant 0.000000e+00 : f32
      %281 = vector.broadcast %cst_92 : f32 to vector<32x64xf32>
      %282 = arith.subf %281, %278 : vector<32x64xf32>
      %283 = arith.select %280, %282, %278 : vector<32x64xi1>, vector<32x64xf32>
      %284 = math.exp %270 : vector<32x64xf32>
      %285 = arith.mulf %284, %262 : vector<32x64xf32>
      %286 = arith.addf %285, %283 : vector<32x64xf32>
      %287 = vector.extract_strided_slice %123 {offsets = [0, 6], sizes = [32, 1], strides = [1, 1]} : vector<32x8xf32> to vector<32x1xf32>
      %288 = vector.broadcast %287 : vector<32x1xf32> to vector<32x64xf32>
      %289 = arith.mulf %288, %286 : vector<32x64xf32>
      %cst_93 = arith.constant dense<0.000000e+00> : vector<64xf32>
      %290 = vector.multi_reduction <add>, %289, %cst_93 [0] : vector<32x64xf32> to vector<64xf32>
      %291 = vector.shape_cast %290 : vector<64xf32> to vector<1x64xf32>
      %292 = vector.extract_strided_slice %115 {offsets = [7, 0], sizes = [1, 64], strides = [1, 1]} : vector<8x64xf32> to vector<1x64xf32>
      %293 = vector.broadcast %292 : vector<1x64xf32> to vector<32x64xf32>
      %294 = arith.mulf %293, %86 : vector<32x64xf32>
      %295 = vector.extract_strided_slice %117 {offsets = [7, 0], sizes = [1, 64], strides = [1, 1]} : vector<8x64xf32> to vector<1x64xf32>
      %296 = vector.extract_strided_slice %120 {offsets = [0, 7], sizes = [32, 1], strides = [1, 1]} : vector<32x8xf32> to vector<32x1xf32>
      %297 = vector.broadcast %295 : vector<1x64xf32> to vector<32x64xf32>
      %298 = vector.broadcast %296 : vector<32x1xf32> to vector<32x64xf32>
      %299 = arith.mulf %297, %298 : vector<32x64xf32>
      %300 = math.absf %299 : vector<32x64xf32>
      %cst_94 = arith.constant 9.99999996E-13 : f32
      %301 = vector.broadcast %cst_94 : f32 to vector<32x64xf32>
      %302 = arith.maximumf %300, %301 : vector<32x64xf32>
      %cst_95 = arith.constant 0.000000e+00 : f32
      %303 = vector.broadcast %cst_95 : f32 to vector<32x64xf32>
      %304 = arith.cmpf olt, %299, %303 : vector<32x64xf32>
      %cst_96 = arith.constant 0.000000e+00 : f32
      %305 = vector.broadcast %cst_96 : f32 to vector<32x64xf32>
      %306 = arith.subf %305, %302 : vector<32x64xf32>
      %307 = arith.select %304, %306, %302 : vector<32x64xi1>, vector<32x64xf32>
      %308 = math.exp %294 : vector<32x64xf32>
      %309 = arith.mulf %308, %286 : vector<32x64xf32>
      %310 = arith.addf %309, %307 : vector<32x64xf32>
      %311 = vector.extract_strided_slice %123 {offsets = [0, 7], sizes = [32, 1], strides = [1, 1]} : vector<32x8xf32> to vector<32x1xf32>
      %312 = vector.broadcast %311 : vector<32x1xf32> to vector<32x64xf32>
      %313 = arith.mulf %312, %310 : vector<32x64xf32>
      %cst_97 = arith.constant dense<0.000000e+00> : vector<64xf32>
      %314 = vector.multi_reduction <add>, %313, %cst_97 [0] : vector<32x64xf32> to vector<64xf32>
      %315 = vector.shape_cast %314 : vector<64xf32> to vector<1x64xf32>
      %316 = tpu.concatenate %147, %171, %195, %219, %243, %267, %291, %315 in 0 : vector<1x64xf32>, vector<1x64xf32>, vector<1x64xf32>, vector<1x64xf32>, vector<1x64xf32>, vector<1x64xf32>, vector<1x64xf32>, vector<1x64xf32> -> vector<8x64xf32>
      %317 = arith.index_cast %113 : i32 to index
      %c0_98 = arith.constant 0 : index
      %318 = vector.load %arg21[%317, %c0_98] : memref<128x64xf32, #tpu.memory_space<vmem>>, vector<8x64xf32>
      tpu.vector_store %arg21[%317, %c0_98], %316 {strides = array<i32>} : memref<128x64xf32, #tpu.memory_space<vmem>>, vector<8x64xf32>,
      scf.yield %310 : vector<32x64xf32>
    }
    %c16_i32_46 = arith.constant 16 : i32
    %c0_47 = arith.constant 0 : index
    %c0_48 = arith.constant 0 : index
    %90 = vector.load %arg15[%c0_47, %c0_48] : memref<32x64xf32, #tpu.memory_space<vmem>>, vector<32x64xf32>
    tpu.vector_store %arg15[%c0_47, %c0_48], %89 {strides = array<i32>} : memref<32x64xf32, #tpu.memory_space<vmem>>, vector<32x64xf32>,
    %c0_49 = arith.constant 0 : index
    %c0_50 = arith.constant 0 : index
    %91 = vector.load %arg21[%c0_49, %c0_50] : memref<128x64xf32, #tpu.memory_space<vmem>>, vector<128x64xf32>
    %c0_51 = arith.constant 0 : index
    %c0_52 = arith.constant 0 : index
    %92 = vector.load %arg11[%c0_51, %c0_52] : memref<1x64xf32, #tpu.memory_space<vmem>>, vector<1x64xf32>
    %93 = vector.broadcast %92 : vector<1x64xf32> to vector<128x64xf32>
    %94 = arith.mulf %62, %93 : vector<128x64xf32>
    %95 = arith.addf %91, %94 : vector<128x64xf32>
    %96 = arith.negf %24 : vector<128x64xf32>
    %97 = math.exp %96 : vector<128x64xf32>
    %cst_53 = arith.constant 1.000000e+00 : f32
    %98 = vector.broadcast %cst_53 : f32 to vector<128x64xf32>
    %99 = arith.addf %98, %97 : vector<128x64xf32>
    %100 = arith.divf %98, %99 : vector<128x64xf32>
    %101 = arith.mulf %24, %100 : vector<128x64xf32>
    %102 = arith.mulf %95, %101 : vector<128x64xf32>
    %c0_54 = arith.constant 0 : index
    %c0_55 = arith.constant 0 : index
    %103 = vector.load %arg12[%c0_54, %c0_55] : memref<64x32xf32, #tpu.memory_space<vmem>>, vector<64x32xf32>
    %cst_56 = arith.constant dense<0.000000e+00> : vector<128x32xf32>
    %104 = tpu.matmul %102, %103, %cst_56 {dimension_numbers = #tpu.dot_dimension_numbers<[1], [0], [0], [1], [0, 0, 1, 1], [], []>} : vector<128x64xf32>, vector<64x32xf32>, vector<128x32xf32> -> vector<128x32xf32>
    %c0_57 = arith.constant 0 : index
    %c0_58 = arith.constant 0 : index
    %105 = vector.load %arg13[%c0_57, %c0_58] : memref<1x32xf32, #tpu.memory_space<vmem>>, vector<1x32xf32>
    %106 = vector.broadcast %105 : vector<1x32xf32> to vector<128x32xf32>
    %107 = arith.addf %104, %106 : vector<128x32xf32>
    %108 = arith.addf %107, %4 : vector<128x32xf32>
    %c0_59 = arith.constant 0 : index
    %c0_60 = arith.constant 0 : index
    %c0_61 = arith.constant 0 : index
    %109 = vector.load %arg14[%c0_59, %c0_60, %c0_61] : memref<1x128x32xf32, #tpu.memory_space<vmem>>, vector<1x128x32xf32>
    %110 = vector.shape_cast %109 : vector<1x128x32xf32> to vector<128x32xf32>
    %111 = vector.shape_cast %108 : vector<128x32xf32> to vector<1x128x32xf32>
    tpu.vector_store %arg14[%c0_59, %c0_60, %c0_61], %111 {strides = array<i32>} : memref<1x128x32xf32, #tpu.memory_space<vmem>>, vector<1x128x32xf32>,
    return
  }
  func.func @transform_0(%arg0: i32, %arg1: i32) -> (i32, i32, i32) {
    %c0_i32 = arith.constant 0 : i32
    %c0_i32_0 = arith.constant 0 : i32
    return %arg0, %arg1, %c0_i32 : i32, i32, i32
  }
  func.func @transform_1(%arg0: i32, %arg1: i32) -> (i32, i32) {
    %c0_i32 = arith.constant 0 : i32
    %c0_i32_0 = arith.constant 0 : i32
    %c0_i32_1 = arith.constant 0 : i32
    return %c0_i32, %c0_i32_0 : i32, i32
  }
  func.func @transform_2(%arg0: i32, %arg1: i32) -> (i32, i32) {
    %c0_i32 = arith.constant 0 : i32
    %c0_i32_0 = arith.constant 0 : i32
    %c0_i32_1 = arith.constant 0 : i32
    return %c0_i32, %c0_i32_0 : i32, i32
  }
  func.func @transform_3(%arg0: i32, %arg1: i32) -> (i32, i32) {
    %c0_i32 = arith.constant 0 : i32
    %c0_i32_0 = arith.constant 0 : i32
    %c0_i32_1 = arith.constant 0 : i32
    return %c0_i32, %c0_i32_0 : i32, i32
  }
  func.func @transform_4(%arg0: i32, %arg1: i32) -> (i32, i32) {
    %c0_i32 = arith.constant 0 : i32
    %c0_i32_0 = arith.constant 0 : i32
    %c0_i32_1 = arith.constant 0 : i32
    return %c0_i32, %c0_i32_0 : i32, i32
  }
  func.func @transform_5(%arg0: i32, %arg1: i32) -> (i32, i32) {
    %c0_i32 = arith.constant 0 : i32
    %c0_i32_0 = arith.constant 0 : i32
    %c0_i32_1 = arith.constant 0 : i32
    return %c0_i32, %c0_i32_0 : i32, i32
  }
  func.func @transform_6(%arg0: i32, %arg1: i32) -> (i32, i32) {
    %c0_i32 = arith.constant 0 : i32
    %c0_i32_0 = arith.constant 0 : i32
    %c0_i32_1 = arith.constant 0 : i32
    return %c0_i32, %c0_i32_0 : i32, i32
  }
  func.func @transform_7(%arg0: i32, %arg1: i32) -> (i32, i32) {
    %c0_i32 = arith.constant 0 : i32
    %c0_i32_0 = arith.constant 0 : i32
    %c0_i32_1 = arith.constant 0 : i32
    return %c0_i32, %c0_i32_0 : i32, i32
  }
  func.func @transform_8(%arg0: i32, %arg1: i32) -> (i32, i32) {
    %c0_i32 = arith.constant 0 : i32
    %c0_i32_0 = arith.constant 0 : i32
    %c0_i32_1 = arith.constant 0 : i32
    return %c0_i32, %c0_i32_0 : i32, i32
  }
  func.func @transform_9(%arg0: i32, %arg1: i32) -> (i32, i32) {
    %c0_i32 = arith.constant 0 : i32
    %c0_i32_0 = arith.constant 0 : i32
    %c0_i32_1 = arith.constant 0 : i32
    return %c0_i32, %c0_i32_0 : i32, i32
  }
  func.func @transform_10(%arg0: i32, %arg1: i32) -> (i32, i32) {
    %c0_i32 = arith.constant 0 : i32
    %c0_i32_0 = arith.constant 0 : i32
    %c0_i32_1 = arith.constant 0 : i32
    return %c0_i32, %c0_i32_0 : i32, i32
  }
  func.func @transform_11(%arg0: i32, %arg1: i32) -> (i32, i32) {
    %c0_i32 = arith.constant 0 : i32
    %c0_i32_0 = arith.constant 0 : i32
    %c0_i32_1 = arith.constant 0 : i32
    return %c0_i32, %c0_i32_0 : i32, i32
  }
  func.func @transform_12(%arg0: i32, %arg1: i32) -> (i32, i32, i32) {
    %c0_i32 = arith.constant 0 : i32
    %c0_i32_0 = arith.constant 0 : i32
    return %arg0, %arg1, %c0_i32 : i32, i32, i32
  }
}

</mosaic_0001>

<bundles_post_ra>
// kernel: tpu_custom_call.1
= control target key start
LH: loop header
LB: loop body
LE: loop exit
PB: predicated region body
PF: predicated region fallthrough
CT: control target
= control target key end

     0   :  { %s4496_s21 = smov 0   ;;  %s4498_s22 = smov 0   ;;  %s6530_s0 = inlined_call_operand.vmem [shape: f32[2,256,32], index: 0, kind: input, shape index: {}]   ;;  %s6531_s1 = inlined_call_operand.vmem [shape: f32[1,32], index: 1, kind: input, shape index: {}]   ;;  %s6532_s2 = inlined_call_operand.vmem [shape: f32[32,128], index: 2, kind: input, shape index: {}]   ;;  %s6533_s3 = inlined_call_operand.vmem [shape: f32[1,128], index: 3, kind: input, shape index: {}]   ;;  %s6534_s4 = inlined_call_operand.vmem [shape: f32[4,64], index: 4, kind: input, shape index: {}]   ;;  %s6535_s5 = inlined_call_operand.vmem [shape: f32[1,64], index: 5, kind: input, shape index: {}]   ;;  %s6536_s6 = inlined_call_operand.vmem [shape: f32[64,128], index: 6, kind: input, shape index: {}]   ;;  %s6537_s7 = inlined_call_operand.vmem [shape: f32[1,64], index: 7, kind: input, shape index: {}]   ;;  %s6538_s8 = inlined_call_operand.vmem [shape: f32[32,64], index: 8, kind: input, shape index: {}]   ;;  %s6539_s9 = inlined_call_operand.vmem [shape: f32[1,64], index: 9, kind: input, shape index: {}]   ;;  %s6540_s10 = inlined_call_operand.vmem [shape: f32[64,32], index: 10, kind: input, shape index: {}]   ;;  %s6541_s11 = inlined_call_operand.vmem [shape: f32[1,32], index: 11, kind: input, shape index: {}]   ;;  %s6542_s12 = inlined_call_operand.vmem [shape: f32[2,256,32], index: 12, kind: output, shape index: {}]  }
   0x1   :  { %s4500_s23 = smov 0   ;;  %s4502_s24 = smov 0  }
   0x2   :  { %s4504_s25 = smov 0  }
   0x3 LB: > { %s31_s26 = sadd.s32 1, %s4390_s23  ;;  %s34_s27 = sadd.s32 1, %s4394_s24  ;;  %s4398_s25 = sphi %s4504_s25, %s22_s25   ;;  %s4394_s24 = sphi %s4502_s24, %s6776_s24   ;;  %s4390_s23 = sphi %s4500_s23, %s6775_s23   ;;  %s4386_s22 = sphi %s4498_s22, %s6774_s22   ;;  %s4382_s21 = sphi %s4496_s21, %s6773_s21  }
   0x4   : > { %p32_p0 = scmp.ge.s32.totalorder %s31_s26, 2  ;;  %p3591_p1 = scmp.ge.s32.totalorder %s4398_s25, 1 }
   0x5   : > { %p383_p2 = scmp.lt.s32.totalorder %s4398_s25, 5 }
   0x6   : > { %s6778_s26 = smov (%p32_p0, %s31_s26), 0  ;;  %s6780_s27 = smov (!%p32_p0, %s34_s27), %s4394_s24 }
   0x7   : > { %p384_p3 = pnand %p3591_p1, %p383_p2  ;;  %p36_p4 = scmp.ge.s32.totalorder %s6780_s27, 2 }
   0x9   : > { %s6782_s27 = smov (%p36_p4, %s6780_s27), 0  ;;  %387 = sbr.rel (%p384_p3) target bundleno = 1777 (0x6f1), region = 68 }
  0x10   : > { %s3592_s28 = sshll.u32 %s4382_s21, 4  ;;  %p434_p5 = scmp.lt.s32.totalorder %s4386_s22, 1 }
  0x11   : > { %p436_p6 = scmp.lt.s32.totalorder %s3592_s28, 31  ;;  %p3598_p7 = scmp.ne.s32.totalorder %s4382_s21, 0 }
  0x12   : > { %s6784_s22 = smov (!%p434_p5, %s4386_s22), 1  ;;  %vm457_vm0 = vcmask (!%p3598_p7), 523264   ;;  %v4420_v0 = vmov (!%p3598_p7), 0.0  }
  0x13   : > { %s6786_s28 = smov (!%p436_p6, %s3592_s28), 31  ;;  %s3593_s29 = sshll.u32 %s6784_s22, 5  ;;  %458 = vst.msk [vmem:[#allocation2] sm:$0xff] (!%p3598_p7), %vm457_vm0, %v4420_v0  ;;  %459 = vst.msk [vmem:[#allocation2 + $0x8] sm:$0xff] (!%p3598_p7), %vm457_vm0, %v4420_v0 }
  0x14   : > { %s439_s30 = sadd.s32 %s3593_s29, %s6786_s28  ;;  %456 = sbr.rel (%p3598_p7) target bundleno = 27 (0x1b), region = 72  ;;  %460 = vst.msk [vmem:[#allocation2 + $0x10] sm:$0xff] (!%p3598_p7), %vm457_vm0, %v4420_v0  ;;  %461 = vst.msk [vmem:[#allocation2 + $0x18] sm:$0xff] (!%p3598_p7), %vm457_vm0, %v4420_v0 }
  0x15   : > { %s3594_s13 = sshll.u32 %s439_s30, 3  ;;  %462 = vst.msk [vmem:[#allocation3] sm:$0xff] (!%p3598_p7), %vm457_vm0, %v4420_v0 }
  0x16   : > { %s4529_s16 = scalar_lea.vmem %s6530_s0, %s3594_s13  ;;  %s4534_s19 = scalar_lea.vmem %s6542_s12, %s3594_s13 }
  0x1b PF: > { %v4537_v1 = vld [vmem:[%s4529_s16] sm:$0xff]  ;;  %vm495_vm1 = vcmask 261120   ;;  %v4540_v2 = vld [vmem:[%s4529_s16 + $0x10] sm:$0xff]  ;;  %v4543_v3 = vld [vmem:[%s4529_s16 + $0x8] sm:$0xff]  ;;  %s4421_s20 = smov 64   ;;  %vm864_vm2 = vcmask 1042432  }
  0x1c   : > { %6613 = vst [vmem:[#allocation9_spill] sm:$0xff] %v4537_v1  ;;  %6614 = vst [vmem:[#allocation10_spill] sm:$0xff] %v4540_v2  ;;  %v479_v4 = vmul.f32 %v4537_v1, %v4537_v1  ;;  %v481_v5 = vmul.f32 %v4540_v2, %v4540_v2  ;;  %v480_v6 = vmul.f32 %v4543_v3, %v4543_v3  ;;  %v4552_v7 = vld [vmem:[%s4529_s16 + $0x18] sm:$0xff]  ;;  %v4557_v9 = vld [vmem:[%s4529_s16 + $0x20] sm:$0xff]  ;;  %vm952_vm3 = vcmask 1041408   ;;  %s4422_s13 = smov 96  }
  0x1d   : > { %6615 = vst [vmem:[#allocation11_spill] sm:$0xff] %v4543_v3  ;;  %6616 = vst [vmem:[#allocation12_spill] sm:$0xff] %v4552_v7  ;;  %v482_v8 = vmul.f32 %v4552_v7, %v4552_v7  ;;  %v4560_v10 = vld [vmem:[%s4529_s16 + $0x28] sm:$0xff]  ;;  %v483_v15 = vmul.f32 %v4557_v9, %v4557_v9  ;;  %v4571_v17 = vld [vmem:[%s4529_s16 + $0x30] sm:$0xff]  ;;  %vm1040_vm4 = vcmask 1040384   ;;  %vm1163_vm5 = vcmask 523264  }
  0x1e   : > { %6617 = vst [vmem:[#allocation13_spill] sm:$0xff] %v4557_v9  ;;  %6618 = vst [vmem:[#allocation14_spill] sm:$0xff] %v4560_v10  ;;  %v496_v11 = vsel %vm495_vm1, %v479_v4, 0.0  ;;  %v502_v12 = vsel %vm495_vm1, %v481_v5, 0.0  ;;  %v499_v13 = vsel %vm495_vm1, %v480_v6, 0.0  ;;  %v484_v16 = vmul.f32 %v4560_v10, %v4560_v10  ;;  %v4574_v18 = vld [vmem:[%s4529_s16 + $0x38] sm:$0xff] }
  0x1f   : > { %497 = vadd.xlane.f32.xlu0 %v496_v11  ;;  %503 = vadd.xlane.f32.xlu1 %v502_v12  ;;  %v505_v14 = vsel %vm495_vm1, %v482_v8, 0.0  ;;  %6619 = vst [vmem:[#allocation15_spill] sm:$0xff] %v4571_v17  ;;  %6620 = vst [vmem:[#allocation16_spill] sm:$0xff] %v4574_v18  ;;  %v508_v19 = vsel %vm495_vm1, %v483_v15, 0.0  ;;  %v485_v21 = vmul.f32 %v4571_v17, %v4571_v17  ;;  %v4583_v23 = vld [vmem:[%s4529_s16 + $0x40] sm:$0xff]  ;;  %v4586_v24 = vld [vmem:[%s4529_s16 + $0x48] sm:$0xff] }
  0x20   : > { %v511_v20 = vsel %vm495_vm1, %v484_v16, 0.0  ;;  %v486_v22 = vmul.f32 %v4574_v18, %v4574_v18  ;;  %6621 = vst [vmem:[#allocation17_spill] sm:$0xff] %v4583_v23  ;;  %6622 = vst [vmem:[#allocation18_spill] sm:$0xff] %v4586_v24  ;;  %v487_v27 = vmul.f32 %v4583_v23, %v4583_v23  ;;  %v488_v28 = vmul.f32 %v4586_v24, %v4586_v24  ;;  %v4595_v29 = vld [vmem:[%s4529_s16 + $0x50] sm:$0xff]  ;;  %v4598_v30 = vld [vmem:[%s4529_s16 + $0x58] sm:$0xff]  ;;  %s5814_s29 = smov 0  }
  0x21   : > { %v514_v25 = vsel %vm495_vm1, %v485_v21, 0.0  ;;  %6623 = vst [vmem:[#allocation19_spill] sm:$0xff] %v4595_v29  ;;  %6624 = vst [vmem:[#allocation20_spill] sm:$0xff] %v4598_v30  ;;  %v489_v33 = vmul.f32 %v4595_v29, %v4595_v29  ;;  %v490_v34 = vmul.f32 %v4598_v30, %v4598_v30  ;;  %v4607_v35 = vld [vmem:[%s4529_s16 + $0x60] sm:$0xff]  ;;  %v4610_v36 = vld [vmem:[%s4529_s16 + $0x68] sm:$0xff] }
  0x22   : > { %v517_v26 = vsel %vm495_vm1, %v486_v22, 0.0  ;;  %v520_v31 = vsel %vm495_vm1, %v487_v27, 0.0  ;;  %v523_v32 = vsel %vm495_vm1, %v488_v28, 0.0  ;;  %6625 = vst [vmem:[#allocation21_spill] sm:$0xff] %v4607_v35  ;;  %6626 = vst [vmem:[#allocation22_spill] sm:$0xff] %v4610_v36  ;;  %v491_v39 = vmul.f32 %v4607_v35, %v4607_v35  ;;  %v4619_v41 = vld [vmem:[%s4529_s16 + $0x70] sm:$0xff] }
  0x23   : > { %500 = vadd.xlane.f32.xlu0 %v499_v13  ;;  %506 = vadd.xlane.f32.xlu1 %v505_v14  ;;  %v526_v37 = vsel %vm495_vm1, %v489_v33, 0.0  ;;  %v529_v38 = vsel %vm495_vm1, %v490_v34, 0.0  ;;  %v492_v40 = vmul.f32 %v4610_v36, %v4610_v36  ;;  %6627 = vst [vmem:[#allocation23_spill] sm:$0xff] %v4619_v41  ;;  %v4622_v42 = vld [vmem:[%s4529_s16 + $0x78] sm:$0xff]  ;;  %v493_v45 = vmul.f32 %v4619_v41, %v4619_v41  ;;  %v632_v49 = vld [vmem:[%s6532_s2] sm:$0xff]  ;;  %v633_v50 = vld [vmem:[%s6532_s2 + $0x8] sm:$0xff] }
  0x24   : > { %6628 = vst [vmem:[#allocation24_spill] sm:$0xff] %v4622_v42  ;;  %v532_v43 = vsel %vm495_vm1, %v491_v39, 0.0  ;;  %v494_v46 = vmul.f32 %v4622_v42, %v4622_v42  ;;  %v3872_v51 = vpack.c.bf16 %v633_v50, %v632_v49  ;;  %v634_v52 = vld [vmem:[%s6532_s2 + $0x10] sm:$0xff]  ;;  %v635_v53 = vld [vmem:[%s6532_s2 + $0x18] sm:$0xff] }
  0x25   : > { %v535_v44 = vsel %vm495_vm1, %v492_v40, 0.0  ;;  %v538_v47 = vsel %vm495_vm1, %v493_v45, 0.0  ;;  %v3876_v54 = vpack.c.bf16 %v635_v53, %v634_v52 }
  0x26   : > { %v541_v48 = vsel %vm495_vm1, %v494_v46, 0.0  ;;  %3873 = vmatprep.subr.bf16.mxu0 %v3872_v51  ;;  %3912 = vmatprep.subr.bf16.mxu1 %v3872_v51 }
  0x27   : > { %509 = vadd.xlane.f32.xlu0 %v508_v19  ;;  %512 = vadd.xlane.f32.xlu1 %v511_v20 }
  0x28   : > { %3875 = vmatpush3.bf16.msra.mxu0 %v3872_v51  ;;  %3914 = vmatpush3.bf16.msra.mxu1 %v3872_v51 }
  0x29   : > { %3877 = vmatprep.subr.bf16.mxu0 %v3876_v54  ;;  %3913 = vmatprep.subr.bf16.mxu1 %v3876_v54 }
  0x2b   : > { %515 = vadd.xlane.f32.xlu0 %v514_v25  ;;  %518 = vadd.xlane.f32.xlu1 %v517_v26  ;;  %v4647_v26 = vld [vmem:[%s6531_s1] ss:$0 sm:$0xff] }
  0x2c   : > { %3879 = vmatpush3.bf16.msra.mxu0 %v3876_v54  ;;  %3915 = vmatpush3.bf16.msra.mxu1 %v3876_v54 }
  0x2f   : > { %521 = vadd.xlane.f32.xlu0 %v520_v31  ;;  %524 = vadd.xlane.f32.xlu1 %v523_v32 }
  0x33   : > { %527 = vadd.xlane.f32.xlu0 %v526_v37  ;;  %530 = vadd.xlane.f32.xlu1 %v529_v38 }
  0x37   : > { %533 = vadd.xlane.f32.xlu0 %v532_v43  ;;  %536 = vadd.xlane.f32.xlu1 %v535_v44 }
  0x3b   : > { %539 = vadd.xlane.f32.xlu0 %v538_v47  ;;  %542 = vadd.xlane.f32.xlu1 %v541_v48 }
  0xac   : > { %v498_v55 = vpop.xlane.xlu0 %497  ;;  %v504_v56 = vpop.xlane.xlu1 %503 }
  0xad   : > { %v545_v57 = vmul.f32 0.03125, %v498_v55  ;;  %v547_v58 = vmul.f32 0.03125, %v504_v56 }
  0xaf   : > { %v561_v59 = vadd.f32 1e-05, %v545_v57  ;;  %v563_v60 = vadd.f32 1e-05, %v547_v58 }
  0xb0   : > { %v501_v61 = vpop.xlane.xlu0 %500  ;;  %v507_v62 = vpop.xlane.xlu1 %506 }
  0xb1   : > { %4008 = vrsqrt.f32 %v561_v59  ;;  %v546_v63 = vmul.f32 0.03125, %v501_v61  ;;  %v548_v0 = vmul.f32 0.03125, %v507_v62 }
  0xb2   : > { %4010 = vrsqrt.f32 %v563_v60 }
  0xb3   : > { %v562_v4 = vadd.f32 1e-05, %v546_v63  ;;  %v564_v5 = vadd.f32 1e-05, %v548_v0 }
  0xb4   : > { %v510_v6 = vpop.xlane.xlu0 %509  ;;  %v513_v8 = vpop.xlane.xlu1 %512 }
  0xb5   : > { %4012 = vrsqrt.f32 %v562_v4  ;;  %v549_v11 = vmul.f32 0.03125, %v510_v6  ;;  %v550_v12 = vmul.f32 0.03125, %v513_v8 }
  0xb6   : > { %4014 = vrsqrt.f32 %v564_v5 }
  0xb7   : > { %v565_v13 = vadd.f32 1e-05, %v549_v11  ;;  %v566_v14 = vadd.f32 1e-05, %v550_v12 }
  0xb8   : > { %v516_v15 = vpop.xlane.xlu0 %515  ;;  %v519_v16 = vpop.xlane.xlu1 %518 }
  0xb9   : > { %4016 = vrsqrt.f32 %v565_v13  ;;  %v551_v19 = vmul.f32 0.03125, %v516_v15  ;;  %v552_v20 = vmul.f32 0.03125, %v519_v16 }
  0xba   : > { %4018 = vrsqrt.f32 %v566_v14 }
  0xbb   : > { %v4009_v21 = vpop.eup %4008  ;;  %v567_v22 = vadd.f32 1e-05, %v551_v19  ;;  %v568_v25 = vadd.f32 1e-05, %v552_v20 }
  0xbc   : > { %v4011_v27 = vpop.eup %4010  ;;  %v522_v28 = vpop.xlane.xlu0 %521  ;;  %v593_v32 = vmul.f32 %v4009_v21, %v4537_v1 }
  0xbd   : > { %v525_v31 = vpop.xlane.xlu1 %524  ;;  %4020 = vrsqrt.f32 %v567_v22  ;;  %v553_v33 = vmul.f32 0.03125, %v522_v28  ;;  %v595_v37 = vmul.f32 %v4011_v27, %v4540_v2 }
  0xbe   : > { %v554_v34 = vmul.f32 0.03125, %v525_v31  ;;  %4022 = vrsqrt.f32 %v568_v25  ;;  %v616_v38 = vmul.f32 %v4647_v26, %v593_v32 }
  0xbf   : > { %v4013_v39 = vpop.eup %4012  ;;  %v569_v40 = vadd.f32 1e-05, %v553_v33  ;;  %v618_v48 = vmul.f32 %v4647_v26, %v595_v37 }
  0xc0   : > { %v570_v43 = vadd.f32 1e-05, %v554_v34  ;;  %v4015_v44 = vpop.eup %4014  ;;  %3768 = vmatprep.mubr.msk.f32.mxu0 %vm495_vm1, %v616_v38  ;;  %v528_v45 = vpop.xlane.xlu0 %527  ;;  %v594_v47 = vmul.f32 %v4013_v39, %v4543_v3 }
  0xc1   : > { %v531_v46 = vpop.xlane.xlu1 %530  ;;  %4024 = vrsqrt.f32 %v569_v40  ;;  %v555_v49 = vmul.f32 0.03125, %v528_v45  ;;  %v596_v51 = vmul.f32 %v4015_v44, %v4552_v7 }
  0xc2   : > { %v556_v50 = vmul.f32 0.03125, %v531_v46  ;;  %4026 = vrsqrt.f32 %v570_v43  ;;  %v617_v52 = vmul.f32 %v4647_v26, %v594_v47 }
  0xc3   : > { %v4017_v53 = vpop.eup %4016  ;;  %v571_v54 = vadd.f32 1e-05, %v555_v49  ;;  %v619_v59 = vmul.f32 %v4647_v26, %v596_v51 }
  0xc4   : > { %v572_v55 = vadd.f32 1e-05, %v556_v50  ;;  %v4019_v56 = vpop.eup %4018  ;;  %3769 = vmatmul.mubr.msk.f32.vlgmr.msra.gmra.mrb[0].mxu0 %vm495_vm1, %v617_v52  ;;  %v534_v57 = vpop.xlane.xlu0 %533  ;;  %v597_v60 = vmul.f32 %v4017_v53, %v4557_v9 }
  0xc5   : > { %v537_v58 = vpop.xlane.xlu1 %536  ;;  %4028 = vrsqrt.f32 %v571_v54  ;;  %v557_v61 = vmul.f32 0.03125, %v534_v57  ;;  %3771 = vmatprep.mubr.msk.f32.mxu0 %vm495_vm1, %v618_v48  ;;  %v598_v63 = vmul.f32 %v4019_v56, %v4560_v10  ;;  %v1277_v57 = vld [vmem:[%s6536_s6] sm:$0xff] }
  0xc6   : > { %v558_v62 = vmul.f32 0.03125, %v537_v58  ;;  %4030 = vrsqrt.f32 %v572_v55  ;;  %v620_v0 = vmul.f32 %v4647_v26, %v597_v60  ;;  %v1278_v58 = vld [vmem:[%s6536_s6 + $0x8] sm:$0xff]  ;;  %v1279_v60 = vld [vmem:[%s6536_s6 + $0x10] sm:$0xff] }
  0xc7   : > { %v4021_v4 = vpop.eup %4020  ;;  %v573_v5 = vadd.f32 1e-05, %v557_v61  ;;  %v621_v13 = vmul.f32 %v4647_v26, %v598_v63  ;;  %v1282_v63 = vld [vmem:[%s6536_s6 + $0x28] sm:$0xff] }
  0xc8   : > { %v574_v6 = vadd.f32 1e-05, %v558_v62  ;;  %v4023_v8 = vpop.eup %4022  ;;  %3772 = vmatmul.mubr.msk.f32.gmra.mrb[2].mxu0 %vm495_vm1, %v619_v59  ;;  %v540_v11 = vpop.xlane.xlu0 %539  ;;  %v599_v14 = vmul.f32 %v4021_v4, %v4571_v17  ;;  %v3880_v59 = vpack.c.bf16 %v1278_v58, %v1277_v57  ;;  %v1281_v62 = vld [vmem:[%s6536_s6 + $0x20] sm:$0xff] }
  0xc9   : > { %v543_v12 = vpop.xlane.xlu1 %542  ;;  %4032 = vrsqrt.f32 %v573_v5  ;;  %v559_v15 = vmul.f32 0.03125, %v540_v11  ;;  %3774 = vmatprep.mubr.msk.f32.mxu0 %vm495_vm1, %v620_v0  ;;  %v600_v19 = vmul.f32 %v4023_v8, %v4574_v18  ;;  %v3654_v0 = vld [vmem:[%s6537_s7] ss:$0 sm:$0xff]  ;;  %v3888_v4 = vpack.c.bf16 %v1282_v63, %v1281_v62  ;;  %v1283_v5 = vld [vmem:[%s6536_s6 + $0x30] sm:$0xff] }
  0xca   : > { %v560_v16 = vmul.f32 0.03125, %v543_v12  ;;  %4034 = vrsqrt.f32 %v574_v6  ;;  %v622_v20 = vmul.f32 %v4647_v26, %v599_v14  ;;  %3881 = vmatprep.subr.bf16.mxu1 %v3880_v59  ;;  %1484 = vrot.lane.b32.xlu0 %v3654_v0, %s4421_s20  ;;  %v1284_v6 = vld [vmem:[%s6536_s6 + $0x38] sm:$0xff]  ;;  %v4728_v11 = vld [vmem:[%s6533_s3] ss:$0 sm:$0xff] }
  0xcb   : > { %v4025_v21 = vpop.eup %4024  ;;  %v575_v22 = vadd.f32 1e-05, %v559_v15  ;;  %v623_v28 = vmul.f32 %v4647_v26, %v600_v19  ;;  %v3892_v8 = vpack.c.bf16 %v1284_v6, %v1283_v5  ;;  %v836_v12 = vld [vmem:[#allocation3] sm:$0xff] }
  0xcc   : > { %v576_v25 = vadd.f32 1e-05, %v560_v16  ;;  %v4027_v27 = vpop.eup %4026  ;;  %3775 = vmatmul.mubr.msk.f32.gmra.mrb[4].mxu0 %vm495_vm1, %v621_v13  ;;  %v601_v31 = vmul.f32 %v4025_v21, %v4583_v23  ;;  %v846_v19 = vrot.slane %v836_v12, 5  ;;  %v950_v21 = vrot.slane %v836_v12, 6  ;;  %v4813_v6 = vld [vmem:[%s6534_s4 + $0x2] ss:$0 sm:$0xff] }
  0xcd   : > { %4036 = vrsqrt.f32 %v575_v22  ;;  %3777 = vmatprep.mubr.msk.f32.mxu0 %vm495_vm1, %v622_v20  ;;  %v602_v32 = vmul.f32 %v4027_v27, %v4586_v24  ;;  %v4739_v20 = vld [vmem:[%s6534_s4 + $0x3] ss:$0 sm:$0xff] }
  0xce   : > { %4038 = vrsqrt.f32 %v576_v25  ;;  %v624_v33 = vmul.f32 %v4647_v26, %v601_v31  ;;  %v1038_v25 = vrot.slane %v836_v12, 7 }
  0xcf   : > { %v4029_v34 = vpop.eup %4028  ;;  %v625_v37 = vmul.f32 %v4647_v26, %v602_v32 }
  0xd0   : > { %v4031_v38 = vpop.eup %4030  ;;  %3778 = vmatmul.mubr.msk.f32.gmra.mrb[6].mxu0 %vm495_vm1, %v623_v28  ;;  %3780 = vmatprep.mubr.msk.f32.mxu1 %vm495_vm1, %v624_v33  ;;  %v603_v39 = vmul.f32 %v4029_v34, %v4595_v29 }
  0xd1   : > { %3781 = vmatmul.mubr.msk.f32.vlgmr.msra.gmra.mrb[0].mxu1 %vm495_vm1, %v625_v37  ;;  %v604_v40 = vmul.f32 %v4031_v38, %v4598_v30 }
  0xd2   : > { %v626_v43 = vmul.f32 %v4647_v26, %v603_v39  ;;  %3883 = vmatpush3.bf16.msra.mxu1 %v3880_v59  ;;  %v4753_v39 = vld [vmem:[%s6534_s4] ss:$0 sm:$0xff] }
  0xd3   : > { %v4033_v44 = vpop.eup %4032  ;;  %v627_v45 = vmul.f32 %v4647_v26, %v604_v40 }
  0xd4   : > { %v4035_v46 = vpop.eup %4034  ;;  %3783 = vmatprep.mubr.msk.f32.mxu1 %vm495_vm1, %v626_v43  ;;  %v605_v47 = vmul.f32 %v4033_v44, %v4607_v35 }
  0xd5   : > { %3784 = vmatmul.mubr.msk.f32.gmra.mrb[2].mxu1 %vm495_vm1, %v627_v45  ;;  %v606_v48 = vmul.f32 %v4035_v46, %v4610_v36 }
  0xd6   : > { %v628_v49 = vmul.f32 %v4647_v26, %v605_v47  ;;  %v4771_v47 = vld [vmem:[%s6534_s4 + $0x1] ss:$0 sm:$0xff] }
  0xd7   : > { %v4037_v50 = vpop.eup %4036  ;;  %v629_v51 = vmul.f32 %v4647_v26, %v606_v48 }
  0xd8   : > { %v4039_v52 = vpop.eup %4038  ;;  %3786 = vmatprep.mubr.msk.f32.mxu1 %vm495_vm1, %v628_v49  ;;  %v607_v53 = vmul.f32 %v4037_v50, %v4619_v41 }
  0xd9   : > { %3787 = vmatmul.mubr.msk.f32.gmra.mrb[4].mxu1 %vm495_vm1, %v629_v51  ;;  %v608_v54 = vmul.f32 %v4039_v52, %v4622_v42 }
  0xda   : > { %v630_v55 = vmul.f32 %v4647_v26, %v607_v53 }
  0xdb   : > { %v631_v56 = vmul.f32 %v4647_v26, %v608_v54  ;;  %v1280_v26 = vld [vmem:[%s6536_s6 + $0x18] sm:$0xff] }
  0xdc   : > { %3789 = vmatprep.mubr.msk.f32.mxu1 %vm495_vm1, %v630_v55  ;;  %v3884_v61 = vpack.c.bf16 %v1280_v26, %v1279_v60  ;;  %v4791_v60 = vld [vmem:[%s6535_s5] ss:$0 sm:$0xff] }
  0xdd   : > { %3790 = vmatmul.mubr.msk.f32.gmra.mrb[6].mxu1 %vm495_vm1, %v631_v56 }
  0xde   : > { %3885 = vmatprep.subr.bf16.mxu1 %v3884_v61 }
  0xdf   : > { %3887 = vmatpush3.bf16.msra.mxu1 %v3884_v61 }
  0xe0   : > { %3889 = vmatprep.subr.bf16.mxu1 %v3888_v4 }
  0xe3   : > { %3891 = vmatpush3.bf16.msra.mxu1 %v3888_v4 }
  0xe4   : > { %3893 = vmatprep.subr.bf16.mxu1 %v3892_v8 }
  0xe7   : > { %3895 = vmatpush3.bf16.msra.mxu1 %v3892_v8 }
 0x197   : > { %v3770_v13 = vpop.f32.mrb[0].mxu0 }
 0x198   : > { %v4731_v14 = vadd.f32 %v3770_v13, %v4728_v11  ;;  %v757_v15 = vpop.f32.mrb[1].mxu0 }
 0x199   : > { %v4734_v16 = vadd.f32 %v4728_v11, %v757_v15 }
 0x19a   : > { %v866_v22 = vrot.slane %v4731_v14, 5  ;;  %v6544_v27 = vrot.slane %v4731_v14, 6  ;;  %v4761_v43 = vmul.f32 %v4739_v20, %v4731_v14 }
 0x19b   : > { %v865_v31 = vrot.slane %v4734_v16, 5  ;;  %v953_v32 = vrot.slane %v4734_v16, 6  ;;  %v3773_v33 = vpop.f32.mrb[2].mxu0  ;;  %v6546_v34 = vrot.slane %v4734_v16, 7  ;;  %v4757_v40 = vmul.f32 %v4739_v20, %v4734_v16 }
 0x19c   : > { %v4748_v37 = vadd.f32 %v3773_v33, %v4728_v11  ;;  %v767_v38 = vpop.f32.mrb[3].mxu0 }
 0x19d   : > { %v867_v44 = vsel %vm864_vm2, %v865_v31, %v866_v22  ;;  %v912_v45 = vsel %vm864_vm2, %v846_v19, %v865_v31  ;;  %v4766_v46 = vadd.f32 %v4728_v11, %v767_v38  ;;  %v1000_v48 = vsel %vm952_vm3, %v950_v21, %v953_v32 }
 0x19e   : > { %6629 = vst [vmem:[#allocation25_spill] sm:$0xff] %v4748_v37  ;;  %v870_v49 = vrot.slane %v4748_v37, 5  ;;  %v958_v50 = vrot.slane %v4748_v37, 6  ;;  %v1046_v51 = vrot.slane %v4748_v37, 7  ;;  %v4779_v52 = vmul.f32 %v4739_v20, %v4748_v37 }
 0x19f   : > { %v868_v53 = vrot.slane %v4766_v46, 5  ;;  %v6545_v54 = vrot.slane %v4766_v46, 6  ;;  %v6543_v55 = vrot.slane %v4766_v46, 7  ;;  %v3776_v56 = vpop.f32.mrb[4].mxu0  ;;  %v918_v57 = vmul.f32 %v4753_v39, %v912_v45 }
 0x1a0   : > { %v4786_v58 = vadd.f32 %v3776_v56, %v4728_v11  ;;  %v777_v59 = vpop.f32.mrb[5].mxu0  ;;  %v1006_v26 = vmul.f32 %v4771_v47, %v1000_v48  ;;  %v1088_v61 = vsel %vm1040_vm4, %v1038_v25, %v6546_v34  ;;  %v919_v62 = vmul.f32 %v4753_v39, %v867_v44 }
 0x1a1   : > { %v4799_v63 = vsel %vm864_vm2, %v866_v22, %v868_v53  ;;  %v871_v0 = vsel %vm864_vm2, %v868_v53, %v870_v49  ;;  %v959_v4 = vsel %vm952_vm3, %v6545_v54, %v958_v50  ;;  %v4808_v5 = vsel %vm1040_vm4, %v6543_v55, %v1046_v51 }
 0x1a2   : > { %6630 = vst [vmem:[#allocation26_spill] sm:$0xff] %v4786_v58  ;;  %v4816_v8 = vmul.f32 %v4753_v39, %v871_v0  ;;  %v4819_v12 = vmul.f32 %v4771_v47, %v959_v4  ;;  %v874_v13 = vrot.slane %v4786_v58, 5  ;;  %v962_v15 = vrot.slane %v4786_v58, 6 }
 0x1a3   : > { %v1050_v19 = vrot.slane %v4786_v58, 7  ;;  %v4826_v21 = vmul.f32 %v4739_v20, %v4786_v58  ;;  %v4829_v22 = vadd.f32 %v4728_v11, %v777_v59  ;;  %v3779_v25 = vpop.f32.mrb[6].mxu0  ;;  %v934_v31 = vadd.f32 %v4791_v60, %v918_v57 }
 0x1a4   : > { %v4833_v33 = vadd.f32 %v3779_v25, %v4728_v11  ;;  %v787_v38 = vpop.f32.mrb[7].mxu0  ;;  %v3782_v44 = vpop.f32.mrb[0].mxu1  ;;  %v4836_v45 = vmul.f32 %v4813_v6, %v1088_v61  ;;  %v4839_v48 = vadd.f32 %v4791_v60, %v919_v62  ;;  %v4844_v53 = vsel %vm952_vm3, %v953_v32, %v6544_v27 }
 0x1a5   : > { %6631 = vst [vmem:[#allocation27_spill] sm:$0xff] %v4829_v22  ;;  %v872_v56 = vrot.slane %v4829_v22, 5  ;;  %v960_v57 = vrot.slane %v4829_v22, 6  ;;  %v1048_v59 = vrot.slane %v4829_v22, 7  ;;  %v4851_v0 = vmul.f32 %v4739_v20, %v4829_v22  ;;  %v797_v61 = vpop.f32.mrb[1].mxu1 }
 0x1a6   : > { %6632 = vst [vmem:[#allocation28_spill] sm:$0xff] %v4833_v33  ;;  %v878_v4 = vrot.slane %v4833_v33, 5  ;;  %v966_v62 = vrot.slane %v4833_v33, 6  ;;  %v1054_v25 = vrot.slane %v4833_v33, 7  ;;  %v4858_v32 = vmul.f32 %v4739_v20, %v4833_v33 }
 0x1a7   : > { %v873_v55 = vsel %vm864_vm2, %v870_v49, %v872_v56  ;;  %v875_v27 = vsel %vm864_vm2, %v872_v56, %v874_v13  ;;  %v961_v54 = vsel %vm952_vm3, %v958_v50, %v960_v57  ;;  %v963_v34 = vsel %vm952_vm3, %v960_v57, %v962_v15 }
 0x1a8   : > { %v4865_v28 = vmul.f32 %v4753_v39, %v873_v55  ;;  %v4868_v41 = vmul.f32 %v4753_v39, %v875_v27  ;;  %v4871_v42 = vmul.f32 %v4771_v47, %v961_v54  ;;  %v4874_v35 = vmul.f32 %v4771_v47, %v963_v34  ;;  %v3785_v36 = vpop.f32.mrb[2].mxu1 }
 0x1a9   : > { %v4877_v49 = vsel %vm1040_vm4, %v1046_v51, %v1048_v59  ;;  %v4880_v50 = vsel %vm1040_vm4, %v1048_v59, %v1050_v19  ;;  %v4883_v56 = vadd.f32 %v4728_v11, %v787_v38  ;;  %v4886_v55 = vadd.f32 %v3782_v44, %v4728_v11  ;;  %v807_v27 = vpop.f32.mrb[3].mxu1 }
 0x1aa   : > { %v4889_v54 = vadd.f32 %v4728_v11, %v797_v61  ;;  %v4892_v34 = vadd.f32 %v3785_v36, %v4728_v11  ;;  %v4895_v57 = vadd.f32 %v4728_v11, %v807_v27  ;;  %v1022_v51 = vadd.f32 %v1006_v26, %v934_v31 }
 0x1ab   : > { %6633 = vst [vmem:[#allocation29_spill] sm:$0xff] %v4883_v56  ;;  %v876_v59 = vrot.slane %v4883_v56, 5  ;;  %v964_v29 = vrot.slane %v4883_v56, 6  ;;  %v1052_v38 = vrot.slane %v4883_v56, 7  ;;  %v4902_v44 = vmul.f32 %v4739_v20, %v4883_v56 }
 0x1ac   : > { %6634 = vst [vmem:[#allocation30_spill] sm:$0xff] %v4892_v34  ;;  %6635 = vst [vmem:[#allocation31_spill] sm:$0xff] %v4895_v57  ;;  %v882_v61 = vrot.slane %v4886_v55, 5  ;;  %v880_v27 = vrot.slane %v4889_v54, 5  ;;  %v3788_v26 = vpop.f32.mrb[4].mxu1  ;;  %v6644_v37 = vrot.slane %v4892_v34, 6 }
 0x1ad   : > { %v877_v31 = vsel %vm864_vm2, %v874_v13, %v876_v59  ;;  %v879_v23 = vsel %vm864_vm2, %v876_v59, %v878_v4  ;;  %v965_v24 = vsel %vm952_vm3, %v962_v15, %v964_v29  ;;  %v967_v17 = vsel %vm952_vm3, %v964_v29, %v966_v62  ;;  %v817_v18 = vpop.f32.mrb[5].mxu1 }
 0x1ae   : > { %v4913_v9 = vmul.f32 %v4753_v39, %v877_v31  ;;  %v4916_v10 = vmul.f32 %v4753_v39, %v879_v23  ;;  %v4919_v30 = vmul.f32 %v4771_v47, %v965_v24  ;;  %v4922_v36 = vmul.f32 %v4771_v47, %v967_v17 }
 0x1af   : > { %v4925_v13 = vsel %vm1040_vm4, %v1050_v19, %v1052_v38  ;;  %v4928_v15 = vsel %vm1040_vm4, %v1052_v38, %v1054_v25  ;;  %v881_v29 = vsel %vm864_vm2, %v878_v4, %v880_v27  ;;  %v4932_v59 = vsel %vm864_vm2, %v880_v27, %v882_v61 }
 0x1b0   : > { %v4935_v23 = vmul.f32 %v4753_v39, %v881_v29  ;;  %v6567_v24 = vrot.slane %v4889_v54, 6  ;;  %v6568_v31 = vrot.slane %v4889_v54, 7  ;;  %v4941_v17 = vmul.f32 %v4739_v20, %v4889_v54  ;;  %v3791_v19 = vpop.f32.mrb[6].mxu1 }
 0x1b1   : > { %v886_v38 = vrot.slane %v4892_v34, 5  ;;  %v884_v27 = vrot.slane %v4895_v57, 5  ;;  %v827_v7 = vpop.f32.mrb[7].mxu1 }
 0x1b2   : > { %6636 = vst [vmem:[#allocation32_spill] sm:$0xff] %v4941_v17  ;;  %v969_v29 = vsel %vm952_vm3, %v966_v62, %v6567_v24  ;;  %v4953_v1 = vsel %vm1040_vm4, %v1054_v25, %v6568_v31  ;;  %v4967_v62 = vadd.f32 %v3788_v26, %v4728_v11  ;;  %v4970_v24 = vadd.f32 %v4728_v11, %v817_v18 }
 0x1b3   : > { %v4958_v2 = vmul.f32 %v4771_v47, %v969_v29  ;;  %v4961_v4 = vsel %vm864_vm2, %v882_v61, %v884_v27  ;;  %v4964_v56 = vsel %vm864_vm2, %v884_v27, %v886_v38  ;;  %v4973_v25 = vadd.f32 %v3791_v19, %v4728_v11 }
 0x1b4   : > { %6637 = vst [vmem:[#allocation33_spill] sm:$0xff] %v4964_v56  ;;  %6638 = vst [vmem:[#allocation34_spill] sm:$0xff] %v4967_v62  ;;  %v4976_v33 = vadd.f32 %v4728_v11, %v827_v7  ;;  %v1110_v29 = vadd.f32 %v4836_v45, %v1022_v51  ;;  %v890_v61 = vrot.slane %v4967_v62, 5  ;;  %v978_v3 = vrot.slane %v4967_v62, 6 }
 0x1b5   : > { %6639 = vst [vmem:[#allocation35_spill] sm:$0xff] %v4970_v24  ;;  %6640 = vst [vmem:[#allocation36_spill] sm:$0xff] %v4973_v25  ;;  %v1066_v27 = vrot.slane %v4967_v62, 7  ;;  %v4984_v26 = vmul.f32 %v4739_v20, %v4967_v62  ;;  %v888_v18 = vrot.slane %v4970_v24, 5  ;;  %v976_v19 = vrot.slane %v4970_v24, 6 }
 0x1b6   : > { %6641 = vst [vmem:[#allocation37_spill] sm:$0xff] %v4976_v33  ;;  %v1064_v31 = vrot.slane %v4970_v24, 7  ;;  %v4991_v7 = vmul.f32 %v4739_v20, %v4970_v24  ;;  %1164 = vst.msk [vmem:[#allocation3] sm:$0xff] %vm1163_vm5, %v4973_v25  ;;  %v894_v11 = vrot.slane %v4973_v25, 5  ;;  %v982_v45 = vrot.slane %v4973_v25, 6 }
 0x1b7   : > { %6642 = vst [vmem:[#allocation38_spill] sm:$0xff] %v4984_v26  ;;  %v1070_v51 = vrot.slane %v4973_v25, 7  ;;  %v892_v62 = vrot.slane %v4976_v33, 5  ;;  %v889_v58 = vsel %vm864_vm2, %v886_v38, %v888_v18  ;;  %v891_v22 = vsel %vm864_vm2, %v888_v18, %v890_v61 }
 0x1b8   : > { %6643 = vst [vmem:[#allocation39_spill] sm:$0xff] %v4991_v7  ;;  %v977_v24 = vsel %vm952_vm3, %v6644_v37, %v976_v19  ;;  %v979_v26 = vsel %vm952_vm3, %v976_v19, %v978_v3  ;;  %v5006_v7 = vmul.f32 %v4753_v39, %v889_v58  ;;  %v5009_v56 = vmul.f32 %v4753_v39, %v891_v22 }
 0x1b9   : > { %v5012_v25 = vmul.f32 %v4771_v47, %v977_v24  ;;  %v5015_v17 = vmul.f32 %v4771_v47, %v979_v26  ;;  %v6646_v38 = vrot.slane %v4892_v34, 7  ;;  %v5023_v37 = vsel %vm1040_vm4, %v1064_v31, %v1066_v27 }
 0x1ba   : > { %v893_v58 = vsel %vm864_vm2, %v890_v61, %v892_v62  ;;  %v895_v19 = vsel %vm864_vm2, %v892_v62, %v894_v11  ;;  %v980_v26 = vrot.slane %v4976_v33, 6  ;;  %v1007_v62 = vmul.f32 %v4771_v47, %v4844_v53 }
 0x1bb   : > { %6645 = vst [vmem:[#allocation40_spill] sm:$0xff] %v5015_v17  ;;  %v5020_v18 = vsel %vm1040_vm4, %v6646_v38, %v1064_v31  ;;  %v5028_v22 = vmul.f32 %v4753_v39, %v893_v58  ;;  %v5031_v24 = vmul.f32 %v4753_v39, %v895_v19  ;;  %v1068_v17 = vrot.slane %v4976_v33, 7 }
 0x1bc   : > { %v5037_v38 = vmul.f32 %v4739_v20, %v4976_v33  ;;  %v5040_v31 = vadd.f32 %v4757_v40, %v1110_v29  ;;  %v6649_v61 = vrot.slane %v4731_v14, 7  ;;  %v6650_v11 = vrot.slane %v4734_v16, 7 }
 0x1bd   : > { %6647 = vst [vmem:[#allocation41_spill] sm:$0xff] %v5028_v22  ;;  %6648 = vst [vmem:[#allocation42_spill] sm:$0xff] %v5031_v24  ;;  %v981_v19 = vsel %vm952_vm3, %v978_v3, %v980_v26  ;;  %v983_v24 = vsel %vm952_vm3, %v980_v26, %v982_v45  ;;  %v5052_v22 = vsel %vm1040_vm4, %v1066_v27, %v1068_v17  ;;  %v6651_v27 = vrot.slane %v4766_v46, 6 }
 0x1be   : > { %v1043_v58 = vsel %vm1040_vm4, %v6650_v11, %v6649_v61  ;;  %v5055_v33 = vsel %vm1040_vm4, %v1068_v17, %v1070_v51  ;;  %v5058_v40 = vmul.f32 %v4771_v47, %v981_v19  ;;  %v5061_v53 = vmul.f32 %v4771_v47, %v983_v24 }
 0x1bf   : > { %v3622_v29 = vmul.f32 -1.442695, %v5040_v31  ;;  %v1023_v61 = vadd.f32 %v1007_v62, %v4839_v48  ;;  %v1095_v3 = vmul.f32 %v4813_v6, %v1043_v58  ;;  %v920_v45 = vmul.f32 %v4753_v39, %v4799_v63 }
 0x1c0   : > { %v6652_v17 = vrot.slane %v4731_v14, 6  ;;  %v6653_v26 = vrot.slane %v4766_v46, 7  ;;  %v6654_v24 = vrot.slane %v4731_v14, 7  ;;  %v1133_v63 = vmul.f32 %v4739_v20, %v4766_v46 }
 0x1c1   : > { %4040 = vpow2.f32 %v3622_v29  ;;  %v1111_v58 = vadd.f32 %v1095_v3, %v1023_v61  ;;  %v936_v19 = vadd.f32 %v4791_v60, %v920_v45  ;;  %v1098_v29 = vmul.f32 %v4813_v6, %v4877_v49 }
 0x1c2   : > { %v957_v51 = vsel %vm952_vm3, %v6652_v17, %v6651_v27  ;;  %v1045_v11 = vsel %vm1040_vm4, %v6654_v24, %v6653_v26  ;;  %v937_v27 = vadd.f32 %v4791_v60, %v4816_v8  ;;  %v1097_v17 = vmul.f32 %v4813_v6, %v4808_v5 }
 0x1c3   : > { %v1008_v48 = vmul.f32 %v4771_v47, %v957_v51  ;;  %v1096_v62 = vmul.f32 %v4813_v6, %v1045_v11  ;;  %v938_v26 = vadd.f32 %v4791_v60, %v4865_v28  ;;  %v939_v51 = vadd.f32 %v4791_v60, %v4868_v41 }
 0x1c4   : > { %v1099_v61 = vmul.f32 %v4813_v6, %v4880_v50  ;;  %v5096_v3 = vadd.f32 %v4761_v43, %v1111_v58  ;;  %v1025_v8 = vadd.f32 %v4819_v12, %v937_v27  ;;  %v940_v5 = vadd.f32 %v4791_v60, %v4913_v9 }
 0x1c5   : > { %v1024_v45 = vadd.f32 %v1008_v48, %v936_v19  ;;  %v1026_v28 = vadd.f32 %v4871_v42, %v938_v26  ;;  %v1027_v24 = vadd.f32 %v4874_v35, %v939_v51  ;;  %v1100_v49 = vmul.f32 %v4813_v6, %v4925_v13 }
 0x1c6   : > { %v927_v41 = vmul.f32 %v4753_v39, %v4932_v59  ;;  %v3623_v50 = vmul.f32 -1.442695, %v5096_v3  ;;  %v1113_v11 = vadd.f32 %v1097_v17, %v1025_v8  ;;  %v1028_v48 = vadd.f32 %v4919_v30, %v940_v5 }
 0x1c7   : > { %v1112_v43 = vadd.f32 %v1096_v62, %v1024_v45  ;;  %v1114_v12 = vadd.f32 %v1098_v29, %v1026_v28  ;;  %v1115_v58 = vadd.f32 %v1099_v61, %v1027_v24  ;;  %v6655_v42 = vrot.slane %v4886_v55, 6 }
 0x1c8   : > { %v943_v9 = vadd.f32 %v4791_v60, %v927_v41  ;;  %v6656_v35 = vrot.slane %v4889_v54, 6  ;;  %4042 = vpow2.f32 %v3623_v50  ;;  %v5118_v59 = vadd.f32 %v4779_v52, %v1113_v11 }
 0x1c9   : > { %v5115_v13 = vadd.f32 %v1133_v63, %v1112_v43  ;;  %v1116_v62 = vadd.f32 %v1100_v49, %v1028_v48  ;;  %v5121_v27 = vadd.f32 %v4851_v0, %v1114_v12  ;;  %v5124_v30 = vadd.f32 %v4826_v21, %v1115_v58 }
 0x1ca   : > { %v971_v19 = vsel %vm952_vm3, %v6656_v35, %v6655_v42  ;;  %v6657_v26 = vrot.slane %v4886_v55, 7  ;;  %v6658_v29 = vrot.slane %v4889_v54, 7  ;;  %v3625_v52 = vmul.f32 -1.442695, %v5118_v59 }
 0x1cb   : > { %v1015_v17 = vmul.f32 %v4771_v47, %v971_v19  ;;  %v3624_v63 = vmul.f32 -1.442695, %v5115_v13  ;;  %v5135_v61 = vadd.f32 %v4902_v44, %v1116_v62  ;;  %v4041_v45 = vpop.eup %4040  ;;  %v3626_v21 = vmul.f32 -1.442695, %v5121_v27 }
 0x1cc   : > { %v1059_v51 = vsel %vm1040_vm4, %v6658_v29, %v6657_v26  ;;  %v3627_v8 = vmul.f32 -1.442695, %v5124_v30  ;;  %v1140_v28 = vmul.f32 %v4739_v20, %v4886_v55  ;;  %v1213_v24 = vadd.f32 1.0, %v4041_v45 }
 0x1cd   : > { %v1103_v0 = vmul.f32 %v4813_v6, %v1059_v51  ;;  %v1031_v5 = vadd.f32 %v1015_v17, %v943_v9  ;;  %4044 = vpow2.f32 %v3624_v63  ;;  %v3628_v49 = vmul.f32 -1.442695, %v5135_v61 }
 0x1ce   : > { %v941_v41 = vadd.f32 %v4791_v60, %v4916_v10  ;;  %4046 = vpow2.f32 %v3625_v52  ;;  %v1101_v50 = vmul.f32 %v4813_v6, %v4928_v15  ;;  %v942_v43 = vadd.f32 %v4791_v60, %v4935_v23 }
 0x1cf   : > { %v1119_v44 = vadd.f32 %v1103_v0, %v1031_v5  ;;  %4048 = vrcp.f32 %v1213_v24  ;;  %v1102_v48 = vmul.f32 %v4813_v6, %v4953_v1  ;;  %v928_v12 = vmul.f32 %v4753_v39, %v4961_v4  ;;  %v6663_v0 = vld [vmem:[#allocation32_spill] sm:$0xff] }
 0x1d0   : > { %v1029_v11 = vadd.f32 %v4922_v36, %v941_v41  ;;  %4050 = vpow2.f32 %v3626_v21  ;;  %v1030_v10 = vadd.f32 %v4958_v2, %v942_v43  ;;  %v6659_v9 = vrot.slane %v4895_v57, 6  ;;  %v6664_v21 = vld [vmem:[#allocation33_spill] sm:$0xff] }
 0x1d1   : > { %v5154_v58 = vadd.f32 %v1140_v28, %v1119_v44  ;;  %v6660_v15 = vmov %v6655_v42  ;;  %4052 = vpow2.f32 %v3627_v8  ;;  %v944_v36 = vadd.f32 %v4791_v60, %v928_v12 }
 0x1d2   : > { %v973_v23 = vsel %vm952_vm3, %v6660_v15, %v6659_v9  ;;  %v1117_v42 = vadd.f32 %v1101_v50, %v1029_v11  ;;  %4054 = vpow2.f32 %v3628_v49  ;;  %v1118_v35 = vadd.f32 %v1102_v48, %v1030_v10  ;;  %v4043_v17 = vpop.eup %4042 }
 0x1d3   : > { %v1016_v1 = vmul.f32 %v4771_v47, %v973_v23  ;;  %v3631_v4 = vmul.f32 -1.442695, %v5154_v58  ;;  %v6661_v19 = vrot.slane %v4895_v57, 7  ;;  %v6662_v2 = vmov %v6657_v26 }
 0x1d4   : > { %v5171_v26 = vadd.f32 %v4858_v32, %v1117_v42  ;;  %v1141_v63 = vmul.f32 %v4739_v20, %v4895_v57  ;;  %v1214_v52 = vadd.f32 1.0, %v4043_v17  ;;  %v5177_v45 = vadd.f32 %v6663_v0, %v1118_v35 }
 0x1d5   : > { %v1061_v62 = vsel %vm1040_vm4, %v6662_v2, %v6661_v19  ;;  %v1032_v29 = vadd.f32 %v1016_v1, %v944_v36  ;;  %4056 = vpow2.f32 %v3631_v4  ;;  %v929_v8 = vmul.f32 %v4753_v39, %v6664_v21 }
 0x1d6   : > { %v1104_v51 = vmul.f32 %v4813_v6, %v1061_v62  ;;  %v3629_v5 = vmul.f32 -1.442695, %v5171_v26  ;;  %v6665_v32 = vrot.slane %v4892_v34, 6  ;;  %v6666_v24 = vmov %v6659_v9 }
 0x1d7   : > { %v6667_v41 = vrot.slane %v4892_v34, 7  ;;  %v6668_v44 = vmov %v6661_v19  ;;  %4058 = vrcp.f32 %v1214_v52  ;;  %v3630_v43 = vmul.f32 -1.442695, %v5177_v45  ;;  %v4045_v48 = vpop.eup %4044 }
 0x1d8   : > { %v1120_v28 = vadd.f32 %v1104_v51, %v1032_v29  ;;  %v975_v49 = vsel %vm952_vm3, %v6666_v24, %v6665_v32  ;;  %v945_v39 = vadd.f32 %v4791_v60, %v929_v8  ;;  %4060 = vpow2.f32 %v3629_v5  ;;  %v4047_v15 = vpop.eup %4046  ;;  %v6671_v5 = vld [vmem:[#allocation41_spill] sm:$0xff]  ;;  %v6672_v24 = vld [vmem:[#allocation39_spill] sm:$0xff] }
 0x1d9   : > { %v1063_v50 = vsel %vm1040_vm4, %v6668_v44, %v6667_v41  ;;  %v1017_v11 = vmul.f32 %v4771_v47, %v975_v49  ;;  %v1142_v9 = vmul.f32 %v4739_v20, %v4892_v34  ;;  %v1215_v23 = vadd.f32 1.0, %v4045_v48  ;;  %v4049_v1 = vpop.eup %4048 }
 0x1da   : > { %v5195_v12 = vadd.f32 %v1141_v63, %v1120_v28  ;;  %v1105_v10 = vmul.f32 %v4813_v6, %v1063_v50  ;;  %4062 = vpow2.f32 %v3630_v43  ;;  %v946_v36 = vadd.f32 %v4791_v60, %v5006_v7  ;;  %v4051_v2 = vpop.eup %4050  ;;  %v6670_v63 = vld [vmem:[#allocation40_spill] sm:$0xff]  ;;  %v6673_v50 = vld [vmem:[#allocation38_spill] sm:$0xff] }
 0x1db   : > { %v1033_v42 = vadd.f32 %v1017_v11, %v945_v39  ;;  %v1216_v4 = vadd.f32 1.0, %v4047_v15  ;;  %v1106_v35 = vmul.f32 %v4813_v6, %v5020_v18  ;;  %v947_v19 = vadd.f32 %v4791_v60, %v5009_v56  ;;  %v4053_v51 = vpop.eup %4052 }
 0x1dc   : > { %v3632_v47 = vmul.f32 -1.442695, %v5195_v12  ;;  %v5208_v62 = vmul.f32 %v4049_v1, %v5040_v31  ;;  %4064 = vrcp.f32 %v1215_v23  ;;  %v1034_v29 = vadd.f32 %v5012_v25, %v946_v36  ;;  %v4055_v18 = vpop.eup %4054 }
 0x1dd   : > { %v1121_v17 = vadd.f32 %v1105_v10, %v1033_v42  ;;  %4066 = vrcp.f32 %v1216_v4  ;;  %v1217_v7 = vadd.f32 1.0, %v4051_v2  ;;  %v1035_v52 = vadd.f32 %v6670_v63, %v947_v19  ;;  %v6674_v10 = vld [vmem:[#allocation42_spill] sm:$0xff] }
 0x1de   : > { %6669 = vst [vmem:[#allocation32_spill] sm:$0xff] %v5208_v62  ;;  %v1107_v0 = vmul.f32 %v4813_v6, %v5023_v37  ;;  %1903 = vrot.lane.b32.xlu0 %v5208_v62, %s4421_s20  ;;  %3808 = vmatprep.mubr.msk.f32.mxu1 %vm1163_vm5, %v5208_v62  ;;  %v1218_v56 = vadd.f32 1.0, %v4053_v51  ;;  %4068 = vpow2.f32 %v3632_v47  ;;  %v1122_v25 = vadd.f32 %v1106_v35, %v1034_v29  ;;  %v6676_v47 = vld [vmem:[#allocation36_spill] sm:$0xff] }
 0x1df   : > { %v5218_v31 = vadd.f32 %v1142_v9, %v1121_v17  ;;  %4070 = vrcp.f32 %v1217_v7  ;;  %v1219_v21 = vadd.f32 1.0, %v4055_v18  ;;  %v948_v28 = vadd.f32 %v4791_v60, %v6671_v5  ;;  %v4057_v32 = vpop.eup %4056 }
 0x1e0   : > { %v1123_v8 = vadd.f32 %v1107_v0, %v1035_v52  ;;  %4072 = vrcp.f32 %v1218_v56  ;;  %v5224_v49 = vadd.f32 %v6672_v24, %v1122_v25  ;;  %v1108_v41 = vmul.f32 %v4813_v6, %v5052_v22 }
 0x1e1   : > { %v3633_v37 = vmul.f32 -1.442695, %v5218_v31  ;;  %4074 = vrcp.f32 %v1219_v21  ;;  %v1222_v44 = vadd.f32 1.0, %v4057_v32  ;;  %v1036_v39 = vadd.f32 %v5058_v40, %v948_v28  ;;  %v4059_v11 = vpop.eup %4058 }
 0x1e2   : > { %v5229_v43 = vadd.f32 %v6673_v50, %v1123_v8  ;;  %v3634_v48 = vmul.f32 -1.442695, %v5224_v49  ;;  %v949_v9 = vadd.f32 %v4791_v60, %v6674_v10  ;;  %v1109_v15 = vmul.f32 %v4813_v6, %v5055_v33  ;;  %v4061_v23 = vpop.eup %4060 }
 0x1e3   : > { %4076 = vpow2.f32 %v3633_v37  ;;  %v5238_v22 = vmul.f32 %v4059_v11, %v5096_v3  ;;  %v1124_v36 = vadd.f32 %v1108_v41, %v1036_v39  ;;  %v1220_v40 = vadd.f32 1.0, %v4061_v23 }
 0x1e4   : > { %4078 = vrcp.f32 %v1222_v44  ;;  %v3635_v42 = vmul.f32 -1.442695, %v5229_v43  ;;  %v4063_v1 = vpop.eup %4062  ;;  %v1037_v4 = vadd.f32 %v5061_v53, %v949_v9  ;;  %v1146_v35 = vmul.f32 %v4739_v20, %v6676_v47 }
 0x1e5   : > { %6675 = vst [vmem:[#allocation33_spill] sm:$0xff] %v5238_v22  ;;  %4080 = vpow2.f32 %v3634_v48  ;;  %1905 = vrot.lane.b32.xlu1 %v5238_v22, %s4421_s20  ;;  %3809 = vmatmul.mubr.msk.f32.vlgmr.msra.gmra.mrb[8].mxu1 %vm1163_vm5, %v5238_v22  ;;  %v1221_v60 = vadd.f32 1.0, %v4063_v1  ;;  %v5247_v6 = vadd.f32 %v5037_v38, %v1124_v36 }
 0x1e6   : > { %4082 = vpow2.f32 %v3635_v42  ;;  %v4065_v33 = vpop.eup %4064  ;;  %v1125_v3 = vadd.f32 %v1109_v15, %v1037_v4  ;;  %v5353_v15 = vpop.permute.xlu0 %1484 }
 0x1e7   : > { %4084 = vrcp.f32 %v1220_v40  ;;  %v4067_v19 = vpop.eup %4066  ;;  %v5252_v53 = vmul.f32 %v4065_v33, %v5115_v13  ;;  %v3636_v2 = vmul.f32 -1.442695, %v5247_v6 }
 0x1e8   : > { %4086 = vrcp.f32 %v1221_v60  ;;  %v4069_v17 = vpop.eup %4068  ;;  %v5256_v29 = vmul.f32 %v4067_v19, %v5118_v59  ;;  %v5258_v51 = vadd.f32 %v1146_v35, %v1125_v3 }
 0x1e9   : > { %6677 = vst [vmem:[#allocation40_spill] sm:$0xff] %v5252_v53  ;;  %v4071_v38 = vpop.eup %4070  ;;  %1907 = vrot.lane.b32.xlu0 %v5252_v53, %s4421_s20  ;;  %3811 = vmatprep.mubr.msk.f32.mxu1 %vm1163_vm5, %v5252_v53  ;;  %v1223_v20 = vadd.f32 1.0, %v4069_v17  ;;  %4088 = vpow2.f32 %v3636_v2 }
 0x1ea   : > { %6678 = vst [vmem:[#allocation41_spill] sm:$0xff] %v5256_v29  ;;  %v4073_v13 = vpop.eup %4072  ;;  %3812 = vmatmul.mubr.msk.f32.gmra.mrb[10].mxu1 %vm1163_vm5, %v5256_v29  ;;  %v5267_v7 = vmul.f32 %v4071_v38, %v5121_v27  ;;  %v3637_v59 = vmul.f32 -1.442695, %v5258_v51 }
 0x1eb   : > { %v4075_v63 = vpop.eup %4074  ;;  %v5271_v52 = vmul.f32 %v4073_v13, %v5124_v30  ;;  %4090 = vrcp.f32 %v1223_v20 }
 0x1ec   : > { %6679 = vst [vmem:[#allocation39_spill] sm:$0xff] %v5267_v7  ;;  %3814 = vmatprep.mubr.msk.f32.mxu1 %vm1163_vm5, %v5267_v7  ;;  %v5276_v18 = vmul.f32 %v4075_v63, %v5135_v61  ;;  %4092 = vpow2.f32 %v3637_v59 }
 0x1ed   : > { %6680 = vst [vmem:[#allocation38_spill] sm:$0xff] %v5271_v52  ;;  %v4077_v0 = vpop.eup %4076 }
 0x1ee   : > { %6681 = vst [vmem:[#allocation42_spill] sm:$0xff] %v5276_v18  ;;  %v4079_v56 = vpop.eup %4078  ;;  %v1224_v25 = vadd.f32 1.0, %v4077_v0  ;;  %3815 = vmatmul.mubr.msk.f32.gmra.mrb[12].mxu1 %vm1163_vm5, %v5271_v52 }
 0x1ef   : > { %v4081_v21 = vpop.eup %4080  ;;  %v5281_v27 = vmul.f32 %v4079_v56, %v5154_v58  ;;  %3817 = vmatprep.mubr.msk.f32.mxu1 %vm1163_vm5, %v5276_v18 }
 0x1f0   : > { %v4083_v30 = vpop.eup %4082  ;;  %4094 = vrcp.f32 %v1224_v25  ;;  %v1225_v8 = vadd.f32 1.0, %v4081_v21 }
 0x1f1   : > { %6682 = vst [vmem:[#allocation43_spill] sm:$0xff] %v5281_v27  ;;  %v4085_v5 = vpop.eup %4084  ;;  %1921 = vrot.lane.b32.xlu1 %v5281_v27, %s4421_s20  ;;  %v1226_v61 = vadd.f32 1.0, %v4083_v30 }
 0x1f2   : > { %v4087_v28 = vpop.eup %4086  ;;  %v5288_v32 = vmul.f32 %v4085_v5, %v5171_v26  ;;  %4096 = vrcp.f32 %v1225_v8 }
 0x1f3   : > { %v5291_v37 = vmul.f32 %v4087_v28, %v5177_v45  ;;  %4098 = vrcp.f32 %v1226_v61  ;;  %v4089_v58 = vpop.eup %4088 }
 0x1f4   : > { %6683 = vst [vmem:[#allocation44_spill] sm:$0xff] %v5288_v32  ;;  %3818 = vmatmul.mubr.msk.f32.gmra.mrb[14].mxu1 %vm1163_vm5, %v5288_v32  ;;  %v1227_v24 = vadd.f32 1.0, %v4089_v58 }
 0x1f5   : > { %6684 = vst [vmem:[#allocation45_spill] sm:$0xff] %v5291_v37  ;;  %3820 = vmatprep.mubr.msk.f32.mxu1 %vm1163_vm5, %v5291_v37  ;;  %1909 = vrot.lane.b32.xlu1 %v5256_v29, %s4421_s20  ;;  %v4091_v41 = vpop.eup %4090 }
 0x1f6   : > { %v4093_v44 = vpop.eup %4092  ;;  %v5300_v26 = vmul.f32 %v4091_v41, %v5195_v12  ;;  %4100 = vrcp.f32 %v1227_v24 }
 0x1f7   : > { %v1228_v45 = vadd.f32 1.0, %v4093_v44 }
 0x1f8   : > { %6685 = vst [vmem:[#allocation46_spill] sm:$0xff] %v5300_v26  ;;  %3821 = vmatmul.mubr.msk.f32.gmra.mrb[16].mxu1 %vm1163_vm5, %v5281_v27  ;;  %1923 = vrot.lane.b32.xlu0 %v5300_v26, %s4421_s20 }
 0x1f9   : > { %3823 = vmatprep.mubr.msk.f32.mxu1 %vm1163_vm5, %v5300_v26  ;;  %4102 = vrcp.f32 %v1228_v45 }
 0x1fa   : > { %v4095_v50 = vpop.eup %4094 }
 0x1fb   : > { %v5309_v39 = vmul.f32 %v4095_v50, %v5218_v31 }
 0x1fc   : > { %v4097_v11 = vpop.eup %4096  ;;  %1911 = vrot.lane.b32.xlu0 %v5267_v7, %s4421_s20 }
 0x1fd   : > { %6686 = vst [vmem:[#allocation47_spill] sm:$0xff] %v5309_v39  ;;  %v4099_v48 = vpop.eup %4098  ;;  %1925 = vrot.lane.b32.xlu1 %v5309_v39, %s4421_s20  ;;  %v5316_v12 = vmul.f32 %v4097_v11, %v5224_v49  ;;  %3824 = vmatmul.mubr.msk.f32.gmra.mrb[18].mxu1 %vm1163_vm5, %v5309_v39 }
 0x1fe   : > { %v5323_v31 = vmul.f32 %v4099_v48, %v5229_v43 }
 0x1ff   : > { %6687 = vst [vmem:[#allocation48_spill] sm:$0xff] %v5316_v12  ;;  %3826 = vmatprep.mubr.msk.f32.mxu1 %vm1163_vm5, %v5316_v12 }
 0x200   : > { %6688 = vst [vmem:[#allocation49_spill] sm:$0xff] %v5323_v31  ;;  %v4101_v10 = vpop.eup %4100  ;;  %1927 = vrot.lane.b32.xlu0 %v5316_v12, %s4421_s20 }
 0x201   : > { %1913 = vrot.lane.b32.xlu1 %v5271_v52, %s4421_s20  ;;  %3827 = vmatmul.mubr.msk.f32.gmra.mrb[20].mxu1 %vm1163_vm5, %v5323_v31  ;;  %v5332_v49 = vmul.f32 %v4101_v10, %v5247_v6 }
 0x203   : > { %6689 = vst [vmem:[#allocation50_spill] sm:$0xff] %v5332_v49  ;;  %v4103_v9 = vpop.eup %4102  ;;  %3829 = vmatprep.mubr.msk.f32.mxu1 %vm1163_vm5, %v5332_v49 }
 0x204   : > { %1919 = vrot.lane.b32.xlu0 %v5291_v37, %s4421_s20  ;;  %v5341_v43 = vmul.f32 %v4103_v9, %v5258_v51 }
 0x205   : > { %1929 = vrot.lane.b32.xlu1 %v5323_v31, %s4421_s20 }
 0x206   : > { %6690 = vst [vmem:[#allocation51_spill] sm:$0xff] %v5341_v43  ;;  %3830 = vmatmul.mubr.msk.f32.gmra.mrb[22].mxu1 %vm1163_vm5, %v5341_v43 }
 0x208   : > { %1915 = vrot.lane.b32.xlu0 %v5276_v18, %s4421_s20 }
 0x209   : > { %1917 = vrot.lane.b32.xlu1 %v5288_v32, %s4421_s20 }
 0x20c   : > { %1931 = vrot.lane.b32.xlu0 %v5332_v49, %s4421_s20 }
 0x20d   : > { %1933 = vrot.lane.b32.xlu1 %v5341_v43, %s4421_s20 }
 0x2b8   : > { %v3810_v23 = vpop.f32.mrb[8].mxu1 }
 0x2b9   : > { %v5356_v42 = vadd.f32 %v3810_v23, %v5353_v15  ;;  %1728 = vst.msk [vmem:[#allocation4 + $0x8] sm:$0xff] %vm495_vm1, %v3810_v23  ;;  %v1399_v36 = vpop.f32.mrb[9].mxu1  ;;  %1761 = vrot.lane.b32.xlu1 %v3810_v23, %s4422_s13 }
 0x2ba   : > { %v5361_v1 = vadd.f32 %v5353_v15, %v1399_v36  ;;  %1727 = vst.msk [vmem:[#allocation4] sm:$0xff] %vm495_vm1, %v1399_v36 }
 0x2bb   : > { %v1521_v40 = vmul.f32 1.442695, %v5356_v42  ;;  %vm1504_vm6 = vcmp.gt.f32.partialorder %v5356_v42, 20.0 }
 0x2bc   : > { %v1519_v4 = vmul.f32 1.442695, %v5361_v1  ;;  %vm1503_vm7 = vcmp.gt.f32.partialorder %v5361_v1, 20.0 }
 0x2bd   : > { %4104 = vpow2.f32 %v1521_v40  ;;  %v3813_v60 = vpop.f32.mrb[10].mxu1  ;;  %1759 = vrot.lane.b32.xlu1 %v1399_v36, %s4422_s13 }
 0x2be   : > { %4106 = vpow2.f32 %v1519_v4  ;;  %v5368_v6 = vadd.f32 %v3813_v60, %v5353_v15  ;;  %1730 = vst.msk [vmem:[#allocation4 + $0x18] sm:$0xff] %vm495_vm1, %v3813_v60  ;;  %v1409_v33 = vpop.f32.mrb[11].mxu1  ;;  %1765 = vrot.lane.b32.xlu0 %v3813_v60, %s4422_s13 }
 0x2bf   : > { %v5373_v3 = vadd.f32 %v5353_v15, %v1409_v33  ;;  %1729 = vst.msk [vmem:[#allocation4 + $0x10] sm:$0xff] %vm495_vm1, %v1409_v33 }
 0x2c0   : > { %v1525_v47 = vmul.f32 1.442695, %v5368_v6  ;;  %vm1506_vm11 = vcmp.gt.f32.partialorder %v5368_v6, 20.0 }
 0x2c1   : > { %v1523_v35 = vmul.f32 1.442695, %v5373_v3  ;;  %v3816_v19 = vpop.f32.mrb[12].mxu1  ;;  %1763 = vrot.lane.b32.xlu1 %v1409_v33, %s4422_s13  ;;  %vm1505_vm13 = vcmp.gt.f32.partialorder %v5373_v3, 20.0 }
 0x2c2   : > { %4108 = vpow2.f32 %v1525_v47  ;;  %v5380_v2 = vadd.f32 %v3816_v19, %v5353_v15  ;;  %1732 = vst.msk [vmem:[#allocation4 + $0x28] sm:$0xff] %vm495_vm1, %v3816_v19  ;;  %v1419_v17 = vpop.f32.mrb[13].mxu1  ;;  %1769 = vrot.lane.b32.xlu0 %v3816_v19, %s4422_s13 }
 0x2c3   : > { %4110 = vpow2.f32 %v1523_v35  ;;  %v5385_v51 = vadd.f32 %v5353_v15, %v1419_v17  ;;  %1731 = vst.msk [vmem:[#allocation4 + $0x20] sm:$0xff] %vm495_vm1, %v1419_v17 }
 0x2c4   : > { %v1529_v38 = vmul.f32 1.442695, %v5380_v2  ;;  %vm1508_vm0 = vcmp.gt.f32.partialorder %v5380_v2, 20.0 }
 0x2c5   : > { %v1527_v20 = vmul.f32 1.442695, %v5385_v51  ;;  %1767 = vrot.lane.b32.xlu1 %v1419_v17, %s4422_s13 }
 0x2c6   : > { %4112 = vpow2.f32 %v1529_v38 }
 0x2c7   : > { %v3819_v13 = vpop.f32.mrb[14].mxu1  ;;  %v5391_v59 = vpop.eup %4104  ;;  %4114 = vpow2.f32 %v1527_v20 }
 0x2c8   : > { %v5394_v63 = vadd.f32 %v3819_v13, %v5353_v15  ;;  %1734 = vst.msk [vmem:[#allocation4 + $0x38] sm:$0xff] %vm495_vm1, %v3819_v13  ;;  %v1429_v0 = vpop.f32.mrb[15].mxu1  ;;  %1773 = vrot.lane.b32.xlu0 %v3819_v13, %s4422_s13  ;;  %v5398_v56 = vpop.eup %4106  ;;  %v1560_v25 = vadd.f32 1.0, %v5391_v59  ;;  %v1563_v58 = vmul.f32 -0.5, %v5391_v59  ;;  %v1566_v4 = vand.u32 2147483647, %v5391_v59 }
 0x2c9   : > { %1733 = vst.msk [vmem:[#allocation4 + $0x30] sm:$0xff] %vm495_vm1, %v1429_v0  ;;  %1771 = vrot.lane.b32.xlu1 %v1429_v0, %s4422_s13  ;;  %v1551_v30 = vadd.f32 1.0, %v5398_v56  ;;  %v5410_v28 = vadd.f32 %v5353_v15, %v1429_v0  ;;  %v1554_v9 = vmul.f32 -0.5, %v5398_v56  ;;  %v1557_v60 = vand.u32 2147483647, %v5398_v56 }
 0x2ca   : > { %v1533_v21 = vmul.f32 1.442695, %v5394_v63  ;;  %4116 = vlog2.f32 %v1560_v25  ;;  %v1564_v10 = vadd.f32 1.0, %v1563_v58  ;;  %v5447_v25 = vpop.permute.xlu1 %1905  ;;  %vm1567_vm8 = vcmp.lt.f32.partialorder %v1566_v4, 0.0004427343 }
 0x2cb   : > { %v3822_v8 = vpop.f32.mrb[16].mxu1  ;;  %v1531_v11 = vmul.f32 1.442695, %v5410_v28  ;;  %v1555_v13 = vadd.f32 1.0, %v1554_v9  ;;  %vm5459_vm9 = vcmp.lt.f32.partialorder %v1557_v60, 0.0004427343 }
 0x2cc   : > { %1736 = vst.msk [vmem:[#allocation4 + $0x48] sm:$0xff] %vm495_vm1, %v3822_v8  ;;  %v1439_v5 = vpop.f32.mrb[17].mxu1  ;;  %1777 = vrot.lane.b32.xlu0 %v3822_v8, %s4422_s13  ;;  %v5407_v61 = vpop.eup %4108  ;;  %4118 = vpow2.f32 %v1533_v21  ;;  %v5419_v44 = vadd.f32 %v3822_v8, %v5353_v15  ;;  %v1565_v20 = vmul.f32 %v5391_v59, %v1564_v10 }
 0x2cd   : > { %1735 = vst.msk [vmem:[#allocation4 + $0x40] sm:$0xff] %vm495_vm1, %v1439_v5  ;;  %v5414_v24 = vpop.eup %4110  ;;  %1775 = vrot.lane.b32.xlu1 %v1439_v5, %s4422_s13  ;;  %4120 = vlog2.f32 %v1551_v30  ;;  %v1578_v41 = vadd.f32 1.0, %v5407_v61  ;;  %v5429_v36 = vadd.f32 %v5353_v15, %v1439_v5  ;;  %v1581_v47 = vmul.f32 -0.5, %v5407_v61 }
 0x2ce   : > { %v1569_v45 = vadd.f32 1.0, %v5414_v24  ;;  %v1537_v33 = vmul.f32 1.442695, %v5419_v44  ;;  %v1572_v5 = vmul.f32 -0.5, %v5414_v24  ;;  %v1556_v4 = vmul.f32 %v5398_v56, %v1555_v13 }
 0x2cf   : > { %4122 = vlog2.f32 %v1578_v41  ;;  %v1535_v21 = vmul.f32 1.442695, %v5429_v36  ;;  %v5455_v41 = vpop.permute.xlu0 %1903  ;;  %v1584_v60 = vand.u32 2147483647, %v5407_v61  ;;  %v1575_v49 = vand.u32 2147483647, %v5414_v24 }
 0x2d0   : > { %v5422_v50 = vpop.eup %4112  ;;  %v3825_v48 = vpop.f32.mrb[18].mxu1  ;;  %4124 = vlog2.f32 %v1569_v45  ;;  %v1582_v45 = vadd.f32 1.0, %v1581_v47  ;;  %v1573_v43 = vadd.f32 1.0, %v1572_v5 }
 0x2d1   : > { %v5426_v23 = vpop.eup %4114  ;;  %1738 = vst.msk [vmem:[#allocation4 + $0x58] sm:$0xff] %vm495_vm1, %v3825_v48  ;;  %v1449_v40 = vpop.f32.mrb[19].mxu1  ;;  %1781 = vrot.lane.b32.xlu0 %v3825_v48, %s4422_s13  ;;  %v1596_v35 = vadd.f32 1.0, %v5422_v50  ;;  %v5441_v19 = vadd.f32 %v3825_v48, %v5353_v15  ;;  %4126 = vpow2.f32 %v1531_v11  ;;  %vm5497_vm10 = vcmp.lt.f32.partialorder %v1584_v60, 0.0004427343 }
 0x2d2   : > { %1737 = vst.msk [vmem:[#allocation4 + $0x50] sm:$0xff] %vm495_vm1, %v1449_v40  ;;  %1779 = vrot.lane.b32.xlu1 %v1449_v40, %s4422_s13  ;;  %v1587_v0 = vadd.f32 1.0, %v5426_v23  ;;  %v5465_v10 = vadd.f32 %v5353_v15, %v1449_v40  ;;  %v1583_v13 = vmul.f32 %v5407_v61, %v1582_v45  ;;  %vm5508_vm12 = vcmp.lt.f32.partialorder %v1575_v49, 0.0004427343 }
 0x2d3   : > { %4128 = vlog2.f32 %v1596_v35  ;;  %v1541_v48 = vmul.f32 1.442695, %v5441_v19  ;;  %v1602_v60 = vand.u32 2147483647, %v5422_v50 }
 0x2d4   : > { %v4117_v17 = vpop.eup %4116  ;;  %v3828_v38 = vpop.f32.mrb[20].mxu1  ;;  %4130 = vpow2.f32 %v1537_v33 }
 0x2d5   : > { %1740 = vst.msk [vmem:[#allocation4 + $0x68] sm:$0xff] %vm495_vm1, %v3828_v38  ;;  %v1459_v30 = vpop.f32.mrb[21].mxu1  ;;  %1785 = vrot.lane.b32.xlu0 %v3828_v38, %s4422_s13  ;;  %v1562_v8 = vmul.f32 0.6931472, %v4117_v17  ;;  %4132 = vlog2.f32 %v1587_v0  ;;  %v5472_v17 = vpop.permute.xlu1 %1921  ;;  %v1599_v0 = vmul.f32 -0.5, %v5422_v50  ;;  %v5492_v61 = vadd.f32 %v3828_v38, %v5353_v15 }
 0x2d6   : > { %v5453_v58 = vpop.eup %4118  ;;  %1739 = vst.msk [vmem:[#allocation4 + $0x60] sm:$0xff] %vm495_vm1, %v1459_v30  ;;  %1783 = vrot.lane.b32.xlu1 %v1459_v30, %s4422_s13  ;;  %4134 = vpow2.f32 %v1535_v21  ;;  %v5495_v45 = vadd.f32 %v5353_v15, %v1459_v30  ;;  %vm5537_vm14 = vcmp.lt.f32.partialorder %v1602_v60, 0.0004427343 }
 0x2d7   : > { %v4121_v11 = vpop.eup %4120  ;;  %v1568_v9 = vsel %vm1567_vm8, %v1565_v20, %v1562_v8  ;;  %v1614_v40 = vadd.f32 1.0, %v5453_v58  ;;  %4136 = vpow2.f32 %v1541_v48  ;;  %v1539_v8 = vmul.f32 1.442695, %v5465_v10 }
 0x2d8   : > { %v1696_v33 = vsel %vm1504_vm6, %v5356_v42, %v1568_v9  ;;  %v1553_v35 = vmul.f32 0.6931472, %v4121_v11  ;;  %v1590_v11 = vmul.f32 -0.5, %v5426_v23  ;;  %v5489_v9 = vpop.permute.xlu0 %1907  ;;  %v1545_v49 = vmul.f32 1.442695, %v5492_v61 }
 0x2d9   : > { %v3831_v47 = vpop.f32.mrb[22].mxu1  ;;  %v1712_v42 = vmul.f32 0.125, %v1696_v33  ;;  %v4123_v21 = vpop.eup %4122  ;;  %4138 = vlog2.f32 %v1614_v40  ;;  %vm1507_vm6 = vcmp.gt.f32.partialorder %v5385_v51, 20.0  ;;  %vm1510_vm8 = vcmp.gt.f32.partialorder %v5394_v63, 20.0 }
 0x2da   : > { %1742 = vst.msk [vmem:[#allocation4 + $0x78] sm:$0xff] %vm495_vm1, %v3831_v47  ;;  %1789 = vrot.lane.b32.xlu0 %v3831_v47, %s4422_s13  ;;  %v1469_v20 = vpop.f32.mrb[23].mxu1  ;;  %v1559_v56 = vsel %vm5459_vm9, %v1556_v4, %v1553_v35  ;;  %v4125_v59 = vpop.eup %4124  ;;  %v1580_v33 = vmul.f32 0.6931472, %v4123_v21  ;;  %4140 = vpow2.f32 %v1539_v8  ;;  %v1591_v35 = vadd.f32 1.0, %v1590_v11 }
 0x2db   : > { %1741 = vst.msk [vmem:[#allocation4 + $0x70] sm:$0xff] %vm495_vm1, %v1469_v20  ;;  %1787 = vrot.lane.b32.xlu1 %v1469_v20, %s4422_s13  ;;  %v1695_v5 = vsel %vm1503_vm7, %v5361_v1, %v1559_v56  ;;  %v1571_v4 = vmul.f32 0.6931472, %v4125_v59  ;;  %v1574_v1 = vmul.f32 %v5414_v24, %v1573_v43  ;;  %v5502_v56 = vpop.eup %4126  ;;  %v1600_v24 = vadd.f32 1.0, %v1599_v0 }
 0x2dc   : > { %v1711_v48 = vmul.f32 0.125, %v1695_v5  ;;  %v1586_v38 = vsel %vm5497_vm10, %v1583_v13, %v1580_v33  ;;  %v1910_v5 = vpop.permute.xlu1 %1909  ;;  %v5519_v13 = vpop.permute.xlu0 %1923  ;;  %v1543_v59 = vmul.f32 1.442695, %v5495_v45  ;;  %v1952_v33 = vmul.f32 %v5447_v25, %v1712_v42 }
 0x2dd   : > { %v4129_v21 = vpop.eup %4128  ;;  %v1577_v43 = vsel %vm5508_vm12, %v1574_v1, %v1571_v4  ;;  %v1698_v30 = vsel %vm1506_vm11, %v5368_v6, %v1586_v38  ;;  %v1593_v0 = vand.u32 2147483647, %v5426_v23  ;;  %v1605_v4 = vadd.f32 1.0, %v5502_v56 }
 0x2de   : > { %1841 = vrot.lane.b32.xlu0 %v1712_v42, %s4421_s20  ;;  %v5517_v40 = vpop.eup %4130  ;;  %v1951_v31 = vmul.f32 %v5455_v41, %v1711_v48  ;;  %v5531_v1 = vadd.f32 %v3831_v47, %v5353_v15  ;;  %v1697_v25 = vsel %vm1505_vm13, %v5373_v3, %v1577_v43  ;;  %v1598_v42 = vmul.f32 0.6931472, %v4129_v21 }
 0x2df   : > { %1839 = vrot.lane.b32.xlu1 %v1711_v48, %s4421_s20  ;;  %v4133_v8 = vpop.eup %4132  ;;  %v5544_v6 = vadd.f32 %v5353_v15, %v1469_v20  ;;  %v1601_v47 = vmul.f32 %v5422_v50, %v1600_v24  ;;  %4142 = vlog2.f32 %v1605_v4  ;;  %v1714_v38 = vmul.f32 0.125, %v1698_v30 }
 0x2e0   : > { %v5541_v11 = vpop.eup %4134  ;;  %v1589_v48 = vmul.f32 0.6931472, %v4133_v8  ;;  %4144 = vpow2.f32 %v1545_v49  ;;  %v1617_v3 = vmul.f32 -0.5, %v5453_v58  ;;  %v1632_v60 = vadd.f32 1.0, %v5517_v40  ;;  %v5552_v43 = vpop.permute.xlu1 %1925 }
 0x2e1   : > { %v5550_v21 = vpop.eup %4136  ;;  %4146 = vpow2.f32 %v1543_v59  ;;  %v1592_v15 = vmul.f32 %v5426_v23, %v1591_v35  ;;  %vm5555_vm15 = vcmp.lt.f32.partialorder %v1593_v0, 0.0004427343  ;;  %v1912_v50 = vpop.permute.xlu0 %1911  ;;  %v1549_v20 = vmul.f32 1.442695, %v5531_v1 }
 0x2e2   : > { %1985 = vrot.lane.b32.xlu0 %v1952_v33, %s4421_s20  ;;  %v1713_v33 = vmul.f32 0.125, %v1697_v25  ;;  %v1604_v24 = vsel %vm5537_vm14, %v1601_v47, %v1598_v42  ;;  %v1608_v49 = vmul.f32 -0.5, %v5502_v56  ;;  %4148 = vlog2.f32 %v1632_v60 }
 0x2e3   : > { %1983 = vrot.lane.b32.xlu1 %v1951_v31, %s4421_s20  ;;  %v4139_v8 = vpop.eup %4138  ;;  %v1547_v59 = vmul.f32 1.442695, %v5544_v6  ;;  %v1595_v23 = vsel %vm5555_vm15, %v1592_v15, %v1589_v48  ;;  %v1623_v35 = vadd.f32 1.0, %v5541_v11  ;;  %v1954_v30 = vmul.f32 %v1910_v5, %v1714_v38 }
 0x2e4   : > { %v1618_v0 = vadd.f32 1.0, %v1617_v3  ;;  %v1620_v4 = vand.u32 2147483647, %v5453_v58  ;;  %v5572_v25 = vpop.eup %4140  ;;  %v1953_v42 = vmul.f32 %v5489_v9, %v1713_v33  ;;  %v1700_v41 = vsel %vm1508_vm0, %v5380_v2, %v1604_v24  ;;  %v1914_v60 = vpop.permute.xlu1 %1913 }
 0x2e5   : > { %4150 = vlog2.f32 %v1623_v35  ;;  %v1650_v47 = vadd.f32 1.0, %v5550_v21  ;;  %v1699_v48 = vsel %vm1507_vm6, %v5385_v51, %v1595_v23  ;;  %v1616_v5 = vmul.f32 0.6931472, %v4139_v8  ;;  %v5581_v15 = vpop.permute.xlu0 %1927 }
 0x2e6   : > { %1845 = vrot.lane.b32.xlu0 %v1714_v38, %s4421_s20  ;;  %4152 = vpow2.f32 %v1549_v20  ;;  %v1609_v38 = vadd.f32 1.0, %v1608_v49  ;;  %v1611_v3 = vand.u32 2147483647, %v5502_v56  ;;  %v1716_v9 = vmul.f32 0.125, %v1700_v41 }
 0x2e7   : > { %1843 = vrot.lane.b32.xlu1 %v1713_v33, %s4421_s20  ;;  %4154 = vpow2.f32 %v1547_v59  ;;  %v1619_v2 = vmul.f32 %v5453_v58, %v1618_v0  ;;  %v1635_v33 = vmul.f32 -0.5, %v5517_v40  ;;  %v1641_v31 = vadd.f32 1.0, %v5572_v25 }
 0x2e8   : > { %v1715_v24 = vmul.f32 0.125, %v1699_v48  ;;  %vm5586_vm7 = vcmp.lt.f32.partialorder %v1620_v4, 0.0004427343  ;;  %v1626_v49 = vmul.f32 -0.5, %v5541_v11  ;;  %4156 = vlog2.f32 %v1650_v47  ;;  %v5603_v47 = vpop.permute.xlu1 %1929 }
 0x2e9   : > { %v4143_v20 = vpop.eup %4142  ;;  %v1622_v58 = vsel %vm5586_vm7, %v1619_v2, %v1616_v5  ;;  %v1610_v23 = vmul.f32 %v5502_v56, %v1609_v38  ;;  %4158 = vlog2.f32 %v1641_v31  ;;  %vm1612_vm9 = vcmp.lt.f32.partialorder %v1611_v3, 0.0004427343  ;;  %v5607_v2 = vpop.permute.xlu0 %1919 }
 0x2ea   : > { %1989 = vrot.lane.b32.xlu0 %v1954_v30, %s4421_s20  ;;  %v5591_v8 = vpop.eup %4144  ;;  %v1607_v59 = vmul.f32 0.6931472, %v4143_v20  ;;  %v1638_v30 = vand.u32 2147483647, %v5517_v40  ;;  %v1956_v4 = vmul.f32 %v1914_v60, %v1716_v9  ;;  %vm1509_vm10 = vcmp.gt.f32.partialorder %v5410_v28, 20.0 }
 0x2eb   : > { %1987 = vrot.lane.b32.xlu1 %v1953_v42, %s4421_s20  ;;  %v5597_v35 = vpop.eup %4146  ;;  %v1636_v41 = vadd.f32 1.0, %v1635_v33  ;;  %v1955_v48 = vmul.f32 %v1912_v50, %v1715_v24  ;;  %v1702_v56 = vsel %vm1510_vm8, %v5394_v63, %v1622_v58  ;;  %v1627_v5 = vadd.f32 1.0, %v1626_v49 }
 0x2ec   : > { %v4149_v0 = vpop.eup %4148  ;;  %v1613_v42 = vsel %vm1612_vm9, %v1610_v23, %v1607_v59  ;;  %v1668_v38 = vadd.f32 1.0, %v5591_v8  ;;  %v1629_v60 = vand.u32 2147483647, %v5541_v11  ;;  %vm5614_vm11 = vcmp.lt.f32.partialorder %v1638_v30, 0.0004427343 }
 0x2ed   : > { %v1701_v3 = vsel %vm1509_vm10, %v5410_v28, %v1613_v42  ;;  %v1634_v31 = vmul.f32 0.6931472, %v4149_v0  ;;  %v1718_v20 = vmul.f32 0.125, %v1702_v56  ;;  %v1653_v28 = vmul.f32 -0.5, %v5550_v21 }
 0x2ee   : > { %1849 = vrot.lane.b32.xlu0 %v1716_v9, %s4421_s20  ;;  %v1659_v9 = vadd.f32 1.0, %v5597_v35  ;;  %v1717_v58 = vmul.f32 0.125, %v1701_v3  ;;  %v1628_v59 = vmul.f32 %v5541_v11, %v1627_v5  ;;  %v1644_v23 = vmul.f32 -0.5, %v5572_v25 }
 0x2ef   : > { %1847 = vrot.lane.b32.xlu1 %v1715_v24, %s4421_s20  ;;  %v4151_v33 = vpop.eup %4150  ;;  %v1637_v24 = vmul.f32 %v5517_v40, %v1636_v41  ;;  %4160 = vlog2.f32 %v1668_v38  ;;  %vm5629_vm12 = vcmp.lt.f32.partialorder %v1629_v60, 0.0004427343  ;;  %vm1512_vm13 = vcmp.gt.f32.partialorder %v5419_v44, 20.0  ;;  %v1916_v41 = vpop.permute.xlu0 %1915 }
 0x2f0   : > { %v5618_v63 = vpop.eup %4152  ;;  %v1625_v51 = vmul.f32 0.6931472, %v4151_v33  ;;  %4162 = vlog2.f32 %v1659_v9  ;;  %vm1511_vm14 = vcmp.gt.f32.partialorder %v5429_v36, 20.0  ;;  %v1654_v56 = vadd.f32 1.0, %v1653_v28 }
 0x2f1   : > { %v5622_v49 = vpop.eup %4154  ;;  %v1640_v30 = vsel %vm5614_vm11, %v1637_v24, %v1634_v31  ;;  %v1656_v5 = vand.u32 2147483647, %v5550_v21  ;;  %v1957_v38 = vmul.f32 %v1916_v41, %v1717_v58  ;;  %v1645_v31 = vadd.f32 1.0, %v1644_v23 }
 0x2f2   : > { %1993 = vrot.lane.b32.xlu0 %v1956_v4, %s4421_s20  ;;  %v4157_v40 = vpop.eup %4156  ;;  %v1918_v4 = vpop.permute.xlu1 %1917  ;;  %v1631_v11 = vsel %vm5629_vm12, %v1628_v59, %v1625_v51  ;;  %v1704_v3 = vsel %vm1512_vm13, %v5419_v44, %v1640_v30  ;;  %v1686_v60 = vadd.f32 1.0, %v5618_v63  ;;  %v1647_v50 = vand.u32 2147483647, %v5572_v25 }
 0x2f3   : > { %1991 = vrot.lane.b32.xlu1 %v1955_v48, %s4421_s20  ;;  %v4159_v42 = vpop.eup %4158  ;;  %v1958_v48 = vmul.f32 %v1918_v4, %v1718_v20  ;;  %v1703_v9 = vsel %vm1511_vm14, %v5429_v36, %v1631_v11  ;;  %v1652_v33 = vmul.f32 0.6931472, %v4157_v40  ;;  %v1720_v51 = vmul.f32 0.125, %v1704_v3 }
 0x2f4   : > { %v1643_v24 = vmul.f32 0.6931472, %v4159_v42  ;;  %v1655_v28 = vmul.f32 %v5550_v21, %v1654_v56  ;;  %vm5647_vm15 = vcmp.lt.f32.partialorder %v1656_v5, 0.0004427343  ;;  %v1719_v59 = vmul.f32 0.125, %v1703_v9 }
 0x2f5   : > { %v1646_v36 = vmul.f32 %v5572_v25, %v1645_v31  ;;  %v1662_v23 = vmul.f32 -0.5, %v5597_v35  ;;  %4164 = vlog2.f32 %v1686_v60  ;;  %vm5657_vm0 = vcmp.lt.f32.partialorder %v1647_v50, 0.0004427343 }
 0x2f6   : > { %1853 = vrot.lane.b32.xlu0 %v1718_v20, %s4421_s20  ;;  %v1677_v20 = vadd.f32 1.0, %v5622_v49  ;;  %v1658_v30 = vsel %vm5647_vm15, %v1655_v28, %v1652_v33  ;;  %v1960_v4 = vmul.f32 %v5472_v17, %v1720_v51  ;;  %vm1514_vm6 = vcmp.gt.f32.partialorder %v5441_v19, 20.0 }
 0x2f7   : > { %1851 = vrot.lane.b32.xlu1 %v1717_v58, %s4421_s20  ;;  %v1671_v58 = vmul.f32 -0.5, %v5591_v8  ;;  %v1649_v40 = vsel %vm5657_vm0, %v1646_v36, %v1643_v24  ;;  %vm1513_vm7 = vcmp.gt.f32.partialorder %v5465_v10, 20.0  ;;  %v1959_v42 = vmul.f32 %v5607_v2, %v1719_v59 }
 0x2f8   : > { %4166 = vlog2.f32 %v1677_v20  ;;  %v1706_v41 = vsel %vm1514_vm6, %v5441_v19, %v1658_v30  ;;  %v1663_v56 = vadd.f32 1.0, %v1662_v23  ;;  %v1705_v5 = vsel %vm1513_vm7, %v5465_v10, %v1649_v40 }
 0x2f9   : > { %v4161_v21 = vpop.eup %4160  ;;  %v1672_v11 = vadd.f32 1.0, %v1671_v58  ;;  %v1665_v3 = vand.u32 2147483647, %v5597_v35  ;;  %v1722_v31 = vmul.f32 0.125, %v1706_v41  ;;  %v1689_v2 = vmul.f32 -0.5, %v5618_v63 }
 0x2fa   : > { %1997 = vrot.lane.b32.xlu0 %v1958_v48, %s4421_s20  ;;  %v4163_v25 = vpop.eup %4162  ;;  %v1674_v48 = vand.u32 2147483647, %v5591_v8  ;;  %v1721_v9 = vmul.f32 0.125, %v1705_v5  ;;  %v1664_v33 = vmul.f32 %v5597_v35, %v1663_v56  ;;  %v1680_v10 = vmul.f32 -0.5, %v5622_v49  ;;  %v5725_v56 = vld [vmem:[#allocation2] sm:$0xff]  }
 0x2fb   : > { %1995 = vrot.lane.b32.xlu1 %v1957_v38, %s4421_s20  ;;  %v1670_v38 = vmul.f32 0.6931472, %v4161_v21  ;;  %v1661_v17 = vmul.f32 0.6931472, %v4163_v25  ;;  %v1673_v60 = vmul.f32 %v5591_v8, %v1672_v11  ;;  %vm1666_vm9 = vcmp.lt.f32.partialorder %v1665_v3, 0.0004427343 }
 0x2fc   : > { %vm5676_vm8 = vcmp.lt.f32.partialorder %v1674_v48, 0.0004427343  ;;  %vm1516_vm10 = vcmp.gt.f32.partialorder %v5492_v61, 20.0  ;;  %vm1515_vm11 = vcmp.gt.f32.partialorder %v5495_v45, 20.0  ;;  %v1690_v35 = vadd.f32 1.0, %v1689_v2 }
 0x2fd   : > { %v1676_v50 = vsel %vm5676_vm8, %v1673_v60, %v1670_v38  ;;  %v1667_v8 = vsel %vm1666_vm9, %v1664_v33, %v1661_v17  ;;  %v1961_v28 = vmul.f32 %v5519_v13, %v1721_v9  ;;  %v1692_v58 = vand.u32 2147483647, %v5618_v63  ;;  %v5728_v17 = vld [vmem:[#allocation2 + $0x8] sm:$0xff]  }
 0x2fe   : > { %1857 = vrot.lane.b32.xlu0 %v1720_v51, %s4421_s20  ;;  %v1962_v51 = vmul.f32 %v5552_v43, %v1722_v31  ;;  %v1708_v44 = vsel %vm1516_vm10, %v5492_v61, %v1676_v50  ;;  %v1707_v36 = vsel %vm1515_vm11, %v5495_v45, %v1667_v8  ;;  %v1683_v30 = vand.u32 2147483647, %v5622_v49 }
 0x2ff   : > { %1855 = vrot.lane.b32.xlu1 %v1719_v59, %s4421_s20  ;;  %v4165_v20 = vpop.eup %4164  ;;  %v1681_v59 = vadd.f32 1.0, %v1680_v10  ;;  %v1724_v0 = vmul.f32 0.125, %v1708_v44  ;;  %v1691_v21 = vmul.f32 %v5618_v63, %v1690_v35  ;;  %v1723_v40 = vmul.f32 0.125, %v1707_v36  ;;  %v2047_v63 = vld [vmem:[%s6538_s8] sm:$0xff] }
 0x300   : > { %v1688_v23 = vmul.f32 0.6931472, %v4165_v20  ;;  %vm5697_vm12 = vcmp.lt.f32.partialorder %v1692_v58, 0.0004427343  ;;  %vm1518_vm13 = vcmp.gt.f32.partialorder %v5531_v1, 20.0  ;;  %vm1517_vm15 = vcmp.gt.f32.partialorder %v5544_v6, 20.0 }
 0x301   : > { %v1682_v61 = vmul.f32 %v5622_v49, %v1681_v59  ;;  %vm5706_vm14 = vcmp.lt.f32.partialorder %v1683_v30, 0.0004427343  ;;  %v2049_v49 = vld [vmem:[%s6538_s8 + $0x10] sm:$0xff]  ;;  %v2051_v41 = vmul.f32 1.442695, %v2047_v63  ;;  %v1964_v5 = vmul.f32 %v5603_v47, %v1724_v0 }
 0x302   : > { %2001 = vrot.lane.b32.xlu0 %v1960_v4, %s4421_s20  ;;  %v4167_v24 = vpop.eup %4166  ;;  %v1694_v45 = vsel %vm5697_vm12, %v1691_v21, %v1688_v23  ;;  %v2048_v4 = vld [vmem:[%s6538_s8 + $0x8] sm:$0xff]  ;;  %v2055_v38 = vmul.f32 1.442695, %v2049_v49  ;;  %v1963_v60 = vmul.f32 %v5581_v15, %v1723_v40  ;;  %v1934_v15 = vpop.permute.xlu1 %1933 }
 0x303   : > { %1999 = vrot.lane.b32.xlu1 %v1959_v42, %s4421_s20  ;;  %v1679_v43 = vmul.f32 0.6931472, %v4167_v24  ;;  %v2050_v42 = vld [vmem:[%s6538_s8 + $0x18] sm:$0xff]  ;;  %v2053_v48 = vmul.f32 1.442695, %v2048_v4  ;;  %v1710_v2 = vsel %vm1518_vm13, %v5531_v1, %v1694_v45  ;;  %4168 = vpow2.f32 %v2051_v41  ;;  %v1932_v1 = vpop.permute.xlu0 %1931 }
 0x304   : > { %v2057_v3 = vmul.f32 1.442695, %v2050_v42  ;;  %v1726_v19 = vmul.f32 0.125, %v1710_v2 }
 0x305   : > { %v1685_v11 = vsel %vm5706_vm14, %v1682_v61, %v1679_v43  ;;  %4170 = vpow2.f32 %v2053_v48 }
 0x306   : > { %1861 = vrot.lane.b32.xlu0 %v1722_v31, %s4421_s20  ;;  %v5730_v31 = vld [vmem:[#allocation2 + $0x10] sm:$0xff]   ;;  %v1709_v47 = vsel %vm1517_vm15, %v5544_v6, %v1685_v11  ;;  %4172 = vpow2.f32 %v2055_v38  ;;  %v1966_v10 = vmul.f32 %v1934_v15, %v1726_v19 }
 0x307   : > { %1859 = vrot.lane.b32.xlu1 %v1721_v9, %s4421_s20  ;;  %v5737_v9 = vld [vmem:[#allocation2 + $0x18] sm:$0xff]   ;;  %4174 = vpow2.f32 %v2057_v3  ;;  %v1725_v33 = vmul.f32 0.125, %v1709_v47 }
 0x309   : > { %v1965_v50 = vmul.f32 %v1932_v1, %v1725_v33 }
 0x30a   : > { %2005 = vrot.lane.b32.xlu0 %v1962_v51, %s4421_s20 }
 0x30b   : > { %2003 = vrot.lane.b32.xlu1 %v1961_v28, %s4421_s20 }
 0x30d   : > { %v4169_v20 = vpop.eup %4168 }
 0x30e   : > { %1865 = vrot.lane.b32.xlu0 %v1724_v0, %s4421_s20  ;;  %v5746_v8 = vsub.f32 0.0, %v4169_v20 }
 0x30f   : > { %1863 = vrot.lane.b32.xlu1 %v1723_v40, %s4421_s20  ;;  %v4171_v6 = vpop.eup %4170 }
 0x310   : > { %v4173_v24 = vpop.eup %4172  ;;  %v5748_v51 = vsub.f32 0.0, %v4171_v6 }
 0x311   : > { %v4175_v35 = vpop.eup %4174  ;;  %v5750_v28 = vsub.f32 0.0, %v4173_v24 }
 0x312   : > { %2009 = vrot.lane.b32.xlu0 %v1964_v5, %s4421_s20  ;;  %v5752_v44 = vsub.f32 0.0, %v4175_v35 }
 0x313   : > { %2007 = vrot.lane.b32.xlu1 %v1963_v60, %s4421_s20 }
 0x316   : > { %1869 = vrot.lane.b32.xlu0 %v1726_v19, %s4421_s20 }
 0x317   : > { %1867 = vrot.lane.b32.xlu1 %v1725_v33, %s4421_s20 }
 0x31a   : > { %2013 = vrot.lane.b32.xlu0 %v1966_v10, %s4421_s20 }
 0x31b   : > { %2011 = vrot.lane.b32.xlu1 %v1965_v50, %s4421_s20 }
 0x32b   : > { %v1762_v58 = vpop.permute.xlu1 %1761 }
 0x32c   : > { %1808 = vst.msk [vmem:[#allocation5 + $0x8] sm:$0xff] %vm495_vm1, %v1762_v58 }
 0x32f   : > { %v1760_v59 = vpop.permute.xlu1 %1759 }
 0x330   : > { %1807 = vst.msk [vmem:[#allocation5] sm:$0xff] %vm495_vm1, %v1760_v59  ;;  %v1766_v36 = vpop.permute.xlu0 %1765 }
 0x331   : > { %1810 = vst.msk [vmem:[#allocation5 + $0x18] sm:$0xff] %vm495_vm1, %v1766_v36 }
 0x333   : > { %v1764_v23 = vpop.permute.xlu1 %1763 }
 0x334   : > { %1809 = vst.msk [vmem:[#allocation5 + $0x10] sm:$0xff] %vm495_vm1, %v1764_v23  ;;  %v1770_v30 = vpop.permute.xlu0 %1769 }
 0x335   : > { %1812 = vst.msk [vmem:[#allocation5 + $0x28] sm:$0xff] %vm495_vm1, %v1770_v30 }
 0x337   : > { %v1768_v43 = vpop.permute.xlu1 %1767 }
 0x338   : > { %1811 = vst.msk [vmem:[#allocation5 + $0x20] sm:$0xff] %vm495_vm1, %v1768_v43 }
 0x33a   : > { %v1774_v0 = vpop.permute.xlu0 %1773 }
 0x33b   : > { %1814 = vst.msk [vmem:[#allocation5 + $0x38] sm:$0xff] %vm495_vm1, %v1774_v0  ;;  %v1772_v21 = vpop.permute.xlu1 %1771 }
 0x33c   : > { %1813 = vst.msk [vmem:[#allocation5 + $0x30] sm:$0xff] %vm495_vm1, %v1772_v21 }
 0x33e   : > { %v1778_v40 = vpop.permute.xlu0 %1777 }
 0x33f   : > { %1816 = vst.msk [vmem:[#allocation5 + $0x48] sm:$0xff] %vm495_vm1, %v1778_v40  ;;  %v1776_v13 = vpop.permute.xlu1 %1775 }
 0x340   : > { %1815 = vst.msk [vmem:[#allocation5 + $0x40] sm:$0xff] %vm495_vm1, %v1776_v13 }
 0x343   : > { %v1782_v61 = vpop.permute.xlu0 %1781 }
 0x344   : > { %1818 = vst.msk [vmem:[#allocation5 + $0x58] sm:$0xff] %vm495_vm1, %v1782_v61  ;;  %v1780_v45 = vpop.permute.xlu1 %1779 }
 0x345   : > { %1817 = vst.msk [vmem:[#allocation5 + $0x50] sm:$0xff] %vm495_vm1, %v1780_v45 }
 0x347   : > { %v1786_v25 = vpop.permute.xlu0 %1785 }
 0x348   : > { %1820 = vst.msk [vmem:[#allocation5 + $0x68] sm:$0xff] %vm495_vm1, %v1786_v25  ;;  %v1784_v63 = vpop.permute.xlu1 %1783 }
 0x349   : > { %1819 = vst.msk [vmem:[#allocation5 + $0x60] sm:$0xff] %vm495_vm1, %v1784_v63 }
 0x34c   : > { %v1790_v4 = vpop.permute.xlu0 %1789 }
 0x34d   : > { %1822 = vst.msk [vmem:[#allocation5 + $0x78] sm:$0xff] %vm495_vm1, %v1790_v4  ;;  %v1788_v49 = vpop.permute.xlu1 %1787 }
 0x34e   : > { %1821 = vst.msk [vmem:[#allocation5 + $0x70] sm:$0xff] %vm495_vm1, %v1788_v49 }
 0x350   : > { %v1842_v11 = vpop.permute.xlu0 %1841 }
 0x351   : > { %1888 = vst.msk [vmem:[#allocation6 + $0x8] sm:$0xff] %vm1163_vm5, %v1842_v11  ;;  %v1840_v42 = vpop.permute.xlu1 %1839 }
 0x352   : > { %1887 = vst.msk [vmem:[#allocation6] sm:$0xff] %vm1163_vm5, %v1840_v42 }
 0x354   : > { %v1986_v41 = vpop.permute.xlu0 %1985 }
 0x355   : > { %2032 = vst.msk [vmem:[#allocation7 + $0x8] sm:$0xff] %vm1163_vm5, %v1986_v41  ;;  %v1984_v48 = vpop.permute.xlu1 %1983 }
 0x356   : > { %2031 = vst.msk [vmem:[#allocation7] sm:$0xff] %vm1163_vm5, %v1984_v48 }
 0x358   : > { %v1846_v5 = vpop.permute.xlu0 %1845 }
 0x359   : > { %1890 = vst.msk [vmem:[#allocation6 + $0x18] sm:$0xff] %vm1163_vm5, %v1846_v5  ;;  %v1844_v38 = vpop.permute.xlu1 %1843 }
 0x35a   : > { %1889 = vst.msk [vmem:[#allocation6 + $0x10] sm:$0xff] %vm1163_vm5, %v1844_v38 }
 0x35c   : > { %v1990_v3 = vpop.permute.xlu0 %1989 }
 0x35d   : > { %2034 = vst.msk [vmem:[#allocation7 + $0x18] sm:$0xff] %vm1163_vm5, %v1990_v3  ;;  %v1988_v60 = vpop.permute.xlu1 %1987 }
 0x35e   : > { %2033 = vst.msk [vmem:[#allocation7 + $0x10] sm:$0xff] %vm1163_vm5, %v1988_v60 }
 0x360   : > { %v1850_v2 = vpop.permute.xlu0 %1849 }
 0x361   : > { %1892 = vst.msk [vmem:[#allocation6 + $0x28] sm:$0xff] %vm1163_vm5, %v1850_v2  ;;  %v1848_v47 = vpop.permute.xlu1 %1847 }
 0x362   : > { %1891 = vst.msk [vmem:[#allocation6 + $0x20] sm:$0xff] %vm1163_vm5, %v1848_v47 }
 0x364   : > { %v1994_v19 = vpop.permute.xlu0 %1993 }
 0x365   : > { %2036 = vst.msk [vmem:[#allocation7 + $0x28] sm:$0xff] %vm1163_vm5, %v1994_v19  ;;  %v1992_v33 = vpop.permute.xlu1 %1991 }
 0x366   : > { %2035 = vst.msk [vmem:[#allocation7 + $0x20] sm:$0xff] %vm1163_vm5, %v1992_v33 }
 0x368   : > { %v1854_v15 = vpop.permute.xlu0 %1853 }
 0x369   : > { %1894 = vst.msk [vmem:[#allocation6 + $0x38] sm:$0xff] %vm1163_vm5, %v1854_v15  ;;  %v1852_v1 = vpop.permute.xlu1 %1851 }
 0x36a   : > { %1893 = vst.msk [vmem:[#allocation6 + $0x30] sm:$0xff] %vm1163_vm5, %v1852_v1 }
 0x36c   : > { %v1998_v10 = vpop.permute.xlu0 %1997 }
 0x36d   : > { %2038 = vst.msk [vmem:[#allocation7 + $0x38] sm:$0xff] %vm1163_vm5, %v1998_v10  ;;  %v1996_v50 = vpop.permute.xlu1 %1995 }
 0x36e   : > { %2037 = vst.msk [vmem:[#allocation7 + $0x30] sm:$0xff] %vm1163_vm5, %v1996_v50 }
 0x370   : > { %v1858_v20 = vpop.permute.xlu0 %1857 }
 0x371   : > { %1896 = vst.msk [vmem:[#allocation6 + $0x48] sm:$0xff] %vm1163_vm5, %v1858_v20  ;;  %v1856_v6 = vpop.permute.xlu1 %1855 }
 0x372   : > { %1895 = vst.msk [vmem:[#allocation6 + $0x40] sm:$0xff] %vm1163_vm5, %v1856_v6 }
 0x374   : > { %v2002_v24 = vpop.permute.xlu0 %2001 }
 0x375   : > { %2040 = vst.msk [vmem:[#allocation7 + $0x48] sm:$0xff] %vm1163_vm5, %v2002_v24  ;;  %v2000_v35 = vpop.permute.xlu1 %1999 }
 0x376   : > { %2039 = vst.msk [vmem:[#allocation7 + $0x40] sm:$0xff] %vm1163_vm5, %v2000_v35 }
 0x378   : > { %v1862_v58 = vpop.permute.xlu0 %1861 }
 0x379   : > { %1898 = vst.msk [vmem:[#allocation6 + $0x58] sm:$0xff] %vm1163_vm5, %v1862_v58  ;;  %v1860_v59 = vpop.permute.xlu1 %1859 }
 0x37a   : > { %1897 = vst.msk [vmem:[#allocation6 + $0x50] sm:$0xff] %vm1163_vm5, %v1860_v59 }
 0x37c   : > { %v2006_v36 = vpop.permute.xlu0 %2005 }
 0x37d   : > { %2042 = vst.msk [vmem:[#allocation7 + $0x58] sm:$0xff] %vm1163_vm5, %v2006_v36  ;;  %v2004_v23 = vpop.permute.xlu1 %2003 }
 0x37e   : > { %2041 = vst.msk [vmem:[#allocation7 + $0x50] sm:$0xff] %vm1163_vm5, %v2004_v23 }
 0x380   : > { %v1866_v30 = vpop.permute.xlu0 %1865 }
 0x381   : > { %1900 = vst.msk [vmem:[#allocation6 + $0x68] sm:$0xff] %vm1163_vm5, %v1866_v30  ;;  %v1864_v43 = vpop.permute.xlu1 %1863 }
 0x382   : > { %1899 = vst.msk [vmem:[#allocation6 + $0x60] sm:$0xff] %vm1163_vm5, %v1864_v43 }
 0x384   : > { %v2010_v0 = vpop.permute.xlu0 %2009 }
 0x385   : > { %2044 = vst.msk [vmem:[#allocation7 + $0x68] sm:$0xff] %vm1163_vm5, %v2010_v0  ;;  %v2008_v21 = vpop.permute.xlu1 %2007 }
 0x386   : > { %2043 = vst.msk [vmem:[#allocation7 + $0x60] sm:$0xff] %vm1163_vm5, %v2008_v21 }
 0x388   : > { %v1870_v40 = vpop.permute.xlu0 %1869 }
 0x389   : > { %1902 = vst.msk [vmem:[#allocation6 + $0x78] sm:$0xff] %vm1163_vm5, %v1870_v40  ;;  %v1868_v13 = vpop.permute.xlu1 %1867 }
 0x38a   : > { %1901 = vst.msk [vmem:[#allocation6 + $0x70] sm:$0xff] %vm1163_vm5, %v1868_v13 }
 0x38c   : > { %v2014_v61 = vpop.permute.xlu0 %2013 }
 0x38d   : > { %2046 = vst.msk [vmem:[#allocation7 + $0x78] sm:$0xff] %vm1163_vm5, %v2014_v61  ;;  %v2012_v45 = vpop.permute.xlu1 %2011 }
 0x38e   : > { %2045 = vst.msk [vmem:[#allocation7 + $0x70] sm:$0xff] %vm1163_vm5, %v2012_v45 }
 0x38f LB: >> { %v4423_v25 = vmov 0   ;;  %s5833_s30 = sshll.u32 %s4418_s29, 3  ;;  %v4424_v49 = vmov 3   ;;  %v4425_v3 = vmov 1   ;;  %v4426_v2 = vmov 2   ;;  %s2072_s29 = sadd.s32 1, %s4418_s29   ;;  %s4418_s29 = sphi %s5814_s29, %s2072_s29   ;;  %v4414_v56 = vphi %v5725_v56, %v6729_v56   ;;  %v4410_v17 = vphi %v5728_v17, %v6728_v17   ;;  %v4406_v31 = vphi %v5730_v31, %v6727_v31   ;;  %v4402_v9 = vphi %v5737_v9, %v6726_v9  }
 0x390   : >> { %4176 = vset.pattern.permute.xlu1 %v4423_v25  ;;  %s2082_s13 = scalar_lea.vmem [#allocation4], %s5833_s30  ;;  %s2116_s14 = scalar_lea.vmem [#allocation5], %s5833_s30  ;;  %v6587_v19 = vmov 4   ;;  %v6593_v33 = vmov 7   ;;  %v6591_v15 = vmov 6   ;;  %v6589_v1 = vmov 5  }
 0x391   : >> { %v2083_v63 = vld [vmem:[%s2082_s13] sm:$0xff]  ;;  %v2150_v10 = vlaneseq  ;;  %s2078_s15 = scalar_lea.vmem [#allocation6], %s5833_s30  ;;  %s2080_s16 = scalar_lea.vmem [#allocation7], %s5833_s30 }
 0x392   : >> { %2084 = vxpose.xlu0.b32.start.end [1/1] (short) (narrow) %v2083_v63, 32  ;;  %v2117_v4 = vld [vmem:[%s2116_s14] sm:$0xff]  ;;  %s2977_s17 = scalar_lea.vmem [#allocation8], %s5833_s30  ;;  %p2069_p8 = scmp.ge.s32.totalorder %s2072_s29, 16  }
 0x393   : >> { %v5904_v50 = vshrl.u32 %v2150_v10, 7  ;;  %v5909_v6 = vld [vmem:[%s2078_s15] sm:$0xff] }
 0x395   : >> { %v2152_v20 = vsub.s32 0, %v5904_v50  ;;  %v2261_v35 = vsub.s32 1, %v5904_v50  ;;  %v5927_v30 = vld [vmem:[%s2080_s16] sm:$0xff]  ;;  %v2362_v45 = vsub.s32 2, %v5904_v50  ;;  %v6604_v52 = vsub.s32 5, %v5904_v50 }
 0x397   : >> { %v5913_v24 = vrot.slane %v5909_v6, %v2152_v20  ;;  %v5921_v59 = vrot.slane %v5909_v6, %v2261_v35  ;;  %v5931_v0 = vrot.slane %v5927_v30, %v2152_v20 }
 0x399   : >> { %v2154_v58 = vmul.f32 %v5913_v24, %v5746_v8  ;;  %v2263_v23 = vmul.f32 %v5921_v59, %v5746_v8 }
 0x39b   : >> { %v2206_v36 = vmul.f32 1.442695, %v2154_v58  ;;  %v2311_v43 = vmul.f32 1.442695, %v2263_v23 }
 0x39d   : >> { %4212 = vpow2.f32 %v2206_v36  ;;  %v2463_v36 = vsub.s32 3, %v5904_v50 }
 0x39e   : >> { %4214 = vpow2.f32 %v2311_v43 }
 0x39f   : >> { %2118 = vxpose.xlu0.b32.start.end [1/1] (short) (narrow) %v2117_v4, 32  ;;  %v5950_v43 = vrot.slane %v5909_v6, %v2463_v36 }
 0x3a7   : >> { %v4213_v13 = vpop.eup %4212 }
 0x3a8   : >> { %v2214_v63 = vmul.f32 %v4414_v56, %v4213_v13  ;;  %v5956_v13 = vrot.slane %v5927_v30, %v2261_v35 }
 0x3c8   : >> { %4179 = vset.pattern.permute.xlu0 %v4424_v49 }
 0x412   : >> { %v5838_v11 = vpop.trf.xlu0 }
 0x413   : >> { %2474 = vperm.xlu0 %4179, %v5838_v11   ;;  %2164 = vperm.xlu1 %4176, %v5838_v11  }
 0x416   : >> { %v5842_v42 = vpop.trf.xlu0 }
 0x417   : >> { %4181 = vset.pattern.permute.xlu0 %v4423_v25 }
 0x41a   : >> { %v5845_v41 = vpop.trf.xlu0 }
 0x41e   : >> { %v5847_v48 = vpop.trf.xlu0 }
 0x422   : >> { %v5849_v5 = vpop.trf.xlu0 }
 0x423   : >> { %2224 = vperm.xlu1 %4176, %v5849_v5  }
 0x426   : >> { %v5852_v38 = vpop.trf.xlu0 }
 0x427   : >> { %4177 = vset.pattern.permute.xlu1 %v4425_v3  ;;  %2229 = vperm.xlu0 %4181, %v5852_v38  }
 0x428   : >> { %2272 = vperm.xlu1 %4177, %v5838_v11  }
 0x42a   : >> { %v5856_v60 = vpop.trf.xlu0 }
 0x42b   : >> { %4188 = vset.pattern.permute.xlu0 %v4426_v2 }
 0x42c   : >> { %2328 = vperm.xlu1 %4177, %v5849_v5   ;;  %2437 = vperm.xlu0 %4188, %v5856_v60  }
 0x42e   : >> { %v5868_v47 = vpop.trf.xlu0 }
 0x430   : >> { %4178 = vset.pattern.permute.xlu1 %v4426_v2  ;;  %2385 = vperm.xlu0 %4188, %v5847_v48  }
 0x431   : >> { %2373 = vperm.xlu1 %4178, %v5838_v11  }
 0x434   : >> { %4193 = vset.pattern.permute.xlu0 %v4424_v49 }
 0x435   : >> { %2429 = vperm.xlu1 %4178, %v5849_v5   ;;  %2486 = vperm.xlu0 %4193, %v5847_v48  }
 0x439   : >> { %4180 = vset.pattern.permute.xlu1 %v4423_v25  ;;  %2534 = vperm.xlu0 %4193, %v5852_v38  }
 0x43a   : >> { %2169 = vperm.xlu1 %4180, %v5842_v42  }
 0x43d   : >> { %2542 = vperm.xlu0 %4193, %v5868_v47  }
 0x43e   : >> { %4182 = vset.pattern.permute.xlu1 %v4425_v3 }
 0x43f   : >> { %2276 = vperm.xlu1 %4182, %v5842_v42  }
 0x441   : >> { %4195 = vset.pattern.permute.xlu0 %v6587_v19 }
 0x442   : >> { %2579 = vperm.xlu0 %4195, %v5842_v42  }
 0x443   : >> { %2332 = vperm.xlu1 %4182, %v5852_v38  }
 0x446   : >> { %2631 = vperm.xlu0 %4195, %v5849_v5  }
 0x447   : >> { %4183 = vset.pattern.permute.xlu1 %v4426_v2 }
 0x448   : >> { %2377 = vperm.xlu1 %4183, %v5842_v42  }
 0x44a   : >> { %4198 = vset.pattern.permute.xlu0 %v6593_v33 }
 0x44b   : >> { %2878 = vperm.xlu0 %4198, %v5838_v11  }
 0x44c   : >> { %2433 = vperm.xlu1 %4183, %v5852_v38  }
 0x44f   : >> { %2890 = vperm.xlu0 %4198, %v5847_v48  }
 0x450   : >> { %4184 = vset.pattern.permute.xlu1 %v4424_v49 }
 0x451   : >> { %2478 = vperm.xlu1 %4184, %v5842_v42  }
 0x453   : >> { %4200 = vset.pattern.permute.xlu0 %v6591_v15 }
 0x454   : >> { %2781 = vperm.xlu0 %4200, %v5842_v42  }
 0x455   : >> { %4185 = vset.pattern.permute.xlu1 %v4423_v25 }
 0x456   : >> { %2174 = vperm.xlu1 %4185, %v5845_v41  }
 0x458   : >> { %2837 = vperm.xlu0 %4200, %v5852_v38  }
 0x45a   : >> { %2234 = vperm.xlu1 %4185, %v5856_v60  }
 0x45c   : >> { %4204 = vset.pattern.permute.xlu0 %v6589_v1 }
 0x45d   : >> { %2676 = vperm.xlu0 %4204, %v5838_v11  }
 0x45e   : >> { %4186 = vset.pattern.permute.xlu1 %v4425_v3 }
 0x45f   : >> { %2280 = vperm.xlu1 %4186, %v5845_v41  }
 0x461   : >> { %2688 = vperm.xlu0 %4204, %v5847_v48  }
 0x463   : >> { %2336 = vperm.xlu1 %4186, %v5856_v60  }
 0x465   : >> { %2736 = vperm.xlu0 %4204, %v5852_v38  }
 0x467   : >> { %4187 = vset.pattern.permute.xlu1 %v4426_v2 }
 0x468   : >> { %2381 = vperm.xlu1 %4187, %v5845_v41  }
 0x469   : >> { %2744 = vperm.xlu0 %4204, %v5868_v47  }
 0x46c   : >> { %4189 = vset.pattern.permute.xlu1 %v4423_v25 }
 0x46d   : >> { %2179 = vperm.xlu1 %4189, %v5847_v48   ;;  %4209 = vset.pattern.permute.xlu0 %v6593_v33 }
 0x46e   : >> { %2938 = vperm.xlu0 %4209, %v5852_v38  }
 0x471   : >> { %2239 = vperm.xlu1 %4189, %v5868_v47  }
 0x472   : >> { %2946 = vperm.xlu0 %4209, %v5868_v47  }
 0x475   : >> { %4190 = vset.pattern.permute.xlu1 %v4425_v3  ;;  %v4215_v3 = vpop.eup %4214 }
 0x476   : >> { %2284 = vperm.xlu1 %4190, %v5847_v48  }
 0x47a   : >> { %2340 = vperm.xlu1 %4190, %v5868_v47  }
 0x47e   : >> { %4191 = vset.pattern.permute.xlu1 %v4426_v2 }
 0x47f   : >> { %2441 = vperm.xlu1 %4191, %v5868_v47  }
 0x483   : >> { %4192 = vset.pattern.permute.xlu1 %v4424_v49  ;;  %v5941_v49 = vrot.slane %v5909_v6, %v2362_v45 }
 0x484   : >> { %2482 = vperm.xlu1 %4192, %v5845_v41  }
 0x485   : >> { %v2364_v58 = vmul.f32 %v5941_v49, %v5746_v8  ;;  %v2365_v37 = vmul.f32 %v5941_v49, %v5748_v51 }
 0x487   : >> { %v2412_v23 = vmul.f32 1.442695, %v2364_v58 }
 0x488   : >> { %2530 = vperm.xlu1 %4192, %v5849_v5  }
 0x489   : >> { %4216 = vpow2.f32 %v2412_v23 }
 0x48c   : >> { %2538 = vperm.xlu1 %4192, %v5856_v60  }
 0x490   : >> { %4194 = vset.pattern.permute.xlu1 %v6587_v19  ;;  %v5980_v19 = vrot.slane %v5927_v30, %v2362_v45 }
 0x491   : >> { %2575 = vperm.xlu1 %4194, %v5838_v11  }
 0x492   : >> { %v2165_v21 = vpop.permute.xlu1 %2164 }
 0x493   : >> { %v2182_v40 = vmul.f32 %v2165_v21, %v5931_v0 }
 0x495   : >> { %v2186_v61 = vand.u32 2147483647, %v2182_v40  ;;  %2583 = vperm.xlu1 %4194, %v5845_v41   ;;  %vm2194_vm0 = vcmp.lt.f32.partialorder %v2182_v40, 0.0  ;;  %v6586_v40 = vsub.s32 4, %v5904_v50 }
 0x497   : >> { %v2190_v25 = vmax.f32 %v2186_v61, 1e-12 }
 0x499   : >> { %v2198_v4 = vsub.f32 0.0, %v2190_v25  ;;  %2587 = vperm.xlu1 %4194, %v5847_v48  }
 0x49b   : >> { %v2202_v2 = vsel %vm2194_vm0, %v2198_v4, %v2190_v25  ;;  %v5962_v25 = vrot.slane %v5909_v6, %v6586_v40 }
 0x49c   : >> { %v2218_v10 = vadd.f32 %v2214_v63, %v2202_v2  ;;  %v2465_v63 = vmul.f32 %v5950_v43, %v5746_v8  ;;  %v5970_v2 = vrot.slane %v5927_v30, %v2463_v36 }
 0x49d   : >> { %2635 = vperm.xlu1 %4194, %v5852_v38   ;;  %v2475_v38 = vpop.permute.xlu0 %2474  ;;  %v2566_v23 = vmul.f32 %v5962_v25, %v5746_v8 }
 0x49e   : >> { %v2319_v20 = vmul.f32 %v4215_v3, %v2218_v10 }
 0x49f   : >> { %v2614_v33 = vmul.f32 1.442695, %v2566_v23 }
 0x4a1   : >> { %4196 = vset.pattern.permute.xlu1 %v6589_v1 }
 0x4a2   : >> { %v2225_v56 = vpop.permute.xlu1 %2224  ;;  %2680 = vperm.xlu1 %4196, %v5842_v42  }
 0x4a3   : >> { %v5952_v21 = vmul.f32 %v2225_v56, %v2218_v10  ;;  %v2155_v10 = vmul.f32 %v5913_v24, %v5748_v51  ;;  %v2513_v56 = vmul.f32 1.442695, %v2465_v63 }
 0x4a5   : >> { %4218 = vpow2.f32 %v2513_v56 }
 0x4a6   : >> { %2684 = vperm.xlu1 %4196, %v5845_v41   ;;  %v5967_v3 = vpop.permute.xlu0 %2229 }
 0x4a7   : >> { %v2273_v61 = vpop.permute.xlu1 %2272 }
 0x4a8   : >> { %v2287_v4 = vmul.f32 %v2273_v61, %v5956_v13  ;;  %v2489_v61 = vmul.f32 %v2475_v38, %v5970_v2 }
 0x4aa   : >> { %v2291_v35 = vand.u32 2147483647, %v2287_v4  ;;  %4197 = vset.pattern.permute.xlu1 %v6591_v15  ;;  %v2208_v15 = vmul.f32 1.442695, %v2155_v10  ;;  %vm2299_vm6 = vcmp.lt.f32.partialorder %v2287_v4, 0.0  ;;  %vm2501_vm8 = vcmp.lt.f32.partialorder %v2489_v61, 0.0 }
 0x4ab   : >> { %v2329_v58 = vpop.permute.xlu1 %2328  ;;  %2777 = vperm.xlu1 %4197, %v5838_v11   ;;  %v5982_v1 = vpop.permute.xlu0 %2437  ;;  %v2493_v39 = vand.u32 2147483647, %v2489_v61 }
 0x4ac   : >> { %v2295_v40 = vmax.f32 %v2291_v35, 1e-12  ;;  %v4217_v11 = vpop.eup %4216  ;;  %v2264_v35 = vmul.f32 %v5921_v59, %v5748_v51  ;;  %4220 = vpow2.f32 %v2208_v15 }
 0x4ad   : >> { %4222 = vpow2.f32 %v2614_v33  ;;  %v2497_v23 = vmax.f32 %v2493_v39, 1e-12 }
 0x4ae   : >> { %v2303_v36 = vsub.f32 0.0, %v2295_v40 }
 0x4af   : >> { %2785 = vperm.xlu1 %4197, %v5845_v41   ;;  %v5991_v10 = vpop.permute.xlu0 %2385 }
 0x4b0   : >> { %v2307_v63 = vsel %vm2299_vm6, %v2303_v36, %v2295_v40  ;;  %v2374_v12 = vpop.permute.xlu1 %2373  ;;  %v2313_v40 = vmul.f32 1.442695, %v2264_v35 }
 0x4b1   : >> { %v2323_v38 = vadd.f32 %v2319_v20, %v2307_v63  ;;  %v2388_v45 = vmul.f32 %v2374_v12, %v5980_v19  ;;  %v6717_v63 = vmov 7   ;;  %v4219_v12 = vpop.eup %4218 }
 0x4b2   : >> { %4224 = vpow2.f32 %v2313_v40 }
 0x4b3   : >> { %v5988_v26 = vmul.f32 %v2329_v58, %v2323_v38  ;;  %v2392_v27 = vand.u32 2147483647, %v2388_v45  ;;  %2789 = vperm.xlu1 %4197, %v5847_v48   ;;  %v2420_v4 = vmul.f32 %v4217_v11, %v2323_v38  ;;  %vm2400_vm7 = vcmp.lt.f32.partialorder %v2388_v45, 0.0 }
 0x4b4   : >> { %v2430_v56 = vpop.permute.xlu1 %2429  ;;  %v2505_v48 = vsub.f32 0.0, %v2497_v23  ;;  %v2414_v58 = vmul.f32 1.442695, %v2365_v37  ;;  %v5997_v38 = vpop.permute.xlu0 %2486  ;;  %v2466_v37 = vmul.f32 %v5950_v43, %v5748_v51 }
 0x4b5   : >> { %v2396_v36 = vmax.f32 %v2392_v27, 1e-12 }
 0x4b6   : >> { %v4221_v39 = vpop.eup %4220  ;;  %4226 = vpow2.f32 %v2414_v58  ;;  %v2509_v40 = vsel %vm2501_vm8, %v2505_v48, %v2497_v23  ;;  %v2515_v58 = vmul.f32 1.442695, %v2466_v37  ;;  %v2246_v37 = vsel %vm1163_vm5, %v5952_v21, 0.0 }
 0x4b7   : >> { %v2404_v20 = vsub.f32 0.0, %v2396_v36  ;;  %4199 = vset.pattern.permute.xlu1 %v6717_v63  ;;  %v6720_v21 = vmov 6  }
 0x4b8   : >> { %2882 = vperm.xlu1 %4199, %v5842_v42   ;;  %v4223_v42 = vpop.eup %4222  ;;  %4228 = vpow2.f32 %v2515_v58  ;;  %v6035_v58 = vrot.slane %v5909_v6, %v6604_v52 }
 0x4b9   : >> { %v2408_v15 = vsel %vm2400_vm7, %v2404_v20, %v2396_v36  ;;  %v2170_v33 = vpop.permute.xlu1 %2169  ;;  %v2215_v20 = vmul.f32 %v4410_v17, %v4221_v39 }
 0x4ba   : >> { %v2424_v11 = vadd.f32 %v2420_v4, %v2408_v15  ;;  %v2183_v27 = vmul.f32 %v2170_v33, %v5931_v0  ;;  %v6009_v15 = vpop.permute.xlu0 %2534  ;;  %v6718_v33 = vmov 5  }
 0x4bc   : >> { %v6000_v35 = vmul.f32 %v2430_v56, %v2424_v11  ;;  %v2187_v32 = vand.u32 2147483647, %v2183_v27  ;;  %2886 = vperm.xlu1 %4199, %v5845_v41   ;;  %v2521_v45 = vmul.f32 %v4219_v12, %v2424_v11  ;;  %vm2195_vm9 = vcmp.lt.f32.partialorder %v2183_v27, 0.0  ;;  %v4225_v23 = vpop.eup %4224 }
 0x4be   : >> { %v2191_v18 = vmax.f32 %v2187_v32, 1e-12  ;;  %v2277_v36 = vpop.permute.xlu1 %2276  ;;  %v6005_v4 = vadd.f32 %v2521_v45, %v2509_v40  ;;  %v6719_v40 = vmov 4  }
 0x4bf   : >> { %v2288_v61 = vmul.f32 %v2277_v36, %v5956_v13 }
 0x4c0   : >> { %v2199_v56 = vsub.f32 0.0, %v2191_v18  ;;  %4201 = vset.pattern.permute.xlu1 %v6718_v33  ;;  %v6013_v41 = vmul.f32 %v4223_v42, %v6005_v4  ;;  %v6019_v42 = vpop.permute.xlu0 %2542  ;;  %v4227_v27 = vpop.eup %4226 }
 0x4c1   : >> { %v2292_v32 = vand.u32 2147483647, %v2288_v61  ;;  %2732 = vperm.xlu1 %4201, %v5849_v5   ;;  %vm2300_vm10 = vcmp.lt.f32.partialorder %v2288_v61, 0.0 }
 0x4c2   : >> { %v2203_v12 = vsel %vm2195_vm9, %v2199_v56, %v2191_v18  ;;  %v2333_v48 = vpop.permute.xlu1 %2332  ;;  %v2156_v18 = vmul.f32 %v5913_v24, %v5750_v28 }
 0x4c3   : >> { %v2219_v11 = vadd.f32 %v2215_v20, %v2203_v12  ;;  %v2296_v17 = vmax.f32 %v2292_v32, 1e-12 }
 0x4c5   : >> { %v2304_v39 = vsub.f32 0.0, %v2296_v17  ;;  %v2320_v45 = vmul.f32 %v4225_v23, %v2219_v11  ;;  %4202 = vset.pattern.permute.xlu1 %v6719_v40  ;;  %v2243_v36 = vmul.f32 %v5967_v3, %v2219_v11  ;;  %v2567_v3 = vmul.f32 %v5962_v25, %v5748_v51 }
 0x4c6   : >> { %2639 = vperm.xlu1 %4202, %v5856_v60  }
 0x4c7   : >> { %v2308_v20 = vsel %vm2300_vm10, %v2304_v39, %v2296_v17  ;;  %v2378_v56 = vpop.permute.xlu1 %2377  ;;  %v2247_v32 = vsel %vm1163_vm5, %v2243_v36, 0.0  ;;  %v6721_v39 = vsub.s32 4, %v5904_v50 }
 0x4c8   : >> { %v2324_v23 = vadd.f32 %v2320_v45, %v2308_v20  ;;  %v2389_v61 = vmul.f32 %v2378_v56, %v5980_v19  ;;  %v6030_v12 = vadd.f32 %v2247_v32, %v2246_v37  ;;  %v2210_v37 = vmul.f32 1.442695, %v2156_v18  ;;  %v2580_v32 = vpop.permute.xlu0 %2579 }
 0x4c9   : >> { %v6041_v36 = vrot.slane %v5927_v30, %v6721_v39  ;;  %v2616_v20 = vmul.f32 1.442695, %v2567_v3  ;;  %v2347_v56 = vsel %vm1163_vm5, %v5988_v26, 0.0  ;;  %v2668_v39 = vmul.f32 %v6035_v58, %v5748_v51  ;;  %v4229_v26 = vpop.eup %4228 }
 0x4ca   : >> { %v2344_v11 = vmul.f32 %v2333_v48, %v2324_v23  ;;  %v2393_v7 = vand.u32 2147483647, %v2389_v61  ;;  %4203 = vset.pattern.permute.xlu1 %v6720_v21  ;;  %v2421_v17 = vmul.f32 %v4227_v27, %v2324_v23  ;;  %v2265_v27 = vmul.f32 %v5921_v59, %v5750_v28 }
 0x4cb   : >> { %v2434_v45 = vpop.permute.xlu1 %2433  ;;  %2833 = vperm.xlu1 %4203, %v5849_v5   ;;  %v2591_v22 = vmul.f32 %v2580_v32, %v6041_v36  ;;  %vm2401_vm11 = vcmp.lt.f32.partialorder %v2389_v61, 0.0  ;;  %4230 = vpow2.f32 %v2210_v37  ;;  %v2366_v61 = vmul.f32 %v5941_v49, %v5750_v28 }
 0x4cc   : >> { %v2348_v48 = vsel %vm1163_vm5, %v2344_v11, 0.0  ;;  %v2397_v52 = vmax.f32 %v2393_v7, 1e-12  ;;  %v2315_v7 = vmul.f32 1.442695, %v2265_v27  ;;  %4232 = vpow2.f32 %v2616_v20 }
 0x4cd   : >> { %v6049_v23 = vadd.f32 %v2348_v48, %v2347_v56  ;;  %v2717_v56 = vmul.f32 1.442695, %v2668_v39  ;;  %v2595_v53 = vand.u32 2147483647, %v2591_v22  ;;  %vm2603_vm13 = vcmp.lt.f32.partialorder %v2591_v22, 0.0 }
 0x4ce   : >> { %v2405_v29 = vsub.f32 0.0, %v2397_v52  ;;  %4234 = vpow2.f32 %v2315_v7 }
 0x4cf   : >> { %4205 = vset.pattern.permute.xlu1 %v6718_v33  ;;  %v2448_v33 = vsel %vm1163_vm5, %v6000_v35, 0.0  ;;  %4236 = vpow2.f32 %v2717_v56  ;;  %v2599_v37 = vmax.f32 %v2595_v53, 1e-12 }
 0x4d0   : >> { %v2409_v18 = vsel %vm2401_vm11, %v2405_v29, %v2397_v52  ;;  %v2479_v3 = vpop.permute.xlu1 %2478  ;;  %2740 = vperm.xlu1 %4205, %v5856_v60  }
 0x4d1   : >> { %v2425_v11 = vadd.f32 %v2421_v17, %v2409_v18  ;;  %v2490_v48 = vmul.f32 %v2479_v3, %v5970_v2  ;;  %v2607_v18 = vsub.f32 0.0, %v2599_v37 }
 0x4d3   : >> { %v2445_v62 = vmul.f32 %v2434_v45, %v2425_v11  ;;  %v2522_v34 = vmul.f32 %v4229_v26, %v2425_v11  ;;  %v2494_v57 = vand.u32 2147483647, %v2490_v48  ;;  %vm2502_vm12 = vcmp.lt.f32.partialorder %v2490_v48, 0.0 }
 0x4d4   : >> { %4206 = vset.pattern.permute.xlu1 %v6717_v63  ;;  %v2157_v11 = vmul.f32 %v5913_v24, %v5752_v44 }
 0x4d5   : >> { %v2449_v29 = vsel %vm1163_vm5, %v2445_v62, 0.0  ;;  %v2175_v52 = vpop.permute.xlu1 %2174  ;;  %2934 = vperm.xlu1 %4206, %v5849_v5   ;;  %v2498_v45 = vmax.f32 %v2494_v57, 1e-12  ;;  %v4231_v27 = vpop.eup %4230  ;;  %v2416_v62 = vmul.f32 1.442695, %v2366_v61 }
 0x4d6   : >> { %v6064_v17 = vadd.f32 %v2449_v29, %v2448_v33  ;;  %v2184_v20 = vmul.f32 %v2175_v52, %v5931_v0  ;;  %v4233_v26 = vpop.eup %4232  ;;  %v2216_v57 = vmul.f32 %v4406_v31, %v4231_v27  ;;  %v2467_v33 = vmul.f32 %v5950_v43, %v5750_v28 }
 0x4d7   : >> { %v2506_v32 = vsub.f32 0.0, %v2498_v45  ;;  %4238 = vpow2.f32 %v2416_v62  ;;  %v2611_v52 = vsel %vm2603_vm13, %v2607_v18, %v2599_v37 }
 0x4d8   : >> { %v2188_v39 = vand.u32 2147483647, %v2184_v20  ;;  %v4235_v48 = vpop.eup %4234  ;;  %vm2196_vm14 = vcmp.lt.f32.partialorder %v2184_v20, 0.0 }
 0x4d9   : >> { %v2235_v35 = vpop.permute.xlu1 %2234  ;;  %4207 = vset.pattern.permute.xlu1 %v6719_v40  ;;  %v2510_v5 = vsel %vm2502_vm12, %v2506_v32, %v2498_v45  ;;  %v2212_v32 = vmul.f32 1.442695, %v2157_v11 }
 0x4da   : >> { %2643 = vperm.xlu1 %4207, %v5868_v47   ;;  %v2192_v3 = vmax.f32 %v2188_v39, 1e-12  ;;  %v6069_v7 = vadd.f32 %v2522_v34, %v2510_v5  ;;  %v4237_v34 = vpop.eup %4236  ;;  %v2517_v39 = vmul.f32 1.442695, %v2467_v33  ;;  %v2266_v5 = vmul.f32 %v5921_v59, %v5752_v44 }
 0x4db   : >> { %4240 = vpow2.f32 %v2212_v32 }
 0x4dc   : >> { %v2200_v53 = vsub.f32 0.0, %v2192_v3  ;;  %v2623_v56 = vmul.f32 %v4233_v26, %v6069_v7  ;;  %4242 = vpow2.f32 %v2517_v39  ;;  %v2317_v11 = vmul.f32 1.442695, %v2266_v5 }
 0x4dd   : >> { %v2391_v39 = vmul.f32 %v5991_v10, %v5980_v19 }
 0x4de   : >> { %v2281_v40 = vpop.permute.xlu1 %2280  ;;  %4208 = vset.pattern.permute.xlu1 %v6720_v21  ;;  %v2204_v29 = vsel %vm2196_vm14, %v2200_v53, %v2192_v3  ;;  %v6080_v24 = vadd.f32 %v2623_v56, %v2611_v52  ;;  %4244 = vpow2.f32 %v2317_v11 }
 0x4df   : >> { %v2289_v31 = vmul.f32 %v2281_v40, %v5956_v13  ;;  %2841 = vperm.xlu1 %4208, %v5856_v60   ;;  %v2220_v61 = vadd.f32 %v2216_v57, %v2204_v29  ;;  %v2367_v29 = vmul.f32 %v5941_v49, %v5752_v44  ;;  %vm2403_vm8 = vcmp.lt.f32.partialorder %v2391_v39, 0.0 }
 0x4e0   : >> { %v6083_v62 = vmul.f32 %v4237_v34, %v6080_v24 }
 0x4e1   : >> { %v2293_v45 = vand.u32 2147483647, %v2289_v31  ;;  %v2244_v22 = vmul.f32 %v2235_v35, %v2220_v61  ;;  %v2321_v27 = vmul.f32 %v4235_v48, %v2220_v61  ;;  %vm2301_vm15 = vcmp.lt.f32.partialorder %v2289_v31, 0.0  ;;  %v4239_v3 = vpop.eup %4238 }
 0x4e2   : >> { %v2337_v20 = vpop.permute.xlu1 %2336 }
 0x4e3   : >> { %v2297_v26 = vmax.f32 %v2293_v45, 1e-12  ;;  %4210 = vset.pattern.permute.xlu1 %v6717_v63  ;;  %v2249_v37 = vsel %vm1163_vm5, %v2244_v22, 0.0  ;;  %v2468_v45 = vmul.f32 %v5950_v43, %v5752_v44  ;;  %v2569_v43 = vmul.f32 %v5962_v25, %v5752_v44 }
 0x4e4   : >> { %2942 = vperm.xlu1 %4210, %v5856_v60   ;;  %v6091_v18 = vadd.f32 %v2249_v37, %v6030_v12  ;;  %v6096_v12 = vpop.permute.xlu0 %2631 }
 0x4e5   : >> { %v2305_v35 = vsub.f32 0.0, %v2297_v26 }
 0x4e7   : >> { %v2309_v57 = vsel %vm2301_vm15, %v2305_v35, %v2297_v26  ;;  %v2382_v53 = vpop.permute.xlu1 %2381  ;;  %v2519_v35 = vmul.f32 1.442695, %v2468_v45 }
 0x4e8   : >> { %v2325_v56 = vadd.f32 %v2321_v27, %v2309_v57  ;;  %v2390_v63 = vmul.f32 %v2382_v53, %v5980_v19  ;;  %4211 = vset.pattern.permute.xlu1 %v6720_v21  ;;  %v2418_v27 = vmul.f32 1.442695, %v2367_v29  ;;  %v2395_v53 = vand.u32 2147483647, %v2391_v39 }
 0x4e9   : >> { %2845 = vperm.xlu1 %4211, %v5868_v47   ;;  %v4241_v47 = vpop.eup %4240 }
 0x4ea   : >> { %v2345_v59 = vmul.f32 %v2337_v20, %v2325_v56  ;;  %v2422_v60 = vmul.f32 %v4239_v3, %v2325_v56  ;;  %v2394_v48 = vand.u32 2147483647, %v2390_v63  ;;  %vm2402_vm0 = vcmp.lt.f32.partialorder %v2390_v63, 0.0  ;;  %v4243_v32 = vpop.eup %4242 }
 0x4eb   : >> { %4246 = vpow2.f32 %v2418_v27  ;;  %v4245_v57 = vpop.eup %4244 }
 0x4ec   : >> { %v2350_v40 = vsel %vm1163_vm5, %v2345_v59, 0.0  ;;  %v2398_v33 = vmax.f32 %v2394_v48, 1e-12  ;;  %v2180_v34 = vpop.permute.xlu1 %2179  ;;  %4248 = vpow2.f32 %v2519_v35 }
 0x4ed   : >> { %v6102_v31 = vadd.f32 %v2350_v40, %v6049_v23  ;;  %v2185_v21 = vmul.f32 %v2180_v34, %v5931_v0  ;;  %v6109_v23 = vpop.permute.xlu0 %2878  ;;  %v2217_v0 = vmul.f32 %v4402_v9, %v4241_v47  ;;  %v2492_v9 = vmul.f32 %v5997_v38, %v5970_v2 }
 0x4ee   : >> { %v2406_v52 = vsub.f32 0.0, %v2398_v33  ;;  %v2399_v34 = vmax.f32 %v2395_v53, 1e-12  ;;  %v2568_v38 = vmul.f32 %v5962_v25, %v5750_v28 }
 0x4ef   : >> { %v2189_v61 = vand.u32 2147483647, %v2185_v21  ;;  %vm2197_vm6 = vcmp.lt.f32.partialorder %v2185_v21, 0.0  ;;  %v2496_v21 = vand.u32 2147483647, %v2492_v9  ;;  %vm2504_vm9 = vcmp.lt.f32.partialorder %v2492_v9, 0.0 }
 0x4f0   : >> { %v2410_v22 = vsel %vm2402_vm0, %v2406_v52, %v2398_v33  ;;  %v2240_v20 = vpop.permute.xlu1 %2239  ;;  %v2620_v33 = vmul.f32 1.442695, %v2569_v43 }
 0x4f1   : >> { %v2426_v49 = vadd.f32 %v2422_v60, %v2410_v22  ;;  %v2193_v26 = vmax.f32 %v2189_v61, 1e-12  ;;  %v6122_v59 = vpop.permute.xlu0 %2890  ;;  %v2407_v22 = vsub.f32 0.0, %v2399_v34 }
 0x4f2   : >> { %4250 = vpow2.f32 %v2620_v33 }
 0x4f3   : >> { %v2201_v5 = vsub.f32 0.0, %v2193_v26  ;;  %v2446_v37 = vmul.f32 %v5982_v1, %v2426_v49  ;;  %v6113_v3 = vmul.f32 %v4243_v32, %v2426_v49  ;;  %v2411_v53 = vsel %vm2403_vm8, %v2407_v22, %v2399_v34 }
 0x4f5   : >> { %v2205_v19 = vsel %vm2197_vm6, %v2201_v5, %v2193_v26  ;;  %v2285_v10 = vpop.permute.xlu1 %2284  ;;  %v2451_v11 = vsel %vm1163_vm5, %v2446_v37, 0.0  ;;  %v4247_v32 = vpop.eup %4246 }
 0x4f6   : >> { %v2221_v56 = vadd.f32 %v2217_v0, %v2205_v19  ;;  %v2290_v1 = vmul.f32 %v2285_v10, %v5956_v13  ;;  %v2452_v63 = vadd.f32 %v2451_v11, %v6064_v17  ;;  %v2766_v17 = vsub.s32 6, %v5904_v50  ;;  %v6129_v27 = vpop.permute.xlu0 %2781 }
 0x4f7   : >> { %v2618_v0 = vmul.f32 1.442695, %v2568_v38 }
 0x4f8   : >> { %v2245_v60 = vmul.f32 %v2240_v20, %v2221_v56  ;;  %v2294_v48 = vand.u32 2147483647, %v2290_v1  ;;  %v2322_v40 = vmul.f32 %v4245_v57, %v2221_v56  ;;  %vm2302_vm7 = vcmp.lt.f32.partialorder %v2290_v1, 0.0 }
 0x4f9   : >> { %v2341_v29 = vpop.permute.xlu1 %2340  ;;  %v2500_v20 = vmax.f32 %v2496_v21, 1e-12  ;;  %v6134_v25 = vrot.slane %v5909_v6, %v2766_v17  ;;  %4252 = vpow2.f32 %v2618_v0  ;;  %v2667_v1 = vmul.f32 %v6035_v58, %v5746_v8 }
 0x4fa   : >> { %v2251_v52 = vsel %vm1163_vm5, %v2245_v60, 0.0  ;;  %v2298_v47 = vmax.f32 %v2294_v48, 1e-12  ;;  %v6139_v60 = vpop.permute.xlu0 %2837  ;;  %v2669_v0 = vmul.f32 %v6035_v58, %v5750_v28 }
 0x4fb   : >> { %v2252_v13 = vadd.f32 %v2251_v52, %v6091_v18  ;;  %v4249_v18 = vpop.eup %4248  ;;  %v2508_v57 = vsub.f32 0.0, %v2500_v20  ;;  %v2768_v39 = vmul.f32 %v6134_v25, %v5746_v8  ;;  %v2715_v9 = vmul.f32 1.442695, %v2667_v1 }
 0x4fc   : >> { %v2306_v61 = vsub.f32 0.0, %v2298_v47  ;;  %v4251_v21 = vpop.eup %4250 }
 0x4fd   : >> { %v2253_v45 = vrot.slane %v2252_v13, 4  ;;  %v2512_v52 = vsel %vm2504_vm9, %v2508_v57, %v2500_v20  ;;  %v2816_v20 = vmul.f32 1.442695, %v2768_v39  ;;  %4254 = vpow2.f32 %v2715_v9 }
 0x4fe   : >> { %v2310_v49 = vsel %vm2302_vm7, %v2306_v61, %v2298_v47  ;;  %v2442_v26 = vpop.permute.xlu1 %2441  ;;  %v6722_v47 = vsub.s32 5, %v5904_v50 }
 0x4ff   : >> { %v2254_v5 = vadd.f32 %v2253_v45, %v2252_v13  ;;  %v2326_v37 = vadd.f32 %v2322_v40, %v2310_v49  ;;  %4256 = vpow2.f32 %v2816_v20 }
 0x500   : >> { %v6150_v38 = vrot.slane %v5927_v30, %v6722_v47 }
 0x501   : >> { %v2346_v35 = vmul.f32 %v2341_v29, %v2326_v37  ;;  %v2423_v43 = vmul.f32 %v4247_v32, %v2326_v37  ;;  %v2255_v19 = vrot.slane %v2254_v5, 2  ;;  %v2546_v29 = vmul.f32 %v6009_v15, %v6069_v7 }
 0x503   : >> { %v2352_v10 = vsel %vm1163_vm5, %v2346_v35, 0.0  ;;  %v2427_v11 = vadd.f32 %v2423_v43, %v2411_v53  ;;  %v2483_v56 = vpop.permute.xlu1 %2482  ;;  %v2256_v61 = vadd.f32 %v2255_v19, %v2254_v5  ;;  %v2550_v7 = vsel %vm1163_vm5, %v2546_v29, 0.0 }
 0x504   : >> { %v2353_v48 = vadd.f32 %v2352_v10, %v6102_v31  ;;  %v2491_v40 = vmul.f32 %v2483_v56, %v5970_v2  ;;  %v2867_v53 = vsub.s32 7, %v5904_v50 }
 0x505   : >> { %v2447_v33 = vmul.f32 %v2442_v26, %v2427_v11  ;;  %v2524_v34 = vmul.f32 %v4249_v18, %v2427_v11  ;;  %v2677_v18 = vpop.permute.xlu0 %2676  ;;  %v2257_v10 = vrot.slane %v2256_v61, 1 }
 0x506   : >> { %v2354_v13 = vrot.slane %v2353_v48, 4  ;;  %v2495_v31 = vand.u32 2147483647, %v2491_v40  ;;  %vm2503_vm10 = vcmp.lt.f32.partialorder %v2491_v40, 0.0  ;;  %v2670_v40 = vmul.f32 %v6035_v58, %v5752_v44 }
 0x507   : >> { %v2453_v2 = vsel %vm1163_vm5, %v2447_v33, 0.0  ;;  %v2528_v45 = vadd.f32 %v2524_v34, %v2512_v52  ;;  %v2531_v32 = vpop.permute.xlu1 %2530  ;;  %v2719_v33 = vmul.f32 1.442695, %v2669_v0 }
 0x508   : >> { %v2355_v22 = vadd.f32 %v2354_v13, %v2353_v48  ;;  %v2454_v49 = vadd.f32 %v2453_v2, %v2452_v63  ;;  %v2499_v26 = vmax.f32 %v2495_v31, 1e-12  ;;  %v2545_v15 = vmul.f32 %v2531_v32, %v6005_v4  ;;  %v4253_v4 = vpop.eup %4252 }
 0x509   : >> { %v6157_v37 = vmul.f32 %v4251_v21, %v2528_v45  ;;  %v6162_v48 = vmul.f32 %v2677_v18, %v6150_v38  ;;  %v2548_v52 = vmul.f32 %v6019_v42, %v2528_v45  ;;  %v2771_v13 = vmul.f32 %v6134_v25, %v5752_v44  ;;  %v2689_v31 = vpop.permute.xlu0 %2688 }
 0x50a   : >> { %v2356_v5 = vrot.slane %v2355_v22, 2  ;;  %v2455_v35 = vrot.slane %v2454_v49, 4  ;;  %v2507_v43 = vsub.f32 0.0, %v2499_v26  ;;  %v2549_v57 = vsel %vm1163_vm5, %v2545_v15, 0.0 }
 0x50b   : >> { %v2551_v63 = vadd.f32 %v2550_v7, %v2549_v57  ;;  %v2539_v19 = vpop.permute.xlu1 %2538  ;;  %v2258_v2 = vadd.f32 %v2257_v10, %v2256_v61  ;;  %4258 = vpow2.f32 %v2719_v33  ;;  %v2721_v7 = vmul.f32 1.442695, %v2670_v40 }
 0x50c   : >> { %v2357_v11 = vadd.f32 %v2356_v5, %v2355_v22  ;;  %v2456_v56 = vadd.f32 %v2455_v35, %v2454_v49  ;;  %v2511_v1 = vsel %vm2503_vm10, %v2507_v43, %v2499_v26  ;;  %v2769_v22 = vmul.f32 %v6134_v25, %v5748_v51 }
 0x50d   : >> { %v2527_v39 = vadd.f32 %v6113_v3, %v2511_v1  ;;  %v2695_v49 = vand.u32 2147483647, %v6162_v48  ;;  %v6179_v61 = vmul.f32 %v2689_v31, %v6150_v38  ;;  %v2554_v20 = vsel %vm1163_vm5, %v2548_v52, 0.0 }
 0x50e   : >> { %v2358_v34 = vrot.slane %v2357_v11, 1  ;;  %v2457_v29 = vrot.slane %v2456_v56, 2  ;;  %v2822_v18 = vmul.f32 1.442695, %v2771_v13  ;;  %v6183_v5 = vrot.slane %v5909_v6, %v2867_v53 }
 0x50f   : >> { %v2547_v21 = vmul.f32 %v2539_v19, %v2527_v39  ;;  %v6168_v47 = vmul.f32 %v4253_v4, %v2527_v39  ;;  %v2818_v19 = vmul.f32 1.442695, %v2769_v22  ;;  %v6186_v4 = vrot.slane %v5927_v30, %v2867_v53  ;;  %v4255_v39 = vpop.eup %4254 }
 0x510   : >> { %v2359_v32 = vadd.f32 %v2358_v34, %v2357_v11  ;;  %v2458_v3 = vadd.f32 %v2457_v29, %v2456_v56  ;;  %v2576_v9 = vpop.permute.xlu1 %2575  ;;  %v2699_v10 = vmax.f32 %v2695_v49, 1e-12  ;;  %v6192_v56 = vrot.slane %v5927_v30, %v2766_v17  ;;  %v4257_v53 = vpop.eup %4256 }
 0x511   : >> { %v2552_v58 = vsel %vm1163_vm5, %v2547_v21, 0.0  ;;  %v2590_v26 = vmul.f32 %v2576_v9, %v6041_v36  ;;  %4260 = vpow2.f32 %v2721_v7  ;;  %v2698_v33 = vand.u32 2147483647, %v6179_v61 }
 0x512   : >> { %v2966_v42 = vsel %vm1040_vm4, %v2258_v2, %v2359_v32  ;;  %v2459_v45 = vrot.slane %v2458_v3, 1  ;;  %v2553_v15 = vadd.f32 %v2552_v58, %v2551_v63  ;;  %4262 = vpow2.f32 %v2822_v18 }
 0x513   : >> { %v2594_v0 = vand.u32 2147483647, %v2590_v26  ;;  %vm2602_vm11 = vcmp.lt.f32.partialorder %v2590_v26, 0.0  ;;  %4264 = vpow2.f32 %v2818_v19  ;;  %v2870_v50 = vmul.f32 %v6183_v5, %v5748_v51 }
 0x514   : >> { %v2460_v35 = vadd.f32 %v2459_v45, %v2458_v3  ;;  %v2555_v43 = vadd.f32 %v2554_v20, %v2553_v15  ;;  %v2584_v57 = vpop.permute.xlu1 %2583  ;;  %v2707_v30 = vsub.f32 0.0, %v2699_v10  ;;  %v6201_v31 = vmul.f32 %v6129_v27, %v6192_v56 }
 0x515   : >> { %v2598_v63 = vmax.f32 %v2594_v0, 1e-12  ;;  %v2592_v11 = vmul.f32 %v2584_v57, %v6041_v36  ;;  %v2770_v3 = vmul.f32 %v6134_v25, %v5750_v28  ;;  %v4259_v9 = vpop.eup %4258  ;;  %vm2703_vm12 = vcmp.lt.f32.partialorder %v6162_v48, 0.0 }
 0x516   : >> { %v2967_v1 = vsel %vm952_vm3, %v2966_v42, %v2460_v35  ;;  %v2556_v6 = vrot.slane %v2555_v43, 4  ;;  %v2702_v22 = vmax.f32 %v2698_v33, 1e-12  ;;  %v2711_v7 = vsel %vm2703_vm12, %v2707_v30, %v2699_v10 }
 0x517   : >> { %v2606_v34 = vsub.f32 0.0, %v2598_v63  ;;  %v2596_v29 = vand.u32 2147483647, %v2592_v11  ;;  %vm2604_vm13 = vcmp.lt.f32.partialorder %v2592_v11, 0.0  ;;  %v2820_v33 = vmul.f32 1.442695, %v2770_v3 }
 0x518   : >> { %v2557_v40 = vadd.f32 %v2556_v6, %v2555_v43  ;;  %v2588_v21 = vpop.permute.xlu1 %2587  ;;  %v2919_v43 = vmul.f32 1.442695, %v2870_v50  ;;  %v2710_v11 = vsub.f32 0.0, %v2702_v22  ;;  %vm2706_vm15 = vcmp.lt.f32.partialorder %v6179_v61, 0.0 }
 0x519   : >> { %v2610_v17 = vsel %vm2602_vm11, %v2606_v34, %v2598_v63  ;;  %v2600_v52 = vmax.f32 %v2596_v29, 1e-12  ;;  %v2593_v13 = vmul.f32 %v2588_v21, %v6041_v36  ;;  %v2797_v29 = vand.u32 2147483647, %v6201_v31 }
 0x51a   : >> { %v2558_v2 = vrot.slane %v2557_v40, 2  ;;  %v2626_v32 = vadd.f32 %v6013_v41, %v2610_v17  ;;  %4266 = vpow2.f32 %v2919_v43  ;;  %v2871_v17 = vmul.f32 %v6183_v5, %v5750_v28  ;;  %v6732_v28 = vld [vmem:[#allocation26_spill] sm:$0xff] (%p2069_p8) }
 0x51b   : >> { %v2608_v49 = vsub.f32 0.0, %v2600_v52  ;;  %v2597_v58 = vand.u32 2147483647, %v2593_v13  ;;  %vm2605_vm14 = vcmp.lt.f32.partialorder %v2593_v13, 0.0  ;;  %4268 = vpow2.f32 %v2820_v33 }
 0x51c   : >> { %v2559_v26 = vadd.f32 %v2558_v2, %v2557_v40  ;;  %v2636_v42 = vpop.permute.xlu1 %2635  ;;  %v2646_v36 = vmul.f32 %v6096_v12, %v2626_v32  ;;  %v2723_v45 = vmul.f32 %v4255_v39, %v2626_v32  ;;  %v4261_v12 = vpop.eup %4260  ;;  %v2801_v32 = vmax.f32 %v2797_v29, 1e-12 }
 0x51d   : >> { %v2601_v27 = vmax.f32 %v2597_v58, 1e-12  ;;  %v2647_v15 = vmul.f32 %v2636_v42, %v6080_v24  ;;  %v2612_v41 = vsel %vm2604_vm13, %v2608_v49, %v2600_v52  ;;  %v4263_v63 = vpop.eup %4262  ;;  %v6238_v52 = vmul.f32 %v6109_v23, %v6186_v4 }
 0x51e   : >> { %v2560_v20 = vrot.slane %v2559_v26, 1  ;;  %v2650_v25 = vsel %vm1163_vm5, %v2646_v36, 0.0  ;;  %v6210_v0 = vadd.f32 %v2723_v45, %v2711_v7  ;;  %v6213_v48 = vadd.f32 %v6168_v47, %v2612_v41  ;;  %v4265_v34 = vpop.eup %4264 }
 0x51f   : >> { %v2609_v18 = vsub.f32 0.0, %v2601_v27  ;;  %v2651_v35 = vsel %vm1163_vm5, %v2647_v15, 0.0  ;;  %v2869_v47 = vmul.f32 %v6183_v5, %v5746_v8  ;;  %v2921_v58 = vmul.f32 1.442695, %v2871_v17  ;;  %v6731_v8 = vld [vmem:[#allocation27_spill] sm:$0xff] (%p2069_p8) }
 0x520   : >> { %v2561_v57 = vadd.f32 %v2560_v20, %v2559_v26  ;;  %v6216_v19 = vadd.f32 %v2651_v35, %v2650_v25  ;;  %v6219_v24 = vmul.f32 %v4257_v53, %v6210_v0  ;;  %v2725_v10 = vmul.f32 %v4259_v9, %v6213_v48 }
 0x521   : >> { %v2681_v6 = vpop.permute.xlu1 %2680  ;;  %v2613_v39 = vsel %vm2605_vm14, %v2609_v18, %v2601_v27  ;;  %v2917_v2 = vmul.f32 1.442695, %v2869_v47  ;;  %v2872_v26 = vmul.f32 %v6183_v5, %v5752_v44  ;;  %v2809_v42 = vsub.f32 0.0, %v2801_v32 }
 0x522   : >> { %v6226_v40 = vsel %vm864_vm2, %v2967_v1, %v2561_v57  ;;  %v2692_v21 = vmul.f32 %v2681_v6, %v6150_v38  ;;  %v6230_v53 = vadd.f32 %v6157_v37, %v2613_v39  ;;  %v2714_v1 = vsel %vm2706_vm15, %v2710_v11, %v2702_v22 }
 0x523   : >> { %4270 = vpow2.f32 %v2917_v2  ;;  %v2897_v22 = vand.u32 2147483647, %v6238_v52  ;;  %v2923_v41 = vmul.f32 1.442695, %v2872_v26  ;;  %vm2805_vm6 = vcmp.lt.f32.partialorder %v6201_v31, 0.0 }
 0x524   : >> { %v2696_v50 = vand.u32 2147483647, %v2692_v21  ;;  %v2726_v30 = vmul.f32 %v4261_v12, %v6230_v53  ;;  %vm2704_vm0 = vcmp.lt.f32.partialorder %v2692_v21, 0.0  ;;  %4272 = vpow2.f32 %v2921_v58  ;;  %v4267_v5 = vpop.eup %4266 }
 0x525   : >> { %v2685_v13 = vpop.permute.xlu1 %2684  ;;  %v2901_v18 = vmax.f32 %v2897_v22, 1e-12  ;;  %v2813_v35 = vsel %vm2805_vm6, %v2809_v42, %v2801_v32  ;;  %v4269_v57 = vpop.eup %4268  ;;  %4274 = vpow2.f32 %v2923_v41  ;;  %vm2905_vm9 = vcmp.lt.f32.partialorder %v6238_v52, 0.0 }
 0x526   : >> { %v2700_v37 = vmax.f32 %v2696_v50, 1e-12  ;;  %v2693_v3 = vmul.f32 %v2685_v13, %v6150_v38  ;;  %v6241_v9 = vadd.f32 %v2726_v30, %v2714_v1  ;;  %vm2969_vm15 = vcmask 1043456  }
 0x527   : >> { %v2909_v33 = vsub.f32 0.0, %v2901_v18  ;;  %vm2973_vm6 = vcmask 1045504   ;;  %v3661_v51 = vmul.f32 (%p2069_p8), -1.442695, %v6731_v8  ;;  %v3662_v44 = vmul.f32 (%p2069_p8), -1.442695, %v6732_v28 }
 0x528   : >> { %v2708_v61 = vsub.f32 0.0, %v2700_v37  ;;  %v2697_v49 = vand.u32 2147483647, %v2693_v3  ;;  %v6246_v23 = vmul.f32 %v4263_v63, %v6241_v9  ;;  %vm2705_vm7 = vcmp.lt.f32.partialorder %v2693_v3, 0.0 }
 0x529   : >> { %v2896_v63 = vmul.f32 %v6122_v59, %v6186_v4  ;;  %v2913_v58 = vsel %vm2905_vm9, %v2909_v33, %v2901_v18  ;;  %v2737_v18 = vpop.permute.xlu0 %2736 }
 0x52a   : >> { %v2712_v36 = vsel %vm2704_vm0, %v2708_v61, %v2700_v37  ;;  %v2701_v45 = vmax.f32 %v2697_v49, 1e-12  ;;  %v2778_v27 = vpop.permute.xlu1 %2777  ;;  %vm2971_vm0 = vcmask 1044480  }
 0x52b   : >> { %v2792_v38 = vmul.f32 %v2778_v27, %v6192_v56  ;;  %v6251_v15 = vadd.f32 %v6083_v62, %v2712_v36  ;;  %v2900_v30 = vand.u32 2147483647, %v2896_v63  ;;  %vm2908_vm12 = vcmp.lt.f32.partialorder %v2896_v63, 0.0 }
 0x52c   : >> { %v2709_v7 = vsub.f32 0.0, %v2701_v45 }
 0x52d   : >> { %v2796_v20 = vand.u32 2147483647, %v2792_v38  ;;  %v2825_v25 = vmul.f32 %v4265_v34, %v6251_v15  ;;  %vm2804_vm8 = vcmp.lt.f32.partialorder %v2792_v38, 0.0  ;;  %v4271_v50 = vpop.eup %4270  ;;  %v2904_v3 = vmax.f32 %v2900_v30, 1e-12 }
 0x52e   : >> { %v2786_v43 = vpop.permute.xlu1 %2785  ;;  %v2713_v12 = vsel %vm2705_vm7, %v2709_v7, %v2701_v45  ;;  %v4273_v32 = vpop.eup %4272  ;;  %vm2975_vm7 = vcmask 1046528  }
 0x52f   : >> { %v2800_v62 = vmax.f32 %v2796_v20, 1e-12  ;;  %v2794_v11 = vmul.f32 %v2786_v43, %v6192_v56  ;;  %v6258_v6 = vadd.f32 %v2825_v25, %v2813_v35  ;;  %v6260_v47 = vadd.f32 %v2725_v10, %v2713_v12  ;;  %v4275_v38 = vpop.eup %4274 }
 0x530   : >> { %v2912_v52 = vsub.f32 0.0, %v2904_v3 }
 0x531   : >> { %v2808_v31 = vsub.f32 0.0, %v2800_v62  ;;  %v2798_v39 = vand.u32 2147483647, %v2794_v11  ;;  %v2926_v29 = vmul.f32 %v4267_v5, %v6258_v6  ;;  %v2826_v21 = vmul.f32 %v4269_v57, %v6260_v47 }
 0x532   : >> { %v2790_v34 = vpop.permute.xlu1 %2789  ;;  %vm2806_vm10 = vcmp.lt.f32.partialorder %v2794_v11, 0.0  ;;  %v2916_v12 = vsel %vm2908_vm12, %v2912_v52, %v2904_v3  ;;  %v2748_v57 = vmul.f32 %v2737_v18, %v6251_v15 }
 0x533   : >> { %v2802_v59 = vmax.f32 %v2798_v39, 1e-12  ;;  %v2795_v17 = vmul.f32 %v2790_v34, %v6192_v56  ;;  %v2812_v1 = vsel %vm2804_vm8, %v2808_v31, %v2800_v62 }
 0x534   : >> { %v2828_v13 = vadd.f32 %v6219_v24, %v2812_v1  ;;  %v2752_v34 = vsel %vm1163_vm5, %v2748_v57, 0.0 }
 0x535   : >> { %v2810_v10 = vsub.f32 0.0, %v2802_v59  ;;  %v2799_v2 = vand.u32 2147483647, %v2795_v17  ;;  %vm2807_vm11 = vcmp.lt.f32.partialorder %v2795_v17, 0.0 }
 0x536   : >> { %v2925_v37 = vmul.f32 %v4271_v50, %v2828_v13 }
 0x537   : >> { %v2803_v61 = vmax.f32 %v2799_v2, 1e-12  ;;  %v2883_v49 = vpop.permute.xlu1 %2882  ;;  %v2814_v26 = vsel %vm2806_vm10, %v2810_v10, %v2802_v59  ;;  %v2745_v2 = vpop.permute.xlu0 %2744 }
 0x538   : >> { %v2894_v22 = vmul.f32 %v2883_v49, %v6186_v4  ;;  %v6268_v56 = vadd.f32 %v2925_v37, %v2913_v58   ;;  %v6270_v36 = vadd.f32 %v2826_v21, %v2814_v26 }
 0x539   : >> { %v2811_v45 = vsub.f32 0.0, %v2803_v61 }
 0x53a   : >> { %v6723_v42 = vmov %v6268_v56  ;;  %v2898_v24 = vand.u32 2147483647, %v2894_v22  ;;  %v2927_v27 = vmul.f32 %v4273_v32, %v6270_v36  ;;  %vm2906_vm13 = vcmp.lt.f32.partialorder %v2894_v22, 0.0 }
 0x53b   : >> { %v2887_v7 = vpop.permute.xlu1 %2886  ;;  %v2815_v41 = vsel %vm2807_vm11, %v2811_v45, %v2803_v61  ;;  %v2939_v58 = vpop.permute.xlu0 %2938  ;;  %2979 = vst.msk [vmem:[#allocation2] sm:$0xff] (%p2069_p8), %vm1163_vm5, %v6723_v42 }
 0x53c   : >> { %v2902_v5 = vmax.f32 %v2898_v24, 1e-12  ;;  %v2895_v20 = vmul.f32 %v2887_v7, %v6186_v4  ;;  %v6275_v25 = vadd.f32 %v6246_v23, %v2815_v41 }
 0x53e   : >> { %v2910_v56 = vsub.f32 0.0, %v2902_v5  ;;  %v2899_v35 = vand.u32 2147483647, %v2895_v20  ;;  %v2928_v43 = vmul.f32 %v4275_v38, %v6275_v25  ;;  %vm2907_vm14 = vcmp.lt.f32.partialorder %v2895_v20, 0.0 }
 0x540   : >> { %v2914_v62 = vsel %vm2906_vm13, %v2910_v56, %v2902_v5  ;;  %v2903_v11 = vmax.f32 %v2899_v35, 1e-12  ;;  %v2733_v31 = vpop.permute.xlu1 %2732  ;;  %v6279_v39 = vadd.f32 %v2928_v43, %v2916_v12  }
 0x541   : >> { %v2747_v4 = vmul.f32 %v2733_v31, %v6210_v0  ;;  %v6282_v17 = vadd.f32 %v2926_v29, %v2914_v62   ;;  %v2849_v0 = vmul.f32 %v6139_v60, %v6258_v6 }
 0x542   : >> { %v2911_v33 = vsub.f32 0.0, %v2903_v11  ;;  %2982 = vst.msk [vmem:[#allocation2 + $0x18] sm:$0xff] (%p2069_p8), %vm1163_vm5, %v6279_v39 }
 0x543   : >> { %v6724_v23 = vmov %v6282_v17  ;;  %v2751_v63 = vsel %vm1163_vm5, %v2747_v4, 0.0  ;;  %v2853_v37 = vsel %vm1163_vm5, %v2849_v0, 0.0 }
 0x544   : >> { %v2753_v21 = vadd.f32 %v2752_v34, %v2751_v63  ;;  %v2915_v50 = vsel %vm2907_vm14, %v2911_v33, %v2903_v11  ;;  %v2950_v22 = vmul.f32 %v2939_v58, %v6724_v23  ;;  %v2947_v11 = vpop.permute.xlu0 %2946  ;;  %2980 = vst.msk [vmem:[#allocation2 + $0x8] sm:$0xff] (%p2069_p8), %vm1163_vm5, %v6724_v23 }
 0x545   : >> { %v2640_v30 = vpop.permute.xlu1 %2639  ;;  %v6286_v31 = vadd.f32 %v2927_v27, %v2915_v50  }
 0x546   : >> { %v2648_v59 = vmul.f32 %v2640_v30, %v6213_v48  ;;  %v2750_v48 = vmul.f32 %v2745_v2, %v6241_v9  ;;  %v2954_v27 = vsel %vm1163_vm5, %v2950_v22, 0.0 }
 0x547   : >> { %v6725_v15 = vmov %v6286_v31 }
 0x548   : >> { %v2653_v1 = vsel %vm1163_vm5, %v2648_v59, 0.0  ;;  %v2756_v6 = vsel %vm1163_vm5, %v2750_v48, 0.0  ;;  %2981 = vst.msk [vmem:[#allocation2 + $0x10] sm:$0xff] (%p2069_p8), %vm1163_vm5, %v6725_v15 }
 0x549   : >> { %v2654_v10 = vadd.f32 %v2653_v1, %v6216_v19 }
 0x54a   : >> { %v2834_v29 = vpop.permute.xlu1 %2833 }
 0x54b   : >> { %v2848_v17 = vmul.f32 %v2834_v29, %v2828_v13 }
 0x54d   : >> { %v2852_v32 = vsel %vm1163_vm5, %v2848_v17, 0.0 }
 0x54e   : >> { %v2854_v3 = vadd.f32 %v2853_v37, %v2852_v32 }
 0x54f   : >> { %v2741_v61 = vpop.permute.xlu1 %2740 }
 0x550   : >> { %v2749_v49 = vmul.f32 %v2741_v61, %v6260_v47 }
 0x552   : >> { %v2754_v26 = vsel %vm1163_vm5, %v2749_v49, 0.0 }
 0x553   : >> { %v2755_v19 = vadd.f32 %v2754_v26, %v2753_v21 }
 0x554   : >> { %v2935_v60 = vpop.permute.xlu1 %2934 }
 0x555   : >> { %v2949_v13 = vmul.f32 %v2935_v60, %v6723_v42  ;;  %v2757_v45 = vadd.f32 %v2756_v6, %v2755_v19 }
 0x557   : >> { %v2953_v24 = vsel %vm1163_vm5, %v2949_v13, 0.0  ;;  %v2758_v38 = vrot.slane %v2757_v45, 4 }
 0x558   : >> { %v2955_v47 = vadd.f32 %v2954_v27, %v2953_v24  ;;  %v3657_v24 = vmul.f32 (%p2069_p8), -1.442695, %v4734_v16  ;;  %v3659_v27 = vmul.f32 (%p2069_p8), -1.442695, %v4766_v46 }
 0x559   : >> { %v2644_v52 = vpop.permute.xlu1 %2643  ;;  %v2759_v7 = vadd.f32 %v2758_v38, %v2757_v45  ;;  %v3658_v38 = vmul.f32 (%p2069_p8), -1.442695, %v4731_v14 }
 0x55a   : >> { %v2649_v9 = vmul.f32 %v2644_v52, %v6230_v53  ;;  %v2952_v53 = vmul.f32 %v2947_v11, %v6279_v39  ;;  %4276 = vpow2.f32 (%p2069_p8), %v3657_v24  ;;  %v6736_v11 = vld [vmem:[#allocation30_spill] sm:$0xff] (%p2069_p8)  ;;  %v6739_v24 = vld [vmem:[#allocation37_spill] sm:$0xff] (%p2069_p8) }
 0x55b   : >> { %v2760_v20 = vrot.slane %v2759_v7, 2  ;;  %4278 = vpow2.f32 (%p2069_p8), %v3659_v27  ;;  %v3671_v27 = vmul.f32 (%p2069_p8), -1.442695, %v6739_v24 }
 0x55c   : >> { %v2655_v41 = vsel %vm1163_vm5, %v2649_v9, 0.0  ;;  %v2958_v59 = vsel %vm1163_vm5, %v2952_v53, 0.0  ;;  %v6726_v9 = vmov %v6279_v39  ;;  %4280 = vpow2.f32 (%p2069_p8), %v3658_v38  ;;  %v3231_v39 = vld [vmem:[%s6540_s10 + $0x8] sm:$0xff] (%p2069_p8) }
 0x55d   : >> { %v2656_v5 = vadd.f32 %v2655_v41, %v2654_v10  ;;  %v2761_v57 = vadd.f32 %v2760_v20, %v2759_v7  ;;  %v6733_v9 = vld [vmem:[#allocation29_spill] sm:$0xff] (%p2069_p8)  ;;  %v6734_v7 = vld [vmem:[#allocation28_spill] sm:$0xff] (%p2069_p8)  ;;  %v3232_v41 = vld [vmem:[%s6540_s10 + $0x10] sm:$0xff] (%p2069_p8) }
 0x55e   : >> { %v2842_v18 = vpop.permute.xlu1 %2841 }
 0x55f   : >> { %v2657_v56 = vrot.slane %v2656_v5, 4  ;;  %v2850_v35 = vmul.f32 %v2842_v18, %v6270_v36  ;;  %v2762_v34 = vrot.slane %v2761_v57, 1  ;;  %v3233_v18 = vld [vmem:[%s6540_s10 + $0x18] sm:$0xff] (%p2069_p8) }
 0x561   : >> { %v2658_v43 = vadd.f32 %v2657_v56, %v2656_v5  ;;  %v2855_v12 = vsel %vm1163_vm5, %v2850_v35, 0.0  ;;  %v2763_v29 = vadd.f32 %v2762_v34, %v2761_v57  ;;  %v6729_v56 = vmov %v6723_v42  ;;  %v6735_v57 = vld [vmem:[#allocation31_spill] sm:$0xff] (%p2069_p8) }
 0x562   : >> { %v2856_v62 = vadd.f32 %v2855_v12, %v2854_v3  ;;  %v3663_v42 = vmul.f32 (%p2069_p8), -1.442695, %v6733_v9  ;;  %v3665_v5 = vmul.f32 (%p2069_p8), -1.442695, %v4889_v54  ;;  %v3666_v56 = vmul.f32 (%p2069_p8), -1.442695, %v4886_v55 }
 0x563   : >> { %v2659_v31 = vrot.slane %v2658_v43, 2  ;;  %v2943_v4 = vpop.permute.xlu1 %2942  ;;  %v3900_v35 = vpack.c.bf16 (%p2069_p8), %v3233_v18, %v3232_v41  ;;  %v3235_v12 = vld [vmem:[%s6540_s10 + $0x28] sm:$0xff] (%p2069_p8) }
 0x564   : >> { %v2951_v33 = vmul.f32 %v2943_v4, %v6725_v15  ;;  %v6737_v4 = vld [vmem:[#allocation35_spill] sm:$0xff] (%p2069_p8) }
 0x565   : >> { %v2660_v63 = vadd.f32 %v2659_v31, %v2658_v43  ;;  %v6727_v31 = vmov %v6725_v15  ;;  %v3230_v15 = vld [vmem:[%s6540_s10] sm:$0xff] (%p2069_p8) }
 0x566   : >> { %v2956_v21 = vsel %vm1163_vm5, %v2951_v33, 0.0  ;;  %v3896_v20 = vpack.c.bf16 (%p2069_p8), %v3231_v39, %v3230_v15  ;;  %v3234_v43 = vld [vmem:[%s6540_s10 + $0x20] sm:$0xff] (%p2069_p8)  ;;  %v3668_v31 = vmul.f32 (%p2069_p8), -1.442695, %v6736_v11  ;;  %v3669_v33 = vmul.f32 (%p2069_p8), -1.442695, %v6737_v4 }
 0x567   : >> { %v2661_v50 = vrot.slane %v2660_v63, 1  ;;  %v2957_v30 = vadd.f32 %v2956_v21, %v2955_v47  ;;  %v6730_v47 = vld [vmem:[#allocation25_spill] sm:$0xff] (%p2069_p8)  ;;  %v3904_v53 = vpack.c.bf16 (%p2069_p8), %v3235_v12, %v3234_v43 }
 0x568   : >> { %v2846_v36 = vpop.permute.xlu1 %2845  ;;  %v3660_v52 = vmul.f32 (%p2069_p8), -1.442695, %v6730_v47  ;;  %3897 = vmatprep.subr.bf16.mxu0 (%p2069_p8), %v3896_v20 }
 0x569   : >> { %v2662_v1 = vadd.f32 %v2661_v50, %v2660_v63  ;;  %v2851_v10 = vmul.f32 %v2846_v36, %v6275_v25  ;;  %v2959_v0 = vadd.f32 %v2958_v59, %v2957_v30  ;;  %3899 = vmatpush3.bf16.msra.mxu0 (%p2069_p8), %v3896_v20  ;;  %v4277_v63 = vpop.eup (%p2069_p8), %4276  ;;  %v3236_v36 = vld [vmem:[%s6540_s10 + $0x30] sm:$0xff] (%p2069_p8)  ;;  %v3237_v59 = vld [vmem:[%s6540_s10 + $0x38] sm:$0xff] (%p2069_p8) }
 0x56a   : > { %4282 = vpow2.f32 (%p2069_p8), %v3660_v52  ;;  %3901 = vmatprep.subr.bf16.mxu0 (%p2069_p8), %v3900_v35  ;;  %v4279_v34 = vpop.eup (%p2069_p8), %4278  ;;  %v3086_v21 = vadd.f32 (%p2069_p8), 1.0, %v4277_v63 }
 0x56b   : >> { %v2970_v17 = vsel %vm2969_vm15, %v6226_v40, %v2662_v1  ;;  %v2857_v2 = vsel %vm1163_vm5, %v2851_v10, 0.0  ;;  %v2960_v32 = vrot.slane %v2959_v0, 4  ;;  %4284 = vpow2.f32 (%p2069_p8), %v3661_v51  ;;  %v4281_v50 = vpop.eup (%p2069_p8), %4280  ;;  %v6740_v51 = vld [vmem:[#allocation36_spill] sm:$0xff] (%p2069_p8) }
 0x56c   : >> { %v2858_v37 = vadd.f32 %v2857_v2, %v2856_v62  ;;  %v2972_v3 = vsel %vm2971_vm0, %v2970_v17, %v2763_v29  ;;  %v6728_v17 = vmov %v6724_v23  ;;  %v3664_v23 = vmul.f32 (%p2069_p8), -1.442695, %v6734_v7 }
 0x56d   : >> { %v2961_v61 = vadd.f32 %v2960_v32, %v2959_v0  ;;  %4286 = vpow2.f32 (%p2069_p8), %v3662_v44  ;;  %v3667_v62 = vmul.f32 (%p2069_p8), -1.442695, %v6735_v57  ;;  %3903 = vmatpush3.bf16.msra.mxu0 (%p2069_p8), %v3900_v35  ;;  %v3088_v30 = vadd.f32 (%p2069_p8), 1.0, %v4279_v34 }
 0x56e   : >> { %v2859_v49 = vrot.slane %v2858_v37, 4  ;;  %4288 = vpow2.f32 (%p2069_p8), %v3663_v42  ;;  %3905 = vmatprep.subr.bf16.mxu0 (%p2069_p8), %v3904_v53  ;;  %v3087_v10 = vadd.f32 (%p2069_p8), 1.0, %v4281_v50  ;;  %v3908_v0 = vpack.c.bf16 (%p2069_p8), %v3237_v59, %v3236_v36 }
 0x56f   : >> { %v2962_v48 = vrot.slane %v2961_v61, 2  ;;  %4290 = vpow2.f32 (%p2069_p8), %v3664_v23  ;;  %v3672_v44 = vmul.f32 (%p2069_p8), -1.442695, %v6740_v51 }
 0x570   : >> { %v2860_v58 = vadd.f32 %v2859_v49, %v2858_v37  ;;  %4292 = vpow2.f32 (%p2069_p8), %v3665_v5 }
 0x571   : >> { %v2963_v26 = vadd.f32 %v2962_v48, %v2961_v61  ;;  %4294 = vpow2.f32 (%p2069_p8), %v3666_v56  ;;  %3907 = vmatpush3.bf16.msra.mxu0 (%p2069_p8), %v3904_v53 }
 0x572   : >> { %v2861_v19 = vrot.slane %v2860_v58, 2  ;;  %4296 = vpow2.f32 (%p2069_p8), %v3667_v62  ;;  %3909 = vmatprep.subr.bf16.mxu0 (%p2069_p8), %v3908_v0 }
 0x573   : >> { %v2964_v60 = vrot.slane %v2963_v26, 1  ;;  %4298 = vpow2.f32 (%p2069_p8), %v3668_v31 }
 0x574   : >> { %v2862_v22 = vadd.f32 %v2861_v19, %v2860_v58  ;;  %4300 = vpow2.f32 (%p2069_p8), %v3669_v33  ;;  %v4283_v1 = vpop.eup (%p2069_p8), %4282 }
 0x575   : >> { %v2965_v13 = vadd.f32 %v2964_v60, %v2963_v26  ;;  %4302 = vrcp.f32 (%p2069_p8), %v3086_v21  ;;  %v4285_v29 = vpop.eup (%p2069_p8), %4284  ;;  %v3089_v17 = vadd.f32 (%p2069_p8), 1.0, %v4283_v1  ;;  %3911 = vmatpush3.bf16.msra.mxu0 (%p2069_p8), %v3908_v0 }
 0x576   : >> { %v2863_v6 = vrot.slane %v2862_v22, 1  ;;  %2071 = sbr.rel (!%p2069_p8) target bundleno = 911 (0x38f), region = 114  ;;  %4304 = vrcp.f32 (%p2069_p8), %v3088_v30  ;;  %v3090_v32 = vadd.f32 (%p2069_p8), 1.0, %v4285_v29 }
 0x577   : > { %v4287_v2 = vpop.eup (%p2069_p8), %4286  ;;  %4306 = vrcp.f32 (%p2069_p8), %v3087_v10 }
 0x578   : >> { %v2864_v25 = vadd.f32 %v2863_v6, %v2862_v22  ;;  %v4289_v37 = vpop.eup (%p2069_p8), %4288  ;;  %4308 = vrcp.f32 (%p2069_p8), %v3089_v17 }
 0x579   : > { %v4291_v61 = vpop.eup (%p2069_p8), %4290  ;;  %4310 = vrcp.f32 (%p2069_p8), %v3090_v32  ;;  %v3092_v49 = vadd.f32 (%p2069_p8), 1.0, %v4289_v37  ;;  %v6742_v32 = vld [vmem:[#allocation40_spill] sm:$0xff] (%p2069_p8) }
 0x57a   : >> { %v2974_v40 = vsel %vm2973_vm6, %v2972_v3, %v2864_v25  ;;  %v3091_v3 = vadd.f32 (%p2069_p8), 1.0, %v4287_v2  ;;  %v4293_v48 = vpop.eup (%p2069_p8), %4292  ;;  %v3093_v58 = vadd.f32 (%p2069_p8), 1.0, %v4291_v61 }
 0x57b   : >> { %v2976_v45 = vsel %vm2975_vm7, %v2974_v40, %v2965_v13  ;;  %v4295_v26 = vpop.eup (%p2069_p8), %4294  ;;  %v3094_v22 = vadd.f32 (%p2069_p8), 1.0, %v4293_v48  ;;  %v6738_v13 = vld [vmem:[#allocation34_spill] sm:$0xff] (%p2069_p8) }
 0x57c   : >> { %2978 = vst.msk [vmem:[%s2977_s17] sm:$0xff] %vm1163_vm5, %v2976_v45  ;;  %4312 = vrcp.f32 (%p2069_p8), %v3091_v3  ;;  %v4297_v19 = vpop.eup (%p2069_p8), %4296  ;;  %v3095_v6 = vadd.f32 (%p2069_p8), 1.0, %v4295_v26  ;;  %v3670_v40 = vmul.f32 (%p2069_p8), -1.442695, %v6738_v13  ;;  %v6744_v26 = vld [vmem:[#allocation41_spill] sm:$0xff] (%p2069_p8) }
 0x57d   : > { %v4299_v60 = vpop.eup %4298  ;;  %4314 = vrcp.f32 %v3092_v49  ;;  %v3096_v15 = vadd.f32 1.0, %v4297_v19  ;;  %v6743_v49 = vld [vmem:[#allocation33_spill] sm:$0xff] }
 0x57e   : > { %v4301_v25 = vpop.eup %4300  ;;  %4316 = vrcp.f32 %v3093_v58  ;;  %v3097_v5 = vadd.f32 1.0, %v4299_v60 }
 0x57f   : > { %v4303_v45 = vpop.eup %4302  ;;  %4318 = vrcp.f32 %v3094_v22  ;;  %v3098_v56 = vadd.f32 1.0, %v4301_v25 }
 0x580   : > { %v4305_v38 = vpop.eup %4304  ;;  %v3134_v52 = vmul.f32 %v4303_v45, %v4734_v16  ;;  %4320 = vrcp.f32 %v3095_v6  ;;  %v6745_v45 = vld [vmem:[#allocation39_spill] sm:$0xff] }
 0x581   : > { %v4307_v42 = vpop.eup %4306  ;;  %v3136_v23 = vmul.f32 %v4305_v38, %v4766_v46  ;;  %4322 = vpow2.f32 %v3670_v40 }
 0x582   : > { %v4309_v39 = vpop.eup %4308  ;;  %3166 = vrot.lane.b32.xlu0 %v3134_v52, %s4421_s20  ;;  %v3135_v41 = vmul.f32 %v4307_v42, %v4731_v14  ;;  %4324 = vpow2.f32 %v3671_v27  ;;  %v6746_v52 = vld [vmem:[#allocation38_spill] sm:$0xff] }
 0x583   : > { %v4311_v20 = vpop.eup %4310  ;;  %3170 = vrot.lane.b32.xlu1 %v3136_v23, %s4421_s20  ;;  %v3137_v16 = vmul.f32 %v4309_v39, %v6730_v47  ;;  %4326 = vpow2.f32 %v3672_v44  ;;  %v2983_v2 = vld [vmem:[#allocation8] sm:$0xff]  ;;  %v2985_v61 = vld [vmem:[#allocation8 + $0x10] sm:$0xff]  ;;  %v2984_v58 = vld [vmem:[#allocation8 + $0x8] sm:$0xff] }
 0x584   : > { %4328 = vrcp.f32 %v3096_v15  ;;  %v3138_v46 = vmul.f32 %v4311_v20, %v6731_v8  ;;  %v2986_v6 = vld [vmem:[#allocation8 + $0x18] sm:$0xff]  ;;  %v2987_v27 = vld [vmem:[#allocation8 + $0x20] sm:$0xff]  ;;  %v2988_v23 = vld [vmem:[#allocation8 + $0x28] sm:$0xff] }
 0x585   : > { %4330 = vrcp.f32 %v3097_v5  ;;  %v6747_v5 = vld [vmem:[#allocation42_spill] sm:$0xff] }
 0x586   : > { %v4313_v18 = vpop.eup %4312  ;;  %3168 = vrot.lane.b32.xlu0 %v3135_v41, %s4421_s20  ;;  %4332 = vrcp.f32 %v3098_v56 }
 0x587   : > { %v4315_v35 = vpop.eup %4314  ;;  %3172 = vrot.lane.b32.xlu1 %v3137_v16, %s4421_s20  ;;  %v3139_v14 = vmul.f32 %v4313_v18, %v6732_v28  ;;  %v2989_v16 = vld [vmem:[#allocation8 + $0x30] sm:$0xff] }
 0x588   : > { %v4317_v43 = vpop.eup %4316  ;;  %v3140_v47 = vmul.f32 %v4315_v35, %v6733_v9 }
 0x589   : > { %v4319_v12 = vpop.eup %4318  ;;  %v3141_v31 = vmul.f32 %v4317_v43, %v6734_v7  ;;  %v2990_v43 = vld [vmem:[#allocation8 + $0x38] sm:$0xff] }
 0x58a   : > { %3174 = vrot.lane.b32.xlu0 %v3138_v46, %s4421_s20  ;;  %v4321_v62 = vpop.eup %4320  ;;  %v3142_v28 = vmul.f32 %v4319_v12, %v4889_v54  ;;  %v6748_v46 = vld [vmem:[#allocation44_spill] sm:$0xff] }
 0x58b   : > { %3176 = vrot.lane.b32.xlu1 %v3139_v14, %s4421_s20  ;;  %v4323_v33 = vpop.eup %4322  ;;  %v3143_v50 = vmul.f32 %v4321_v62, %v4886_v55 }
 0x58c   : > { %v4325_v8 = vpop.eup %4324  ;;  %v3099_v53 = vadd.f32 1.0, %v4323_v33 }
 0x58d   : > { %v4327_v63 = vpop.eup %4326  ;;  %v3100_v34 = vadd.f32 1.0, %v4325_v8  ;;  %v2991_v8 = vld [vmem:[#allocation8 + $0x40] sm:$0xff] }
 0x58e   : > { %3178 = vrot.lane.b32.xlu0 %v3140_v47, %s4421_s20  ;;  %v4329_v21 = vpop.eup %4328  ;;  %4334 = vrcp.f32 %v3099_v53  ;;  %v3101_v9 = vadd.f32 1.0, %v4327_v63 }
 0x58f   : > { %3180 = vrot.lane.b32.xlu1 %v3141_v31, %s4421_s20  ;;  %v4331_v30 = vpop.eup %4330  ;;  %4336 = vrcp.f32 %v3100_v34  ;;  %v3144_v7 = vmul.f32 %v4329_v21, %v6735_v57  ;;  %v6749_v31 = vld [vmem:[#allocation45_spill] sm:$0xff] }
 0x590   : > { %4338 = vrcp.f32 %v3101_v9  ;;  %v4333_v36 = vpop.eup %4332  ;;  %v3145_v54 = vmul.f32 %v4331_v30, %v6736_v11  ;;  %v6414_v11 = vld [vmem:[%s6539_s9] ss:$0 sm:$0xff] }
 0x591   : > { %v3146_v59 = vmul.f32 %v4333_v36, %v6737_v4  ;;  %v6741_v4 = vld [vmem:[#allocation32_spill] sm:$0xff]  ;;  %v3008_v37 = vmul.f32 %v6414_v11, %v6742_v32  ;;  %v3007_v48 = vmul.f32 %v6414_v11, %v6743_v49  ;;  %v3009_v19 = vmul.f32 %v6414_v11, %v6744_v26  ;;  %v6751_v36 = vld [vmem:[#allocation46_spill] sm:$0xff] }
 0x592   : > { %3182 = vrot.lane.b32.xlu0 %v3142_v28, %s4421_s20  ;;  %v3006_v17 = vmul.f32 %v6414_v11, %v6741_v4  ;;  %v3012_v20 = vmul.f32 %v6414_v11, %v6747_v5  ;;  %v3013_v35 = vmul.f32 %v6414_v11, %v6748_v46  ;;  %v3014_v33 = vmul.f32 %v6414_v11, %v6749_v31  ;;  %v6750_v28 = vld [vmem:[#allocation43_spill] sm:$0xff]  ;;  %v6753_v32 = vld [vmem:[#allocation48_spill] sm:$0xff] }
 0x593   : > { %3184 = vrot.lane.b32.xlu1 %v3143_v50, %s4421_s20  ;;  %v3024_v60 = vadd.f32 %v3008_v37, %v2985_v61  ;;  %v3023_v40 = vadd.f32 %v3007_v48, %v2984_v58  ;;  %v3025_v38 = vadd.f32 %v3009_v19, %v2986_v6  ;;  %v3015_v34 = vmul.f32 %v6414_v11, %v6750_v28  ;;  %v2992_v50 = vld [vmem:[#allocation8 + $0x48] sm:$0xff]  ;;  %v6754_v48 = vld [vmem:[#allocation49_spill] sm:$0xff] }
 0x594   : > { %v3022_v3 = vadd.f32 %v3006_v17, %v2983_v2  ;;  %v3028_v62 = vadd.f32 %v3012_v20, %v2989_v16  ;;  %v3029_v63 = vadd.f32 %v3013_v35, %v2990_v43  ;;  %v3018_v37 = vmul.f32 %v6414_v11, %v6753_v32  ;;  %v2996_v19 = vld [vmem:[#allocation8 + $0x68] sm:$0xff]  ;;  %v3673_v16 = vld [vmem:[%s6541_s11] ss:$0 sm:$0xff] }
 0x595   : > { %v3019_v58 = vmul.f32 %v6414_v11, %v6754_v48  ;;  %v6760_v28 = vld [vmem:[#allocation10_spill] sm:$0xff]  ;;  %v6766_v48 = vld [vmem:[#allocation17_spill] sm:$0xff] }
 0x596   : > { %3186 = vrot.lane.b32.xlu0 %v3144_v7, %s4421_s20  ;;  %v3030_v7 = vadd.f32 %v3014_v33, %v2991_v8 }
 0x597   : > { %3188 = vrot.lane.b32.xlu1 %v3145_v54, %s4421_s20  ;;  %v3016_v54 = vmul.f32 %v6414_v11, %v6751_v36 }
 0x598   : > { %v4335_v55 = vpop.eup %4334 }
 0x599   : > { %v4337_v1 = vpop.eup %4336  ;;  %v3147_v10 = vmul.f32 %v4335_v55, %v6738_v13 }
 0x59a   : > { %3190 = vrot.lane.b32.xlu0 %v3146_v59, %s4421_s20  ;;  %v4339_v0 = vpop.eup %4338  ;;  %v3148_v57 = vmul.f32 %v4337_v1, %v6739_v24  ;;  %v3010_v24 = vmul.f32 %v6414_v11, %v6745_v45  ;;  %v2993_v59 = vld [vmem:[#allocation8 + $0x50] sm:$0xff]  ;;  %v3031_v1 = vadd.f32 %v3015_v34, %v2992_v50 }
 0x59b   : > { %3192 = vrot.lane.b32.xlu1 %v3147_v10, %s4421_s20  ;;  %v3149_v29 = vmul.f32 %v4339_v0, %v6740_v51  ;;  %v3011_v51 = vmul.f32 %v6414_v11, %v6746_v52  ;;  %v6752_v10 = vld [vmem:[#allocation47_spill] sm:$0xff]  ;;  %v3032_v2 = vadd.f32 %v3016_v54, %v2993_v59  ;;  %v6762_v54 = vld [vmem:[#allocation13_spill] sm:$0xff] }
 0x59c   : > { %v3026_v41 = vadd.f32 %v3010_v24, %v2987_v27  ;;  %v3017_v0 = vmul.f32 %v6414_v11, %v6752_v10  ;;  %v3035_v24 = vadd.f32 %v3019_v58, %v2996_v19  ;;  %v6756_v27 = vld [vmem:[#allocation51_spill] sm:$0xff] }
 0x59d   : > { %v3027_v56 = vadd.f32 %v3011_v51, %v2988_v23  ;;  %v2998_v51 = vld [vmem:[#allocation8 + $0x78] sm:$0xff] }
 0x59e   : > { %3194 = vrot.lane.b32.xlu0 %v3148_v57, %s4421_s20 }
 0x59f   : > { %3196 = vrot.lane.b32.xlu1 %v3149_v29, %s4421_s20  ;;  %v2994_v29 = vld [vmem:[#allocation8 + $0x58] sm:$0xff] }
 0x5a0   : > { %v3033_v49 = vadd.f32 %v3017_v0, %v2994_v29 }
 0x5f4   : > { %v3167_v22 = vpop.permute.xlu0 %3166 }
 0x5f5   : > { %v3214_v25 = vmul.f32 %v3167_v22, %v3022_v3  ;;  %v3171_v13 = vpop.permute.xlu1 %3170  ;;  %v2995_v3 = vld [vmem:[#allocation8 + $0x60] sm:$0xff] }
 0x5f6   : > { %v3216_v44 = vmul.f32 %v3171_v13, %v3024_v60  ;;  %v3034_v6 = vadd.f32 %v3018_v37, %v2995_v3 }
 0x5f7   : > { %3848 = vmatprep.mubr.msk.f32.mxu0 %vm1163_vm5, %v3214_v25  ;;  %v6755_v25 = vld [vmem:[#allocation50_spill] sm:$0xff] }
 0x5f8   : > { %v3169_v42 = vpop.permute.xlu0 %3168  ;;  %v3020_v13 = vmul.f32 %v6414_v11, %v6755_v25 }
 0x5f9   : > { %v3215_v15 = vmul.f32 %v3169_v42, %v3023_v40  ;;  %v3173_v39 = vpop.permute.xlu1 %3172  ;;  %v2997_v40 = vld [vmem:[#allocation8 + $0x70] sm:$0xff] }
 0x5fa   : > { %v3217_v18 = vmul.f32 %v3173_v39, %v3025_v38  ;;  %v3021_v38 = vmul.f32 %v6414_v11, %v6756_v27  ;;  %v3036_v42 = vadd.f32 %v3020_v13, %v2997_v40  ;;  %v6768_v13 = vld [vmem:[#allocation19_spill] sm:$0xff] }
 0x5fb   : > { %3849 = vmatmul.mubr.msk.f32.vlgmr.msra.gmra.mrb[8].mxu0 %vm1163_vm5, %v3215_v15 }
 0x5fc   : > { %3851 = vmatprep.mubr.msk.f32.mxu0 %vm1163_vm5, %v3216_v44  ;;  %v3175_v14 = vpop.permute.xlu0 %3174  ;;  %v3037_v39 = vadd.f32 %v3021_v38, %v2998_v51 }
 0x5fd   : > { %v3218_v12 = vmul.f32 %v3175_v14, %v3026_v41  ;;  %v3177_v47 = vpop.permute.xlu1 %3176  ;;  %v6757_v14 = vld [vmem:[#allocation11_spill] sm:$0xff] }
 0x5fe   : > { %v3219_v53 = vmul.f32 %v3177_v47, %v3027_v56 }
 0x5ff   : > { %3852 = vmatmul.mubr.msk.f32.gmra.mrb[10].mxu0 %vm1163_vm5, %v3217_v18 }
 0x600   : > { %3854 = vmatprep.mubr.msk.f32.mxu0 %vm1163_vm5, %v3218_v12  ;;  %v3179_v21 = vpop.permute.xlu0 %3178  ;;  %v6758_v12 = vld [vmem:[#allocation9_spill] sm:$0xff] }
 0x601   : > { %v3220_v9 = vmul.f32 %v3179_v21, %v3028_v62  ;;  %v3181_v30 = vpop.permute.xlu1 %3180 }
 0x602   : > { %v3221_v55 = vmul.f32 %v3181_v30, %v3029_v63 }
 0x603   : > { %3855 = vmatmul.mubr.msk.f32.gmra.mrb[12].mxu0 %vm1163_vm5, %v3219_v53  ;;  %v6759_v53 = vld [vmem:[#allocation12_spill] sm:$0xff] }
 0x604   : > { %3857 = vmatprep.mubr.msk.f32.mxu0 %vm1163_vm5, %v3220_v9  ;;  %v3183_v57 = vpop.permute.xlu0 %3182 }
 0x605   : > { %v3222_v4 = vmul.f32 %v3183_v57, %v3030_v7  ;;  %v3185_v17 = vpop.permute.xlu1 %3184  ;;  %v6761_v7 = vld [vmem:[#allocation14_spill] sm:$0xff]  ;;  %v6763_v57 = vld [vmem:[#allocation16_spill] sm:$0xff] }
 0x606   : > { %v3223_v61 = vmul.f32 %v3185_v17, %v3031_v1 }
 0x607   : > { %3858 = vmatmul.mubr.msk.f32.gmra.mrb[14].mxu0 %vm1163_vm5, %v3221_v55 }
 0x608   : > { %3860 = vmatprep.mubr.msk.f32.mxu0 %vm1163_vm5, %v3222_v4  ;;  %v3187_v26 = vpop.permute.xlu0 %3186  ;;  %v6764_v4 = vld [vmem:[#allocation15_spill] sm:$0xff] }
 0x609   : > { %v3224_v22 = vmul.f32 %v3187_v26, %v3032_v2  ;;  %v3189_v60 = vpop.permute.xlu1 %3188 }
 0x60a   : > { %v3225_v45 = vmul.f32 %v3189_v60, %v3033_v49 }
 0x60b   : > { %3861 = vmatmul.mubr.msk.f32.gmra.mrb[16].mxu0 %vm1163_vm5, %v3223_v61  ;;  %v6765_v61 = vld [vmem:[#allocation18_spill] sm:$0xff] }
 0x60c   : > { %3863 = vmatprep.mubr.msk.f32.mxu0 %vm1163_vm5, %v3224_v22  ;;  %v3191_v52 = vpop.permute.xlu0 %3190 }
 0x60d   : > { %v3226_v44 = vmul.f32 %v3191_v52, %v3034_v6  ;;  %v3193_v23 = vpop.permute.xlu1 %3192  ;;  %v6767_v6 = vld [vmem:[#allocation20_spill] sm:$0xff]  ;;  %v6769_v52 = vld [vmem:[#allocation22_spill] sm:$0xff] }
 0x60e   : > { %v3227_v15 = vmul.f32 %v3193_v23, %v3035_v24 }
 0x60f   : > { %3864 = vmatmul.mubr.msk.f32.gmra.mrb[18].mxu0 %vm1163_vm5, %v3225_v45 }
 0x610   : > { %3866 = vmatprep.mubr.msk.f32.mxu0 %vm1163_vm5, %v3226_v44  ;;  %v3195_v41 = vpop.permute.xlu0 %3194  ;;  %v6770_v44 = vld [vmem:[#allocation21_spill] sm:$0xff] }
 0x611   : > { %v3228_v5 = vmul.f32 %v3195_v41, %v3036_v42  ;;  %v3197_v20 = vpop.permute.xlu1 %3196 }
 0x612   : > { %v3229_v11 = vmul.f32 %v3197_v20, %v3037_v39 }
 0x613   : > { %3867 = vmatmul.mubr.msk.f32.gmra.mrb[20].mxu0 %vm1163_vm5, %v3227_v15 }
 0x614   : > { %3869 = vmatprep.mubr.msk.f32.mxu0 %vm1163_vm5, %v3228_v5  ;;  %v6771_v5 = vld [vmem:[#allocation24_spill] sm:$0xff] }
 0x617   : > { %3870 = vmatmul.mubr.msk.f32.gmra.mrb[22].mxu0 %vm1163_vm5, %v3229_v11  ;;  %v6772_v11 = vld [vmem:[#allocation23_spill] sm:$0xff] }
 0x6ce   : > { %v3850_v18 = vpop.f32.mrb[8].mxu0 }
 0x6cf   : > { %v3365_v56 = vadd.f32 %v3850_v18, %v3673_v16  ;;  %v3359_v46 = vpop.f32.mrb[9].mxu0 }
 0x6d0   : > { %v3360_v35 = vadd.f32 %v3673_v16, %v3359_v46 }
 0x6d1   : > { %v3439_v43 = vadd.f32 %v3365_v56, %v6757_v14 }
 0x6d2   : > { %v3438_v47 = vadd.f32 %v3360_v35, %v6758_v12  ;;  %v3853_v62 = vpop.f32.mrb[10].mxu0 }
 0x6d3   : > { %3455 = vst.msk [vmem:[%s4534_s19 + $0x8] sm:$0xff] %vm495_vm1, %v3439_v43  ;;  %v3375_v31 = vadd.f32 %v3853_v62, %v3673_v16  ;;  %v3369_v33 = vpop.f32.mrb[11].mxu0 }
 0x6d4   : > { %3454 = vst.msk [vmem:[%s4534_s19] sm:$0xff] %vm495_vm1, %v3438_v47  ;;  %v3370_v8 = vadd.f32 %v3673_v16, %v3369_v33 }
 0x6d5   : > { %v3441_v63 = vadd.f32 %v3375_v31, %v6759_v53 }
 0x6d6   : > { %v3440_v34 = vadd.f32 %v3370_v8, %v6760_v28  ;;  %v3856_v21 = vpop.f32.mrb[12].mxu0 }
 0x6d7   : > { %3457 = vst.msk [vmem:[%s4534_s19 + $0x18] sm:$0xff] %vm495_vm1, %v3441_v63  ;;  %v3385_v50 = vadd.f32 %v3856_v21, %v3673_v16  ;;  %v3379_v9 = vpop.f32.mrb[13].mxu0 }
 0x6d8   : > { %3456 = vst.msk [vmem:[%s4534_s19 + $0x10] sm:$0xff] %vm495_vm1, %v3440_v34  ;;  %v3380_v30 = vadd.f32 %v3673_v16, %v3379_v9 }
 0x6d9   : > { %v3443_v36 = vadd.f32 %v3385_v50, %v6761_v7 }
 0x6da   : > { %v3442_v59 = vadd.f32 %v3380_v30, %v6762_v54  ;;  %v3859_v55 = vpop.f32.mrb[14].mxu0 }
 0x6db   : > { %3459 = vst.msk [vmem:[%s4534_s19 + $0x28] sm:$0xff] %vm495_vm1, %v3443_v36  ;;  %v3395_v1 = vadd.f32 %v3859_v55, %v3673_v16  ;;  %v3389_v10 = vpop.f32.mrb[15].mxu0 }
 0x6dc   : > { %3458 = vst.msk [vmem:[%s4534_s19 + $0x20] sm:$0xff] %vm495_vm1, %v3442_v59  ;;  %v3390_v0 = vadd.f32 %v3673_v16, %v3389_v10 }
 0x6dd   : > { %v3445_v29 = vadd.f32 %v3395_v1, %v6763_v57 }
 0x6de   : > { %v3444_v17 = vadd.f32 %v3390_v0, %v6764_v4  ;;  %v3862_v2 = vpop.f32.mrb[16].mxu0 }
 0x6df   : > { %3461 = vst.msk [vmem:[%s4534_s19 + $0x38] sm:$0xff] %vm495_vm1, %v3445_v29  ;;  %v3405_v32 = vadd.f32 %v3862_v2, %v3673_v16  ;;  %v3399_v37 = vpop.f32.mrb[17].mxu0 }
 0x6e0   : > { %3460 = vst.msk [vmem:[%s4534_s19 + $0x30] sm:$0xff] %vm495_vm1, %v3444_v17  ;;  %v3400_v3 = vadd.f32 %v3673_v16, %v3399_v37 }
 0x6e1   : > { %v3447_v49 = vadd.f32 %v3405_v32, %v6765_v61 }
 0x6e2   : > { %v3446_v58 = vadd.f32 %v3400_v3, %v6766_v48  ;;  %v3865_v26 = vpop.f32.mrb[18].mxu0 }
 0x6e3   : > { %3463 = vst.msk [vmem:[%s4534_s19 + $0x48] sm:$0xff] %vm495_vm1, %v3447_v49  ;;  %v3415_v19 = vadd.f32 %v3865_v26, %v3673_v16  ;;  %v3409_v22 = vpop.f32.mrb[19].mxu0 }
 0x6e4   : > { %3462 = vst.msk [vmem:[%s4534_s19 + $0x40] sm:$0xff] %vm495_vm1, %v3446_v58  ;;  %v3410_v60 = vadd.f32 %v3673_v16, %v3409_v22 }
 0x6e5   : > { %v3449_v25 = vadd.f32 %v3415_v19, %v6767_v6 }
 0x6e6   : > { %v3448_v40 = vadd.f32 %v3410_v60, %v6768_v13  ;;  %v3868_v45 = vpop.f32.mrb[20].mxu0 }
 0x6e7   : > { %3465 = vst.msk [vmem:[%s4534_s19 + $0x58] sm:$0xff] %vm495_vm1, %v3449_v25  ;;  %v3425_v24 = vadd.f32 %v3868_v45, %v3673_v16  ;;  %v3419_v27 = vpop.f32.mrb[21].mxu0 }
 0x6e8   : > { %3464 = vst.msk [vmem:[%s4534_s19 + $0x50] sm:$0xff] %vm495_vm1, %v3448_v40  ;;  %v3420_v38 = vadd.f32 %v3673_v16, %v3419_v27 }
 0x6e9   : > { %v3451_v51 = vadd.f32 %v3425_v24, %v6769_v52 }
 0x6ea   : > { %v3450_v42 = vadd.f32 %v3420_v38, %v6770_v44  ;;  %v3871_v23 = vpop.f32.mrb[22].mxu0 }
 0x6eb   : > { %3467 = vst.msk [vmem:[%s4534_s19 + $0x68] sm:$0xff] %vm495_vm1, %v3451_v51  ;;  %v3435_v15 = vadd.f32 %v3871_v23, %v3673_v16  ;;  %v3429_v39 = vpop.f32.mrb[23].mxu0 }
 0x6ec   : > { %3466 = vst.msk [vmem:[%s4534_s19 + $0x60] sm:$0xff] %vm495_vm1, %v3450_v42  ;;  %v3430_v41 = vadd.f32 %v3673_v16, %v3429_v39 }
 0x6ed   : > { %v3453_v20 = vadd.f32 %v3435_v15, %v6771_v5 }
 0x6ee   : > { %v3452_v18 = vadd.f32 %v3430_v41, %v6772_v11 }
 0x6ef   : > { %3469 = vst.msk [vmem:[%s4534_s19 + $0x78] sm:$0xff] %vm495_vm1, %v3453_v20 }
 0x6f0   : > { %3468 = vst.msk [vmem:[%s4534_s19 + $0x70] sm:$0xff] %vm495_vm1, %v3452_v18 }
 0x6f1 PF: > { %s22_s25 = sadd.s32 1, %s4398_s25   ;;  %s6773_s21 = smov %s4390_s23 }
 0x6f2   : > { %p19_p9 = scmp.ge.s32.totalorder %s22_s25, 6   ;;  %s6774_s22 = smov %s4394_s24 }
 0x6f3   : > { %s6775_s23 = smov %s6778_s26  ;;  %s6776_s24 = smov %s6782_s27 }
 0x6f4   :  { %21 = sbr.rel (!%p19_p9) target bundleno = 3 (0x3), region = 125 }

</bundles_post_ra>
